<compile_context>
chip_gen: v7x
topology: tpu7x:2x2x1
jax: 0.10.0
libtpu: 0.0.40
codegen_flags: <defaults>
</compile_context>

<pallas_src>
import functools

import numpy as np
import jax
import jax.numpy as jnp
from jax.experimental import pallas as pl
from jax.experimental.pallas import tpu as pltpu

_EPS = 1e-5
_INV_SQRT2 = 1.0 / np.sqrt(2.0)
_MXU_DTYPE = jnp.bfloat16      # MXU input dtype (accumulation & all elementwise math stay f32)


# ---------------------------------------------------------------------------
# Generation-aware compiler params
# ---------------------------------------------------------------------------
@functools.lru_cache(maxsize=None)
def _vmem_limit_bytes():
    # ~3/4 of physical VMEM: ~96 MiB on v5e/v6e (128 MiB), ~48 MiB on v7x (64 MiB).
    try:
        cap = getattr(pltpu.get_tpu_info(), "vmem_capacity_bytes", None)
        if cap:
            return int(cap) * 3 // 4
    except Exception:
        pass
    return 64 * 1024 * 1024


def _cparams():
    return pltpu.CompilerParams(dimension_semantics=("parallel",),
                                vmem_limit_bytes=_vmem_limit_bytes())


# ---------------------------------------------------------------------------
# In-kernel helpers (traced inline into each fused kernel)
# ---------------------------------------------------------------------------
def _gelu(y):
    # Exact (erf-based) GELU, matching torch.nn.GELU default.  erf lands on the EUP slot.
    return 0.5 * y * (1.0 + jax.lax.erf(y * _INV_SQRT2))


def _inorm_gelu_2d(x, g, b):
    # x: (C, L) f32.  InstanceNorm over L (= H*W, biased variance), affine, GELU.
    mean = jnp.mean(x, axis=-1, keepdims=True)
    xc = x - mean
    var = jnp.mean(xc * xc, axis=-1, keepdims=True)
    y = xc * jax.lax.rsqrt(var + _EPS) * g + b
    return _gelu(y)


def _inorm_gelu_3d(x, g, b):
    # x: (C, H, F) f32; g, b: (C, 1).  InstanceNorm over (H, F), affine, GELU.
    mean = jnp.mean(jnp.mean(x, axis=2, keepdims=True), axis=1, keepdims=True)
    xc = x - mean
    var = jnp.mean(jnp.mean(xc * xc, axis=2, keepdims=True), axis=1, keepdims=True)
    y = xc * jax.lax.rsqrt(var + _EPS) * g[:, :, None] + b[:, :, None]
    return _gelu(y)


def _fill_taps(s_ref, y, masks, H, W):
    # y: (C, H*W) f32 (normalized + GELU'd), masks: (9, H*W) f32 precomputed boundary masks.
    # Writes the 9 shifted+masked taps into rows [t*C, (t+1)*C) of s_ref (cast to MXU dtype).
    # Each tap: one XLU lane-roll + one (C, HW) VPU mask multiply; live ranges end at the store.
    C, HW = y.shape
    t = 0
    for dh in (-1, 0, 1):
        for dw in (-1, 0, 1):
            d = dh * W + dw
            shifted = y if d == 0 else pltpu.roll(y, (-d) % HW, 1)   # shifted[p] = y[p + d]
            if not (dh == 0 and dw == 0):
                shifted = shifted * masks[t:t + 1, :]
            s_ref[pl.ds(t * C, C), :] = shifted.astype(s_ref.dtype)
            t += 1


# ---------------------------------------------------------------------------
# Fused Pallas kernels (one grid step = one batch sample)
# ---------------------------------------------------------------------------
def _tfc1_kernel(x_ref, m_ref, g_ref, b_ref, w_ref, o_ref, s_ref, *, H, W):
    # x_ref: (1, Cin, H*W) -> InstanceNorm + GELU + 3x3 conv (single stacked matmul) -> (1, Cout, H*W)
    y = _inorm_gelu_2d(x_ref[0].astype(jnp.float32), g_ref[...], b_ref[...])
    _fill_taps(s_ref, y, m_ref[...], H, W)
    o_ref[0] = jnp.dot(w_ref[...], s_ref[...],
                       preferred_element_type=jnp.float32).astype(o_ref.dtype)


def _tdf_kernel(x_ref, g1_ref, b1_ref, w1_ref, g2_ref, b2_ref, w2_ref, o_ref):
    # Whole TDF branch fused: IN+GELU -> Linear(fps->hid) -> IN+GELU -> Linear(hid->fps) -> +x.
    _, C, H, W = x_ref.shape
    Fh = w1_ref.shape[1]
    x = x_ref[0].astype(jnp.float32)                               # (C, H, W)
    t = _inorm_gelu_3d(x, g1_ref[...], b1_ref[...])
    t = jnp.dot(t.reshape(C * H, W).astype(_MXU_DTYPE), w1_ref[...],
                preferred_element_type=jnp.float32)                # (C*H, Fh)
    t = _inorm_gelu_3d(t.reshape(C, H, Fh), g2_ref[...], b2_ref[...])
    t = jnp.dot(t.reshape(C * H, Fh).astype(_MXU_DTYPE), w2_ref[...],
                preferred_element_type=jnp.float32)                # (C*H, W)
    o_ref[0] = (x + t.reshape(C, H, W)).astype(o_ref.dtype)


def _tfc2_shortcut_kernel(x2_ref, x0_ref, m_ref, g_ref, b_ref, w_ref, o_ref, s_ref, *, H, W):
    # tfc2 conv on x2 with the 1x1 shortcut of the original block input x0 folded into the SAME
    # contraction: out = [W_conv2 | W_short] @ [taps(IN+GELU(x2)) ; x0].
    C = x2_ref.shape[1]
    Cin0 = x0_ref.shape[1]
    y = _inorm_gelu_2d(x2_ref[0].astype(jnp.float32), g_ref[...], b_ref[...])
    _fill_taps(s_ref, y, m_ref[...], H, W)
    s_ref[pl.ds(9 * C, Cin0), :] = x0_ref[0].astype(s_ref.dtype)
    o_ref[0] = jnp.dot(w_ref[...], s_ref[...],
                       preferred_element_type=jnp.float32).astype(o_ref.dtype)


# ---------------------------------------------------------------------------
# pallas_call wrappers
# ---------------------------------------------------------------------------
def tfc1(x_flat, masks, gamma, beta, w, H, W):
    B, Cin, HW = x_flat.shape
    Cout = w.shape[0]
    return pl.pallas_call(
        functools.partial(_tfc1_kernel, H=H, W=W),
        out_shape=jax.ShapeDtypeStruct((B, Cout, HW), jnp.float32),
        grid=(B,),
        in_specs=[pl.BlockSpec((1, Cin, HW), lambda i: (i, 0, 0)),
                  pl.BlockSpec((9, HW), lambda i: (0, 0)),
                  pl.BlockSpec((Cin, 1), lambda i: (0, 0)),
                  pl.BlockSpec((Cin, 1), lambda i: (0, 0)),
                  pl.BlockSpec((Cout, 9 * Cin), lambda i: (0, 0))],
        out_specs=pl.BlockSpec((1, Cout, HW), lambda i: (i, 0, 0)),
        scratch_shapes=[pltpu.VMEM((9 * Cin, HW), _MXU_DTYPE)],
        compiler_params=_cparams(),
    )(x_flat, masks, gamma, beta, w)


def tdf(x1, g1, b1, w1, g2, b2, w2):
    B, C, H, W = x1.shape
    Fh = w1.shape[1]
    return pl.pallas_call(
        _tdf_kernel,
        out_shape=jax.ShapeDtypeStruct((B, C, H, W), jnp.float32),
        grid=(B,),
        in_specs=[pl.BlockSpec((1, C, H, W), lambda i: (i, 0, 0, 0)),
                  pl.BlockSpec((C, 1), lambda i: (0, 0)),
                  pl.BlockSpec((C, 1), lambda i: (0, 0)),
                  pl.BlockSpec((W, Fh), lambda i: (0, 0)),
                  pl.BlockSpec((C, 1), lambda i: (0, 0)),
                  pl.BlockSpec((C, 1), lambda i: (0, 0)),
                  pl.BlockSpec((Fh, W), lambda i: (0, 0))],
        out_specs=pl.BlockSpec((1, C, H, W), lambda i: (i, 0, 0, 0)),
        compiler_params=_cparams(),
    )(x1, g1, b1, w1, g2, b2, w2)


def tfc2_shortcut(x2_flat, x0_flat, masks, gamma, beta, w2s, H, W):
    B, C, HW = x2_flat.shape
    Cin0 = x0_flat.shape[1]
    Cout = w2s.shape[0]
    K = 9 * C + Cin0
    return pl.pallas_call(
        functools.partial(_tfc2_shortcut_kernel, H=H, W=W),
        out_shape=jax.ShapeDtypeStruct((B, Cout, HW), jnp.float32),
        grid=(B,),
        in_specs=[pl.BlockSpec((1, C, HW), lambda i: (i, 0, 0)),
                  pl.BlockSpec((1, Cin0, HW), lambda i: (i, 0, 0)),
                  pl.BlockSpec((9, HW), lambda i: (0, 0)),
                  pl.BlockSpec((C, 1), lambda i: (0, 0)),
                  pl.BlockSpec((C, 1), lambda i: (0, 0)),
                  pl.BlockSpec((Cout, K), lambda i: (0, 0))],
        out_specs=pl.BlockSpec((1, Cout, HW), lambda i: (i, 0, 0)),
        scratch_shapes=[pltpu.VMEM((K, HW), _MXU_DTYPE)],
        compiler_params=_cparams(),
    )(x2_flat, x0_flat, masks, gamma, beta, w2s)


# ---------------------------------------------------------------------------
# One-time parameter / constant preprocessing (hoisted out of the forward pass)
# ---------------------------------------------------------------------------
def _col(v):
    return jnp.asarray(v, jnp.float32).reshape(-1, 1)


def _conv_masks(H, W):
    # mask[t, h*W + w] = 1 iff (h+dh, w+dw) is inside the image, tap t = (dh+1)*3 + (dw+1).
    hh, ww = np.meshgrid(np.arange(H), np.arange(W), indexing="ij")
    masks = np.empty((9, H * W), np.float32)
    t = 0
    for dh in (-1, 0, 1):
        for dw in (-1, 0, 1):
            valid = ((hh + dh >= 0) & (hh + dh < H) & (ww + dw >= 0) & (ww + dw < W))
            masks[t] = valid.reshape(-1).astype(np.float32)
            t += 1
    return jnp.asarray(masks)


def _pack_conv3x3(w):
    # (3, 3, Cin, Cout) -> (Cout, 9*Cin) with column index t*Cin + ci, tap t = kh*3 + kw.
    cout = w.shape[3]
    w = jnp.transpose(jnp.asarray(w, jnp.float32), (3, 0, 1, 2))
    return w.reshape(cout, -1)


def prepare_params(params, H, W):
    masks = _conv_masks(H, W)
    prepped = []
    for p in params:
        w1 = _pack_conv3x3(p["conv1_w"]).astype(_MXU_DTYPE)                  # (C, 9*Cin)
        w2 = _pack_conv3x3(p["conv2_w"])                                     # (C, 9*C)
        ws = jnp.transpose(jnp.asarray(p["short_w"], jnp.float32))           # (C, Cin0)
        w2s = jnp.concatenate([w2, ws], axis=1).astype(_MXU_DTYPE)           # (C, 9*C + Cin0)
        prepped.append({
            "in1_g": _col(p["in1_g"]), "in1_b": _col(p["in1_b"]), "conv1_w": w1,
            "tdf_in1_g": _col(p["tdf_in1_g"]), "tdf_in1_b": _col(p["tdf_in1_b"]),
            "lin1_w": jnp.asarray(p["lin1_w"], _MXU_DTYPE),
            "tdf_in2_g": _col(p["tdf_in2_g"]), "tdf_in2_b": _col(p["tdf_in2_b"]),
            "lin2_w": jnp.asarray(p["lin2_w"], _MXU_DTYPE),
            "in2_g": _col(p["in2_g"]), "in2_b": _col(p["in2_b"]), "conv2s_w": w2s,
        })
    return masks, prepped


# ---------------------------------------------------------------------------
# MDX forward (stack of TFC-TDF blocks), canonical (B, C, H*W) layout between kernels
# ---------------------------------------------------------------------------
def mdx_forward(x, masks, params):
    # x: (B, C, H, W) NCHW; last dim = fps.  `params` must come from prepare_params().
    B, _, H, W = x.shape
    HW = H * W
    x_flat = x.reshape(B, -1, HW).astype(jnp.float32)
    for p in params:
        C = p["conv1_w"].shape[0]
        # tfc1: IN + GELU + 3x3 conv (one stacked MXU matmul)
        x1_flat = tfc1(x_flat, masks, p["in1_g"], p["in1_b"], p["conv1_w"], H, W)
        # tdf: fully fused branch, residual add inside the kernel
        x2 = tdf(x1_flat.reshape(B, C, H, W),
                 p["tdf_in1_g"], p["tdf_in1_b"], p["lin1_w"],
                 p["tdf_in2_g"], p["tdf_in2_b"], p["lin2_w"])
        # tfc2 + 1x1 shortcut of the block input, shortcut folded into the same contraction
        x_flat = tfc2_shortcut(x2.reshape(B, C, HW), x_flat, masks,
                               p["in2_g"], p["in2_b"], p["conv2s_w"], H, W)
    return x_flat.reshape(B, -1, H, W)


# ---------------------------------------------------------------------------
# Pure-JAX f32 reference (same math, no Pallas) used for verification
# ---------------------------------------------------------------------------
def _ref_in_gelu(x, g, b):
    mean = jnp.mean(x, axis=(2, 3), keepdims=True)
    var = jnp.mean((x - mean) ** 2, axis=(2, 3), keepdims=True)
    y = (x - mean) / jnp.sqrt(var + _EPS) * g[None, :, None, None] + b[None, :, None, None]
    return 0.5 * y * (1.0 + jax.lax.erf(y * _INV_SQRT2))


def _ref_conv3x3(x, w):
    wt = jnp.transpose(w, (3, 2, 0, 1))  # (3,3,Cin,Cout) -> OIHW
    return jax.lax.conv_general_dilated(x, wt, (1, 1), ((1, 1), (1, 1)),
                                        dimension_numbers=('NCHW', 'OIHW', 'NCHW'))


def mdx_forward_ref(x, params):
    for p in params:
        s = jnp.einsum('bchw,co->bohw', x, p["short_w"])
        x = _ref_conv3x3(_ref_in_gelu(x, p["in1_g"], p["in1_b"]), p["conv1_w"])
        t = _ref_in_gelu(x, p["tdf_in1_g"], p["tdf_in1_b"])
        t = jnp.einsum('bchf,fg->bchg', t, p["lin1_w"])
        t = _ref_in_gelu(t, p["tdf_in2_g"], p["tdf_in2_b"])
        t = jnp.einsum('bchf,fg->bchg', t, p["lin2_w"])
        x = x + t
        x = _ref_conv3x3(_ref_in_gelu(x, p["in2_g"], p["in2_b"]), p["conv2_w"])
        x = x + s
    return x


# ---------------------------------------------------------------------------
# Deterministic parameter init (synthetic; shapes follow MDX.__init__)
# ---------------------------------------------------------------------------
def init_params(key, in_channels, channels, num_blocks, fps, bottleneck):
    hidden = fps // bottleneck
    params = []
    c_in = in_channels
    for _ in range(num_blocks):
        key, k0, k1, k2, k3, k4, k5 = jax.random.split(key, 7)
        blk = {
            "in1_g": 1.0 + 0.1 * jax.random.normal(k5, (c_in,), jnp.float32),
            "in1_b": 0.05 * jnp.arange(c_in, dtype=jnp.float32),
            "conv1_w": 0.1 * jax.random.normal(k0, (3, 3, c_in, channels), jnp.float32),
            "tdf_in1_g": jnp.ones((channels,), jnp.float32),
            "tdf_in1_b": jnp.zeros((channels,), jnp.float32),
            "lin1_w": 0.1 * jax.random.normal(k1, (fps, hidden), jnp.float32),
            "tdf_in2_g": jnp.ones((channels,), jnp.float32),
            "tdf_in2_b": jnp.zeros((channels,), jnp.float32),
            "lin2_w": 0.1 * jax.random.normal(k2, (hidden, fps), jnp.float32),
            "in2_g": 1.0 + 0.1 * jax.random.normal(k4, (channels,), jnp.float32),
            "in2_b": jnp.zeros((channels,), jnp.float32),
            "conv2_w": 0.1 * jax.random.normal(k3, (3, 3, channels, channels), jnp.float32),
            "short_w": 0.1 * jax.random.normal(key, (c_in, channels), jnp.float32),
        }
        params.append(blk)
        c_in = channels
    return params


if __name__ == "__main__":
    # Small shapes consistent with the module: NCHW input, last dim = fps (Linear axis).
    B, Cin, C, H, FPS = 2, 4, 8, 8, 16
    NUM_BLOCKS, BOTTLENECK = 2, 4

    key = jax.random.PRNGKey(0)
    kx, kp = jax.random.split(key)
    x = jax.random.normal(kx, (B, Cin, H, FPS), jnp.float32)
    params = init_params(kp, Cin, C, NUM_BLOCKS, FPS, BOTTLENECK)

    # One-time weight/mask preprocessing (hoisted out of the forward pass).
    masks, prepped = prepare_params(params, H, FPS)

    fwd = jax.jit(mdx_forward)
    out = jax.block_until_ready(fwd(x, masks, prepped))
    ref = jax.block_until_ready(mdx_forward_ref(x, params))

    assert out.shape == (B, C, H, FPS)
    # bf16 MXU inputs (f32 accumulation / stats) need a looser tolerance than the pure-f32 path.
    tol = 2e-3 if _MXU_DTYPE == jnp.float32 else 5e-2
    np.testing.assert_allclose(np.asarray(out), np.asarray(ref), rtol=tol, atol=tol)
    print("KERNEL_OK")
</pallas_src>

<mosaic_0001>
module attributes {stable_mosaic.version = 11 : i64} {
  func.func @_tfc1_kernel(%arg0: i32, %arg1: memref<1x4x128xf32, #tpu.memory_space<vmem>>, %arg2: memref<9x128xf32, #tpu.memory_space<vmem>>, %arg3: memref<4x1xf32, #tpu.memory_space<vmem>>, %arg4: memref<4x1xf32, #tpu.memory_space<vmem>>, %arg5: memref<8x36xbf16, #tpu.memory_space<vmem>>, %arg6: memref<1x8x128xf32, #tpu.memory_space<vmem>>, %arg7: memref<36x128xbf16, #tpu.memory_space<vmem>>) attributes {dimension_semantics = [#tpu.dimension_semantics<parallel>], iteration_bounds = array<i64: 2>, scalar_prefetch = 0 : i64, scratch_operands = 1 : i64, tpu.core_type = #tpu.core_type<tc>, window_params = [{transform_indices = @transform_0, window_bounds = array<i64: 1, 4, 128>}, {pipeline_mode = #tpu.pipeline_mode<synchronous>, transform_indices = @transform_1, window_bounds = array<i64: 9, 128>}, {pipeline_mode = #tpu.pipeline_mode<synchronous>, transform_indices = @transform_2, window_bounds = array<i64: 4, 1>}, {pipeline_mode = #tpu.pipeline_mode<synchronous>, transform_indices = @transform_3, window_bounds = array<i64: 4, 1>}, {pipeline_mode = #tpu.pipeline_mode<synchronous>, transform_indices = @transform_4, window_bounds = array<i64: 8, 36>}, {transform_indices = @transform_5, window_bounds = array<i64: 1, 8, 128>}]} {
    %c0 = arith.constant 0 : index
    %c0_0 = arith.constant 0 : index
    %c0_1 = arith.constant 0 : index
    %0 = vector.load %arg1[%c0, %c0_0, %c0_1] : memref<1x4x128xf32, #tpu.memory_space<vmem>>, vector<1x4x128xf32>
    %1 = vector.shape_cast %0 : vector<1x4x128xf32> to vector<4x128xf32>
    %c0_2 = arith.constant 0 : index
    %c0_3 = arith.constant 0 : index
    %2 = vector.load %arg3[%c0_2, %c0_3] : memref<4x1xf32, #tpu.memory_space<vmem>>, vector<4x1xf32>
    %c0_4 = arith.constant 0 : index
    %c0_5 = arith.constant 0 : index
    %3 = vector.load %arg4[%c0_4, %c0_5] : memref<4x1xf32, #tpu.memory_space<vmem>>, vector<4x1xf32>
    %cst = arith.constant dense<0.000000e+00> : vector<4xf32>
    %4 = vector.multi_reduction <add>, %1, %cst [1] : vector<4x128xf32> to vector<4xf32>
    %5 = vector.shape_cast %4 : vector<4xf32> to vector<4x1xf32>
    %cst_6 = arith.constant 1.280000e+02 : f32
    %6 = vector.broadcast %cst_6 : f32 to vector<4x1xf32>
    %7 = arith.divf %5, %6 : vector<4x1xf32>
    %8 = vector.broadcast %7 : vector<4x1xf32> to vector<4x128xf32>
    %9 = arith.subf %1, %8 : vector<4x128xf32>
    %10 = arith.mulf %9, %9 : vector<4x128xf32>
    %cst_7 = arith.constant dense<0.000000e+00> : vector<4xf32>
    %11 = vector.multi_reduction <add>, %10, %cst_7 [1] : vector<4x128xf32> to vector<4xf32>
    %12 = vector.shape_cast %11 : vector<4xf32> to vector<4x1xf32>
    %cst_8 = arith.constant 1.280000e+02 : f32
    %13 = vector.broadcast %cst_8 : f32 to vector<4x1xf32>
    %14 = arith.divf %12, %13 : vector<4x1xf32>
    %cst_9 = arith.constant 9.99999974E-6 : f32
    %15 = vector.broadcast %cst_9 : f32 to vector<4x1xf32>
    %16 = arith.addf %14, %15 : vector<4x1xf32>
    %17 = math.rsqrt %16 : vector<4x1xf32>
    %18 = vector.broadcast %17 : vector<4x1xf32> to vector<4x128xf32>
    %19 = arith.mulf %9, %18 : vector<4x128xf32>
    %20 = vector.broadcast %2 : vector<4x1xf32> to vector<4x128xf32>
    %21 = arith.mulf %19, %20 : vector<4x128xf32>
    %22 = vector.broadcast %3 : vector<4x1xf32> to vector<4x128xf32>
    %23 = arith.addf %21, %22 : vector<4x128xf32>
    %cst_10 = arith.constant 5.000000e-01 : f32
    %24 = vector.broadcast %cst_10 : f32 to vector<4x128xf32>
    %25 = arith.mulf %24, %23 : vector<4x128xf32>
    %cst_11 = arith.constant 0.707106769 : f32
    %26 = vector.broadcast %cst_11 : f32 to vector<4x128xf32>
    %27 = arith.mulf %23, %26 : vector<4x128xf32>
    %28 = math.erf %27 : vector<4x128xf32>
    %cst_12 = arith.constant 1.000000e+00 : f32
    %29 = vector.broadcast %cst_12 : f32 to vector<4x128xf32>
    %30 = arith.addf %29, %28 : vector<4x128xf32>
    %31 = arith.mulf %25, %30 : vector<4x128xf32>
    %c0_13 = arith.constant 0 : index
    %c0_14 = arith.constant 0 : index
    %32 = vector.load %arg2[%c0_13, %c0_14] : memref<9x128xf32, #tpu.memory_space<vmem>>, vector<9x128xf32>
    %c17_i32 = arith.constant 17 : i32
    %33 = tpu.dynamic_rotate %31 by %c17_i32 dim 1 : vector<4x128xf32>, i32 -> vector<4x128xf32>
    %34 = vector.extract_strided_slice %32 {offsets = [0, 0], sizes = [1, 128], strides = [1, 1]} : vector<9x128xf32> to vector<1x128xf32>
    %35 = vector.broadcast %34 : vector<1x128xf32> to vector<4x128xf32>
    %36 = arith.mulf %33, %35 : vector<4x128xf32>
    %37 = arith.truncf %36 : vector<4x128xf32> to vector<4x128xbf16>
    %c0_15 = arith.constant 0 : index
    %c0_16 = arith.constant 0 : index
    %38 = vector.load %arg7[%c0_15, %c0_16] : memref<36x128xbf16, #tpu.memory_space<vmem>>, vector<4x128xbf16>
    tpu.vector_store %arg7[%c0_15, %c0_16], %37 {strides = array<i32>} : memref<36x128xbf16, #tpu.memory_space<vmem>>, vector<4x128xbf16>,
    %c16_i32 = arith.constant 16 : i32
    %39 = tpu.dynamic_rotate %31 by %c16_i32 dim 1 : vector<4x128xf32>, i32 -> vector<4x128xf32>
    %40 = vector.extract_strided_slice %32 {offsets = [1, 0], sizes = [1, 128], strides = [1, 1]} : vector<9x128xf32> to vector<1x128xf32>
    %41 = vector.broadcast %40 : vector<1x128xf32> to vector<4x128xf32>
    %42 = arith.mulf %39, %41 : vector<4x128xf32>
    %43 = arith.truncf %42 : vector<4x128xf32> to vector<4x128xbf16>
    %c4 = arith.constant 4 : index
    %c0_17 = arith.constant 0 : index
    %44 = vector.load %arg7[%c4, %c0_17] : memref<36x128xbf16, #tpu.memory_space<vmem>>, vector<4x128xbf16>
    tpu.vector_store %arg7[%c4, %c0_17], %43 {strides = array<i32>} : memref<36x128xbf16, #tpu.memory_space<vmem>>, vector<4x128xbf16>,
    %c15_i32 = arith.constant 15 : i32
    %45 = tpu.dynamic_rotate %31 by %c15_i32 dim 1 : vector<4x128xf32>, i32 -> vector<4x128xf32>
    %46 = vector.extract_strided_slice %32 {offsets = [2, 0], sizes = [1, 128], strides = [1, 1]} : vector<9x128xf32> to vector<1x128xf32>
    %47 = vector.broadcast %46 : vector<1x128xf32> to vector<4x128xf32>
    %48 = arith.mulf %45, %47 : vector<4x128xf32>
    %49 = arith.truncf %48 : vector<4x128xf32> to vector<4x128xbf16>
    %c8 = arith.constant 8 : index
    %c0_18 = arith.constant 0 : index
    %50 = vector.load %arg7[%c8, %c0_18] : memref<36x128xbf16, #tpu.memory_space<vmem>>, vector<4x128xbf16>
    tpu.vector_store %arg7[%c8, %c0_18], %49 {strides = array<i32>} : memref<36x128xbf16, #tpu.memory_space<vmem>>, vector<4x128xbf16>,
    %c1_i32 = arith.constant 1 : i32
    %51 = tpu.dynamic_rotate %31 by %c1_i32 dim 1 : vector<4x128xf32>, i32 -> vector<4x128xf32>
    %52 = vector.extract_strided_slice %32 {offsets = [3, 0], sizes = [1, 128], strides = [1, 1]} : vector<9x128xf32> to vector<1x128xf32>
    %53 = vector.broadcast %52 : vector<1x128xf32> to vector<4x128xf32>
    %54 = arith.mulf %51, %53 : vector<4x128xf32>
    %55 = arith.truncf %54 : vector<4x128xf32> to vector<4x128xbf16>
    %c12 = arith.constant 12 : index
    %c0_19 = arith.constant 0 : index
    %56 = vector.load %arg7[%c12, %c0_19] : memref<36x128xbf16, #tpu.memory_space<vmem>>, vector<4x128xbf16>
    tpu.vector_store %arg7[%c12, %c0_19], %55 {strides = array<i32>} : memref<36x128xbf16, #tpu.memory_space<vmem>>, vector<4x128xbf16>,
    %57 = arith.truncf %31 : vector<4x128xf32> to vector<4x128xbf16>
    %c16 = arith.constant 16 : index
    %c0_20 = arith.constant 0 : index
    %58 = vector.load %arg7[%c16, %c0_20] : memref<36x128xbf16, #tpu.memory_space<vmem>>, vector<4x128xbf16>
    tpu.vector_store %arg7[%c16, %c0_20], %57 {strides = array<i32>} : memref<36x128xbf16, #tpu.memory_space<vmem>>, vector<4x128xbf16>,
    %c127_i32 = arith.constant 127 : i32
    %59 = tpu.dynamic_rotate %31 by %c127_i32 dim 1 : vector<4x128xf32>, i32 -> vector<4x128xf32>
    %60 = vector.extract_strided_slice %32 {offsets = [5, 0], sizes = [1, 128], strides = [1, 1]} : vector<9x128xf32> to vector<1x128xf32>
    %61 = vector.broadcast %60 : vector<1x128xf32> to vector<4x128xf32>
    %62 = arith.mulf %59, %61 : vector<4x128xf32>
    %63 = arith.truncf %62 : vector<4x128xf32> to vector<4x128xbf16>
    %c20 = arith.constant 20 : index
    %c0_21 = arith.constant 0 : index
    %64 = vector.load %arg7[%c20, %c0_21] : memref<36x128xbf16, #tpu.memory_space<vmem>>, vector<4x128xbf16>
    tpu.vector_store %arg7[%c20, %c0_21], %63 {strides = array<i32>} : memref<36x128xbf16, #tpu.memory_space<vmem>>, vector<4x128xbf16>,
    %c113_i32 = arith.constant 113 : i32
    %65 = tpu.dynamic_rotate %31 by %c113_i32 dim 1 : vector<4x128xf32>, i32 -> vector<4x128xf32>
    %66 = vector.extract_strided_slice %32 {offsets = [6, 0], sizes = [1, 128], strides = [1, 1]} : vector<9x128xf32> to vector<1x128xf32>
    %67 = vector.broadcast %66 : vector<1x128xf32> to vector<4x128xf32>
    %68 = arith.mulf %65, %67 : vector<4x128xf32>
    %69 = arith.truncf %68 : vector<4x128xf32> to vector<4x128xbf16>
    %c24 = arith.constant 24 : index
    %c0_22 = arith.constant 0 : index
    %70 = vector.load %arg7[%c24, %c0_22] : memref<36x128xbf16, #tpu.memory_space<vmem>>, vector<4x128xbf16>
    tpu.vector_store %arg7[%c24, %c0_22], %69 {strides = array<i32>} : memref<36x128xbf16, #tpu.memory_space<vmem>>, vector<4x128xbf16>,
    %c112_i32 = arith.constant 112 : i32
    %71 = tpu.dynamic_rotate %31 by %c112_i32 dim 1 : vector<4x128xf32>, i32 -> vector<4x128xf32>
    %72 = vector.extract_strided_slice %32 {offsets = [7, 0], sizes = [1, 128], strides = [1, 1]} : vector<9x128xf32> to vector<1x128xf32>
    %73 = vector.broadcast %72 : vector<1x128xf32> to vector<4x128xf32>
    %74 = arith.mulf %71, %73 : vector<4x128xf32>
    %75 = arith.truncf %74 : vector<4x128xf32> to vector<4x128xbf16>
    %c28 = arith.constant 28 : index
    %c0_23 = arith.constant 0 : index
    %76 = vector.load %arg7[%c28, %c0_23] : memref<36x128xbf16, #tpu.memory_space<vmem>>, vector<4x128xbf16>
    tpu.vector_store %arg7[%c28, %c0_23], %75 {strides = array<i32>} : memref<36x128xbf16, #tpu.memory_space<vmem>>, vector<4x128xbf16>,
    %c111_i32 = arith.constant 111 : i32
    %77 = tpu.dynamic_rotate %31 by %c111_i32 dim 1 : vector<4x128xf32>, i32 -> vector<4x128xf32>
    %78 = vector.extract_strided_slice %32 {offsets = [8, 0], sizes = [1, 128], strides = [1, 1]} : vector<9x128xf32> to vector<1x128xf32>
    %79 = vector.broadcast %78 : vector<1x128xf32> to vector<4x128xf32>
    %80 = arith.mulf %77, %79 : vector<4x128xf32>
    %81 = arith.truncf %80 : vector<4x128xf32> to vector<4x128xbf16>
    %c32 = arith.constant 32 : index
    %c0_24 = arith.constant 0 : index
    %82 = vector.load %arg7[%c32, %c0_24] : memref<36x128xbf16, #tpu.memory_space<vmem>>, vector<4x128xbf16>
    tpu.vector_store %arg7[%c32, %c0_24], %81 {strides = array<i32>} : memref<36x128xbf16, #tpu.memory_space<vmem>>, vector<4x128xbf16>,
    %c0_25 = arith.constant 0 : index
    %c0_26 = arith.constant 0 : index
    %83 = vector.load %arg5[%c0_25, %c0_26] : memref<8x36xbf16, #tpu.memory_space<vmem>>, vector<8x36xbf16>
    %c0_27 = arith.constant 0 : index
    %c0_28 = arith.constant 0 : index
    %84 = vector.load %arg7[%c0_27, %c0_28] : memref<36x128xbf16, #tpu.memory_space<vmem>>, vector<36x128xbf16>
    %cst_29 = arith.constant dense<0.000000e+00> : vector<8x128xf32>
    %85 = tpu.matmul %83, %84, %cst_29 {dimension_numbers = #tpu.dot_dimension_numbers<[1], [0], [0], [1], [0, 0, 1, 1], [], []>} : vector<8x36xbf16>, vector<36x128xbf16>, vector<8x128xf32> -> vector<8x128xf32>
    %c0_30 = arith.constant 0 : index
    %c0_31 = arith.constant 0 : index
    %c0_32 = arith.constant 0 : index
    %86 = vector.load %arg6[%c0_30, %c0_31, %c0_32] : memref<1x8x128xf32, #tpu.memory_space<vmem>>, vector<1x8x128xf32>
    %87 = vector.shape_cast %86 : vector<1x8x128xf32> to vector<8x128xf32>
    %88 = vector.shape_cast %85 : vector<8x128xf32> to vector<1x8x128xf32>
    tpu.vector_store %arg6[%c0_30, %c0_31, %c0_32], %88 {strides = array<i32>} : memref<1x8x128xf32, #tpu.memory_space<vmem>>, vector<1x8x128xf32>,
    return
  }
  func.func @transform_0(%arg0: i32) -> (i32, i32, i32) {
    %c0_i32 = arith.constant 0 : i32
    %c0_i32_0 = arith.constant 0 : i32
    %c0_i32_1 = arith.constant 0 : i32
    return %arg0, %c0_i32, %c0_i32_0 : i32, i32, i32
  }
  func.func @transform_1(%arg0: i32) -> (i32, i32) {
    %c0_i32 = arith.constant 0 : i32
    %c0_i32_0 = arith.constant 0 : i32
    %c0_i32_1 = arith.constant 0 : i32
    return %c0_i32, %c0_i32_0 : i32, i32
  }
  func.func @transform_2(%arg0: i32) -> (i32, i32) {
    %c0_i32 = arith.constant 0 : i32
    %c0_i32_0 = arith.constant 0 : i32
    %c0_i32_1 = arith.constant 0 : i32
    return %c0_i32, %c0_i32_0 : i32, i32
  }
  func.func @transform_3(%arg0: i32) -> (i32, i32) {
    %c0_i32 = arith.constant 0 : i32
    %c0_i32_0 = arith.constant 0 : i32
    %c0_i32_1 = arith.constant 0 : i32
    return %c0_i32, %c0_i32_0 : i32, i32
  }
  func.func @transform_4(%arg0: i32) -> (i32, i32) {
    %c0_i32 = arith.constant 0 : i32
    %c0_i32_0 = arith.constant 0 : i32
    %c0_i32_1 = arith.constant 0 : i32
    return %c0_i32, %c0_i32_0 : i32, i32
  }
  func.func @transform_5(%arg0: i32) -> (i32, i32, i32) {
    %c0_i32 = arith.constant 0 : i32
    %c0_i32_0 = arith.constant 0 : i32
    %c0_i32_1 = arith.constant 0 : i32
    return %arg0, %c0_i32, %c0_i32_0 : i32, i32, i32
  }
}

module attributes {stable_mosaic.version = 11 : i64} {
  func.func @_tfc2_shortcut_kernel(%arg0: i32, %arg1: memref<1x8x128xf32, #tpu.memory_space<vmem>>, %arg2: memref<1x4x128xf32, #tpu.memory_space<vmem>>, %arg3: memref<9x128xf32, #tpu.memory_space<vmem>>, %arg4: memref<8x1xf32, #tpu.memory_space<vmem>>, %arg5: memref<8x1xf32, #tpu.memory_space<vmem>>, %arg6: memref<8x76xbf16, #tpu.memory_space<vmem>>, %arg7: memref<1x8x128xf32, #tpu.memory_space<vmem>>, %arg8: memref<76x128xbf16, #tpu.memory_space<vmem>>) attributes {dimension_semantics = [#tpu.dimension_semantics<parallel>], iteration_bounds = array<i64: 2>, scalar_prefetch = 0 : i64, scratch_operands = 1 : i64, tpu.core_type = #tpu.core_type<tc>, window_params = [{transform_indices = @transform_0, window_bounds = array<i64: 1, 8, 128>}, {transform_indices = @transform_1, window_bounds = array<i64: 1, 4, 128>}, {pipeline_mode = #tpu.pipeline_mode<synchronous>, transform_indices = @transform_2, window_bounds = array<i64: 9, 128>}, {pipeline_mode = #tpu.pipeline_mode<synchronous>, transform_indices = @transform_3, window_bounds = array<i64: 8, 1>}, {pipeline_mode = #tpu.pipeline_mode<synchronous>, transform_indices = @transform_4, window_bounds = array<i64: 8, 1>}, {pipeline_mode = #tpu.pipeline_mode<synchronous>, transform_indices = @transform_5, window_bounds = array<i64: 8, 76>}, {transform_indices = @transform_6, window_bounds = array<i64: 1, 8, 128>}]} {
    %c0 = arith.constant 0 : index
    %c0_0 = arith.constant 0 : index
    %c0_1 = arith.constant 0 : index
    %0 = vector.load %arg1[%c0, %c0_0, %c0_1] : memref<1x8x128xf32, #tpu.memory_space<vmem>>, vector<1x8x128xf32>
    %1 = vector.shape_cast %0 : vector<1x8x128xf32> to vector<8x128xf32>
    %c0_2 = arith.constant 0 : index
    %c0_3 = arith.constant 0 : index
    %2 = vector.load %arg4[%c0_2, %c0_3] : memref<8x1xf32, #tpu.memory_space<vmem>>, vector<8x1xf32>
    %c0_4 = arith.constant 0 : index
    %c0_5 = arith.constant 0 : index
    %3 = vector.load %arg5[%c0_4, %c0_5] : memref<8x1xf32, #tpu.memory_space<vmem>>, vector<8x1xf32>
    %cst = arith.constant dense<0.000000e+00> : vector<8xf32>
    %4 = vector.multi_reduction <add>, %1, %cst [1] : vector<8x128xf32> to vector<8xf32>
    %5 = vector.shape_cast %4 : vector<8xf32> to vector<8x1xf32>
    %cst_6 = arith.constant 1.280000e+02 : f32
    %6 = vector.broadcast %cst_6 : f32 to vector<8x1xf32>
    %7 = arith.divf %5, %6 : vector<8x1xf32>
    %8 = vector.broadcast %7 : vector<8x1xf32> to vector<8x128xf32>
    %9 = arith.subf %1, %8 : vector<8x128xf32>
    %10 = arith.mulf %9, %9 : vector<8x128xf32>
    %cst_7 = arith.constant dense<0.000000e+00> : vector<8xf32>
    %11 = vector.multi_reduction <add>, %10, %cst_7 [1] : vector<8x128xf32> to vector<8xf32>
    %12 = vector.shape_cast %11 : vector<8xf32> to vector<8x1xf32>
    %cst_8 = arith.constant 1.280000e+02 : f32
    %13 = vector.broadcast %cst_8 : f32 to vector<8x1xf32>
    %14 = arith.divf %12, %13 : vector<8x1xf32>
    %cst_9 = arith.constant 9.99999974E-6 : f32
    %15 = vector.broadcast %cst_9 : f32 to vector<8x1xf32>
    %16 = arith.addf %14, %15 : vector<8x1xf32>
    %17 = math.rsqrt %16 : vector<8x1xf32>
    %18 = vector.broadcast %17 : vector<8x1xf32> to vector<8x128xf32>
    %19 = arith.mulf %9, %18 : vector<8x128xf32>
    %20 = vector.broadcast %2 : vector<8x1xf32> to vector<8x128xf32>
    %21 = arith.mulf %19, %20 : vector<8x128xf32>
    %22 = vector.broadcast %3 : vector<8x1xf32> to vector<8x128xf32>
    %23 = arith.addf %21, %22 : vector<8x128xf32>
    %cst_10 = arith.constant 5.000000e-01 : f32
    %24 = vector.broadcast %cst_10 : f32 to vector<8x128xf32>
    %25 = arith.mulf %24, %23 : vector<8x128xf32>
    %cst_11 = arith.constant 0.707106769 : f32
    %26 = vector.broadcast %cst_11 : f32 to vector<8x128xf32>
    %27 = arith.mulf %23, %26 : vector<8x128xf32>
    %28 = math.erf %27 : vector<8x128xf32>
    %cst_12 = arith.constant 1.000000e+00 : f32
    %29 = vector.broadcast %cst_12 : f32 to vector<8x128xf32>
    %30 = arith.addf %29, %28 : vector<8x128xf32>
    %31 = arith.mulf %25, %30 : vector<8x128xf32>
    %c0_13 = arith.constant 0 : index
    %c0_14 = arith.constant 0 : index
    %32 = vector.load %arg3[%c0_13, %c0_14] : memref<9x128xf32, #tpu.memory_space<vmem>>, vector<9x128xf32>
    %c17_i32 = arith.constant 17 : i32
    %33 = tpu.dynamic_rotate %31 by %c17_i32 dim 1 : vector<8x128xf32>, i32 -> vector<8x128xf32>
    %34 = vector.extract_strided_slice %32 {offsets = [0, 0], sizes = [1, 128], strides = [1, 1]} : vector<9x128xf32> to vector<1x128xf32>
    %35 = vector.broadcast %34 : vector<1x128xf32> to vector<8x128xf32>
    %36 = arith.mulf %33, %35 : vector<8x128xf32>
    %37 = arith.truncf %36 : vector<8x128xf32> to vector<8x128xbf16>
    %c0_15 = arith.constant 0 : index
    %c0_16 = arith.constant 0 : index
    %38 = vector.load %arg8[%c0_15, %c0_16] : memref<76x128xbf16, #tpu.memory_space<vmem>>, vector<8x128xbf16>
    tpu.vector_store %arg8[%c0_15, %c0_16], %37 {strides = array<i32>} : memref<76x128xbf16, #tpu.memory_space<vmem>>, vector<8x128xbf16>,
    %c16_i32 = arith.constant 16 : i32
    %39 = tpu.dynamic_rotate %31 by %c16_i32 dim 1 : vector<8x128xf32>, i32 -> vector<8x128xf32>
    %40 = vector.extract_strided_slice %32 {offsets = [1, 0], sizes = [1, 128], strides = [1, 1]} : vector<9x128xf32> to vector<1x128xf32>
    %41 = vector.broadcast %40 : vector<1x128xf32> to vector<8x128xf32>
    %42 = arith.mulf %39, %41 : vector<8x128xf32>
    %43 = arith.truncf %42 : vector<8x128xf32> to vector<8x128xbf16>
    %c8 = arith.constant 8 : index
    %c0_17 = arith.constant 0 : index
    %44 = vector.load %arg8[%c8, %c0_17] : memref<76x128xbf16, #tpu.memory_space<vmem>>, vector<8x128xbf16>
    tpu.vector_store %arg8[%c8, %c0_17], %43 {strides = array<i32>} : memref<76x128xbf16, #tpu.memory_space<vmem>>, vector<8x128xbf16>,
    %c15_i32 = arith.constant 15 : i32
    %45 = tpu.dynamic_rotate %31 by %c15_i32 dim 1 : vector<8x128xf32>, i32 -> vector<8x128xf32>
    %46 = vector.extract_strided_slice %32 {offsets = [2, 0], sizes = [1, 128], strides = [1, 1]} : vector<9x128xf32> to vector<1x128xf32>
    %47 = vector.broadcast %46 : vector<1x128xf32> to vector<8x128xf32>
    %48 = arith.mulf %45, %47 : vector<8x128xf32>
    %49 = arith.truncf %48 : vector<8x128xf32> to vector<8x128xbf16>
    %c16 = arith.constant 16 : index
    %c0_18 = arith.constant 0 : index
    %50 = vector.load %arg8[%c16, %c0_18] : memref<76x128xbf16, #tpu.memory_space<vmem>>, vector<8x128xbf16>
    tpu.vector_store %arg8[%c16, %c0_18], %49 {strides = array<i32>} : memref<76x128xbf16, #tpu.memory_space<vmem>>, vector<8x128xbf16>,
    %c1_i32 = arith.constant 1 : i32
    %51 = tpu.dynamic_rotate %31 by %c1_i32 dim 1 : vector<8x128xf32>, i32 -> vector<8x128xf32>
    %52 = vector.extract_strided_slice %32 {offsets = [3, 0], sizes = [1, 128], strides = [1, 1]} : vector<9x128xf32> to vector<1x128xf32>
    %53 = vector.broadcast %52 : vector<1x128xf32> to vector<8x128xf32>
    %54 = arith.mulf %51, %53 : vector<8x128xf32>
    %55 = arith.truncf %54 : vector<8x128xf32> to vector<8x128xbf16>
    %c24 = arith.constant 24 : index
    %c0_19 = arith.constant 0 : index
    %56 = vector.load %arg8[%c24, %c0_19] : memref<76x128xbf16, #tpu.memory_space<vmem>>, vector<8x128xbf16>
    tpu.vector_store %arg8[%c24, %c0_19], %55 {strides = array<i32>} : memref<76x128xbf16, #tpu.memory_space<vmem>>, vector<8x128xbf16>,
    %57 = arith.truncf %31 : vector<8x128xf32> to vector<8x128xbf16>
    %c32 = arith.constant 32 : index
    %c0_20 = arith.constant 0 : index
    %58 = vector.load %arg8[%c32, %c0_20] : memref<76x128xbf16, #tpu.memory_space<vmem>>, vector<8x128xbf16>
    tpu.vector_store %arg8[%c32, %c0_20], %57 {strides = array<i32>} : memref<76x128xbf16, #tpu.memory_space<vmem>>, vector<8x128xbf16>,
    %c127_i32 = arith.constant 127 : i32
    %59 = tpu.dynamic_rotate %31 by %c127_i32 dim 1 : vector<8x128xf32>, i32 -> vector<8x128xf32>
    %60 = vector.extract_strided_slice %32 {offsets = [5, 0], sizes = [1, 128], strides = [1, 1]} : vector<9x128xf32> to vector<1x128xf32>
    %61 = vector.broadcast %60 : vector<1x128xf32> to vector<8x128xf32>
    %62 = arith.mulf %59, %61 : vector<8x128xf32>
    %63 = arith.truncf %62 : vector<8x128xf32> to vector<8x128xbf16>
    %c40 = arith.constant 40 : index
    %c0_21 = arith.constant 0 : index
    %64 = vector.load %arg8[%c40, %c0_21] : memref<76x128xbf16, #tpu.memory_space<vmem>>, vector<8x128xbf16>
    tpu.vector_store %arg8[%c40, %c0_21], %63 {strides = array<i32>} : memref<76x128xbf16, #tpu.memory_space<vmem>>, vector<8x128xbf16>,
    %c113_i32 = arith.constant 113 : i32
    %65 = tpu.dynamic_rotate %31 by %c113_i32 dim 1 : vector<8x128xf32>, i32 -> vector<8x128xf32>
    %66 = vector.extract_strided_slice %32 {offsets = [6, 0], sizes = [1, 128], strides = [1, 1]} : vector<9x128xf32> to vector<1x128xf32>
    %67 = vector.broadcast %66 : vector<1x128xf32> to vector<8x128xf32>
    %68 = arith.mulf %65, %67 : vector<8x128xf32>
    %69 = arith.truncf %68 : vector<8x128xf32> to vector<8x128xbf16>
    %c48 = arith.constant 48 : index
    %c0_22 = arith.constant 0 : index
    %70 = vector.load %arg8[%c48, %c0_22] : memref<76x128xbf16, #tpu.memory_space<vmem>>, vector<8x128xbf16>
    tpu.vector_store %arg8[%c48, %c0_22], %69 {strides = array<i32>} : memref<76x128xbf16, #tpu.memory_space<vmem>>, vector<8x128xbf16>,
    %c112_i32 = arith.constant 112 : i32
    %71 = tpu.dynamic_rotate %31 by %c112_i32 dim 1 : vector<8x128xf32>, i32 -> vector<8x128xf32>
    %72 = vector.extract_strided_slice %32 {offsets = [7, 0], sizes = [1, 128], strides = [1, 1]} : vector<9x128xf32> to vector<1x128xf32>
    %73 = vector.broadcast %72 : vector<1x128xf32> to vector<8x128xf32>
    %74 = arith.mulf %71, %73 : vector<8x128xf32>
    %75 = arith.truncf %74 : vector<8x128xf32> to vector<8x128xbf16>
    %c56 = arith.constant 56 : index
    %c0_23 = arith.constant 0 : index
    %76 = vector.load %arg8[%c56, %c0_23] : memref<76x128xbf16, #tpu.memory_space<vmem>>, vector<8x128xbf16>
    tpu.vector_store %arg8[%c56, %c0_23], %75 {strides = array<i32>} : memref<76x128xbf16, #tpu.memory_space<vmem>>, vector<8x128xbf16>,
    %c111_i32 = arith.constant 111 : i32
    %77 = tpu.dynamic_rotate %31 by %c111_i32 dim 1 : vector<8x128xf32>, i32 -> vector<8x128xf32>
    %78 = vector.extract_strided_slice %32 {offsets = [8, 0], sizes = [1, 128], strides = [1, 1]} : vector<9x128xf32> to vector<1x128xf32>
    %79 = vector.broadcast %78 : vector<1x128xf32> to vector<8x128xf32>
    %80 = arith.mulf %77, %79 : vector<8x128xf32>
    %81 = arith.truncf %80 : vector<8x128xf32> to vector<8x128xbf16>
    %c64 = arith.constant 64 : index
    %c0_24 = arith.constant 0 : index
    %82 = vector.load %arg8[%c64, %c0_24] : memref<76x128xbf16, #tpu.memory_space<vmem>>, vector<8x128xbf16>
    tpu.vector_store %arg8[%c64, %c0_24], %81 {strides = array<i32>} : memref<76x128xbf16, #tpu.memory_space<vmem>>, vector<8x128xbf16>,
    %c0_25 = arith.constant 0 : index
    %c0_26 = arith.constant 0 : index
    %c0_27 = arith.constant 0 : index
    %83 = vector.load %arg2[%c0_25, %c0_26, %c0_27] : memref<1x4x128xf32, #tpu.memory_space<vmem>>, vector<1x4x128xf32>
    %84 = vector.shape_cast %83 : vector<1x4x128xf32> to vector<4x128xf32>
    %85 = arith.truncf %84 : vector<4x128xf32> to vector<4x128xbf16>
    %c72 = arith.constant 72 : index
    %c0_28 = arith.constant 0 : index
    %86 = vector.load %arg8[%c72, %c0_28] : memref<76x128xbf16, #tpu.memory_space<vmem>>, vector<4x128xbf16>
    tpu.vector_store %arg8[%c72, %c0_28], %85 {strides = array<i32>} : memref<76x128xbf16, #tpu.memory_space<vmem>>, vector<4x128xbf16>,
    %c0_29 = arith.constant 0 : index
    %c0_30 = arith.constant 0 : index
    %87 = vector.load %arg6[%c0_29, %c0_30] : memref<8x76xbf16, #tpu.memory_space<vmem>>, vector<8x76xbf16>
    %c0_31 = arith.constant 0 : index
    %c0_32 = arith.constant 0 : index
    %88 = vector.load %arg8[%c0_31, %c0_32] : memref<76x128xbf16, #tpu.memory_space<vmem>>, vector<76x128xbf16>
    %cst_33 = arith.constant dense<0.000000e+00> : vector<8x128xf32>
    %89 = tpu.matmul %87, %88, %cst_33 {dimension_numbers = #tpu.dot_dimension_numbers<[1], [0], [0], [1], [0, 0, 1, 1], [], []>} : vector<8x76xbf16>, vector<76x128xbf16>, vector<8x128xf32> -> vector<8x128xf32>
    %c0_34 = arith.constant 0 : index
    %c0_35 = arith.constant 0 : index
    %c0_36 = arith.constant 0 : index
    %90 = vector.load %arg7[%c0_34, %c0_35, %c0_36] : memref<1x8x128xf32, #tpu.memory_space<vmem>>, vector<1x8x128xf32>
    %91 = vector.shape_cast %90 : vector<1x8x128xf32> to vector<8x128xf32>
    %92 = vector.shape_cast %89 : vector<8x128xf32> to vector<1x8x128xf32>
    tpu.vector_store %arg7[%c0_34, %c0_35, %c0_36], %92 {strides = array<i32>} : memref<1x8x128xf32, #tpu.memory_space<vmem>>, vector<1x8x128xf32>,
    return
  }
  func.func @transform_0(%arg0: i32) -> (i32, i32, i32) {
    %c0_i32 = arith.constant 0 : i32
    %c0_i32_0 = arith.constant 0 : i32
    %c0_i32_1 = arith.constant 0 : i32
    return %arg0, %c0_i32, %c0_i32_0 : i32, i32, i32
  }
  func.func @transform_1(%arg0: i32) -> (i32, i32, i32) {
    %c0_i32 = arith.constant 0 : i32
    %c0_i32_0 = arith.constant 0 : i32
    %c0_i32_1 = arith.constant 0 : i32
    return %arg0, %c0_i32, %c0_i32_0 : i32, i32, i32
  }
  func.func @transform_2(%arg0: i32) -> (i32, i32) {
    %c0_i32 = arith.constant 0 : i32
    %c0_i32_0 = arith.constant 0 : i32
    %c0_i32_1 = arith.constant 0 : i32
    return %c0_i32, %c0_i32_0 : i32, i32
  }
  func.func @transform_3(%arg0: i32) -> (i32, i32) {
    %c0_i32 = arith.constant 0 : i32
    %c0_i32_0 = arith.constant 0 : i32
    %c0_i32_1 = arith.constant 0 : i32
    return %c0_i32, %c0_i32_0 : i32, i32
  }
  func.func @transform_4(%arg0: i32) -> (i32, i32) {
    %c0_i32 = arith.constant 0 : i32
    %c0_i32_0 = arith.constant 0 : i32
    %c0_i32_1 = arith.constant 0 : i32
    return %c0_i32, %c0_i32_0 : i32, i32
  }
  func.func @transform_5(%arg0: i32) -> (i32, i32) {
    %c0_i32 = arith.constant 0 : i32
    %c0_i32_0 = arith.constant 0 : i32
    %c0_i32_1 = arith.constant 0 : i32
    return %c0_i32, %c0_i32_0 : i32, i32
  }
  func.func @transform_6(%arg0: i32) -> (i32, i32, i32) {
    %c0_i32 = arith.constant 0 : i32
    %c0_i32_0 = arith.constant 0 : i32
    %c0_i32_1 = arith.constant 0 : i32
    return %arg0, %c0_i32, %c0_i32_0 : i32, i32, i32
  }
}

module attributes {stable_mosaic.version = 11 : i64} {
  func.func @_tdf_kernel(%arg0: i32, %arg1: memref<1x8x8x16xf32, #tpu.memory_space<vmem>>, %arg2: memref<8x1xf32, #tpu.memory_space<vmem>>, %arg3: memref<8x1xf32, #tpu.memory_space<vmem>>, %arg4: memref<16x4xbf16, #tpu.memory_space<vmem>>, %arg5: memref<8x1xf32, #tpu.memory_space<vmem>>, %arg6: memref<8x1xf32, #tpu.memory_space<vmem>>, %arg7: memref<4x16xbf16, #tpu.memory_space<vmem>>, %arg8: memref<1x8x8x16xf32, #tpu.memory_space<vmem>>) attributes {dimension_semantics = [#tpu.dimension_semantics<parallel>], iteration_bounds = array<i64: 2>, scalar_prefetch = 0 : i64, scratch_operands = 0 : i64, tpu.core_type = #tpu.core_type<tc>, window_params = [{transform_indices = @transform_0, window_bounds = array<i64: 1, 8, 8, 16>}, {pipeline_mode = #tpu.pipeline_mode<synchronous>, transform_indices = @transform_1, window_bounds = array<i64: 8, 1>}, {pipeline_mode = #tpu.pipeline_mode<synchronous>, transform_indices = @transform_2, window_bounds = array<i64: 8, 1>}, {pipeline_mode = #tpu.pipeline_mode<synchronous>, transform_indices = @transform_3, window_bounds = array<i64: 16, 4>}, {pipeline_mode = #tpu.pipeline_mode<synchronous>, transform_indices = @transform_4, window_bounds = array<i64: 8, 1>}, {pipeline_mode = #tpu.pipeline_mode<synchronous>, transform_indices = @transform_5, window_bounds = array<i64: 8, 1>}, {pipeline_mode = #tpu.pipeline_mode<synchronous>, transform_indices = @transform_6, window_bounds = array<i64: 4, 16>}, {transform_indices = @transform_7, window_bounds = array<i64: 1, 8, 8, 16>}]} {
    %c0 = arith.constant 0 : index
    %c0_0 = arith.constant 0 : index
    %c0_1 = arith.constant 0 : index
    %c0_2 = arith.constant 0 : index
    %0 = vector.load %arg1[%c0, %c0_0, %c0_1, %c0_2] : memref<1x8x8x16xf32, #tpu.memory_space<vmem>>, vector<1x8x8x16xf32>
    %1 = vector.shape_cast %0 : vector<1x8x8x16xf32> to vector<8x8x16xf32>
    %c0_3 = arith.constant 0 : index
    %c0_4 = arith.constant 0 : index
    %2 = vector.load %arg2[%c0_3, %c0_4] : memref<8x1xf32, #tpu.memory_space<vmem>>, vector<8x1xf32>
    %c0_5 = arith.constant 0 : index
    %c0_6 = arith.constant 0 : index
    %3 = vector.load %arg3[%c0_5, %c0_6] : memref<8x1xf32, #tpu.memory_space<vmem>>, vector<8x1xf32>
    %cst = arith.constant dense<0.000000e+00> : vector<8x8xf32>
    %4 = vector.multi_reduction <add>, %1, %cst [2] : vector<8x8x16xf32> to vector<8x8xf32>
    %5 = vector.shape_cast %4 : vector<8x8xf32> to vector<8x8x1xf32>
    %cst_7 = arith.constant 1.600000e+01 : f32
    %6 = vector.broadcast %cst_7 : f32 to vector<8x8x1xf32>
    %7 = arith.divf %5, %6 : vector<8x8x1xf32>
    %cst_8 = arith.constant dense<0.000000e+00> : vector<8x1xf32>
    %8 = vector.multi_reduction <add>, %7, %cst_8 [1] : vector<8x8x1xf32> to vector<8x1xf32>
    %9 = vector.shape_cast %8 : vector<8x1xf32> to vector<8x1x1xf32>
    %cst_9 = arith.constant 8.000000e+00 : f32
    %10 = vector.broadcast %cst_9 : f32 to vector<8x1x1xf32>
    %11 = arith.divf %9, %10 : vector<8x1x1xf32>
    %12 = vector.broadcast %11 : vector<8x1x1xf32> to vector<8x8x16xf32>
    %13 = arith.subf %1, %12 : vector<8x8x16xf32>
    %14 = arith.mulf %13, %13 : vector<8x8x16xf32>
    %cst_10 = arith.constant dense<0.000000e+00> : vector<8x8xf32>
    %15 = vector.multi_reduction <add>, %14, %cst_10 [2] : vector<8x8x16xf32> to vector<8x8xf32>
    %16 = vector.shape_cast %15 : vector<8x8xf32> to vector<8x8x1xf32>
    %cst_11 = arith.constant 1.600000e+01 : f32
    %17 = vector.broadcast %cst_11 : f32 to vector<8x8x1xf32>
    %18 = arith.divf %16, %17 : vector<8x8x1xf32>
    %cst_12 = arith.constant dense<0.000000e+00> : vector<8x1xf32>
    %19 = vector.multi_reduction <add>, %18, %cst_12 [1] : vector<8x8x1xf32> to vector<8x1xf32>
    %20 = vector.shape_cast %19 : vector<8x1xf32> to vector<8x1x1xf32>
    %cst_13 = arith.constant 8.000000e+00 : f32
    %21 = vector.broadcast %cst_13 : f32 to vector<8x1x1xf32>
    %22 = arith.divf %20, %21 : vector<8x1x1xf32>
    %cst_14 = arith.constant 9.99999974E-6 : f32
    %23 = vector.broadcast %cst_14 : f32 to vector<8x1x1xf32>
    %24 = arith.addf %22, %23 : vector<8x1x1xf32>
    %25 = math.rsqrt %24 : vector<8x1x1xf32>
    %26 = vector.broadcast %25 : vector<8x1x1xf32> to vector<8x8x16xf32>
    %27 = arith.mulf %13, %26 : vector<8x8x16xf32>
    %28 = vector.shape_cast %2 : vector<8x1xf32> to vector<8x1x1xf32>
    %29 = vector.broadcast %28 : vector<8x1x1xf32> to vector<8x8x16xf32>
    %30 = arith.mulf %27, %29 : vector<8x8x16xf32>
    %31 = vector.shape_cast %3 : vector<8x1xf32> to vector<8x1x1xf32>
    %32 = vector.broadcast %31 : vector<8x1x1xf32> to vector<8x8x16xf32>
    %33 = arith.addf %30, %32 : vector<8x8x16xf32>
    %cst_15 = arith.constant 5.000000e-01 : f32
    %34 = vector.broadcast %cst_15 : f32 to vector<8x8x16xf32>
    %35 = arith.mulf %34, %33 : vector<8x8x16xf32>
    %cst_16 = arith.constant 0.707106769 : f32
    %36 = vector.broadcast %cst_16 : f32 to vector<8x8x16xf32>
    %37 = arith.mulf %33, %36 : vector<8x8x16xf32>
    %38 = math.erf %37 : vector<8x8x16xf32>
    %cst_17 = arith.constant 1.000000e+00 : f32
    %39 = vector.broadcast %cst_17 : f32 to vector<8x8x16xf32>
    %40 = arith.addf %39, %38 : vector<8x8x16xf32>
    %41 = arith.mulf %35, %40 : vector<8x8x16xf32>
    %42 = vector.shape_cast %41 : vector<8x8x16xf32> to vector<64x16xf32>
    %43 = arith.truncf %42 : vector<64x16xf32> to vector<64x16xbf16>
    %c0_18 = arith.constant 0 : index
    %c0_19 = arith.constant 0 : index
    %44 = vector.load %arg4[%c0_18, %c0_19] : memref<16x4xbf16, #tpu.memory_space<vmem>>, vector<16x4xbf16>
    %cst_20 = arith.constant dense<0.000000e+00> : vector<64x4xf32>
    %45 = tpu.matmul %43, %44, %cst_20 {dimension_numbers = #tpu.dot_dimension_numbers<[1], [0], [0], [1], [0, 0, 1, 1], [], []>} : vector<64x16xbf16>, vector<16x4xbf16>, vector<64x4xf32> -> vector<64x4xf32>
    %46 = vector.shape_cast %45 : vector<64x4xf32> to vector<8x8x4xf32>
    %c0_21 = arith.constant 0 : index
    %c0_22 = arith.constant 0 : index
    %47 = vector.load %arg5[%c0_21, %c0_22] : memref<8x1xf32, #tpu.memory_space<vmem>>, vector<8x1xf32>
    %c0_23 = arith.constant 0 : index
    %c0_24 = arith.constant 0 : index
    %48 = vector.load %arg6[%c0_23, %c0_24] : memref<8x1xf32, #tpu.memory_space<vmem>>, vector<8x1xf32>
    %cst_25 = arith.constant dense<0.000000e+00> : vector<8x8xf32>
    %49 = vector.multi_reduction <add>, %46, %cst_25 [2] : vector<8x8x4xf32> to vector<8x8xf32>
    %50 = vector.shape_cast %49 : vector<8x8xf32> to vector<8x8x1xf32>
    %cst_26 = arith.constant 4.000000e+00 : f32
    %51 = vector.broadcast %cst_26 : f32 to vector<8x8x1xf32>
    %52 = arith.divf %50, %51 : vector<8x8x1xf32>
    %cst_27 = arith.constant dense<0.000000e+00> : vector<8x1xf32>
    %53 = vector.multi_reduction <add>, %52, %cst_27 [1] : vector<8x8x1xf32> to vector<8x1xf32>
    %54 = vector.shape_cast %53 : vector<8x1xf32> to vector<8x1x1xf32>
    %cst_28 = arith.constant 8.000000e+00 : f32
    %55 = vector.broadcast %cst_28 : f32 to vector<8x1x1xf32>
    %56 = arith.divf %54, %55 : vector<8x1x1xf32>
    %57 = vector.broadcast %56 : vector<8x1x1xf32> to vector<8x8x4xf32>
    %58 = arith.subf %46, %57 : vector<8x8x4xf32>
    %59 = arith.mulf %58, %58 : vector<8x8x4xf32>
    %cst_29 = arith.constant dense<0.000000e+00> : vector<8x8xf32>
    %60 = vector.multi_reduction <add>, %59, %cst_29 [2] : vector<8x8x4xf32> to vector<8x8xf32>
    %61 = vector.shape_cast %60 : vector<8x8xf32> to vector<8x8x1xf32>
    %cst_30 = arith.constant 4.000000e+00 : f32
    %62 = vector.broadcast %cst_30 : f32 to vector<8x8x1xf32>
    %63 = arith.divf %61, %62 : vector<8x8x1xf32>
    %cst_31 = arith.constant dense<0.000000e+00> : vector<8x1xf32>
    %64 = vector.multi_reduction <add>, %63, %cst_31 [1] : vector<8x8x1xf32> to vector<8x1xf32>
    %65 = vector.shape_cast %64 : vector<8x1xf32> to vector<8x1x1xf32>
    %cst_32 = arith.constant 8.000000e+00 : f32
    %66 = vector.broadcast %cst_32 : f32 to vector<8x1x1xf32>
    %67 = arith.divf %65, %66 : vector<8x1x1xf32>
    %cst_33 = arith.constant 9.99999974E-6 : f32
    %68 = vector.broadcast %cst_33 : f32 to vector<8x1x1xf32>
    %69 = arith.addf %67, %68 : vector<8x1x1xf32>
    %70 = math.rsqrt %69 : vector<8x1x1xf32>
    %71 = vector.broadcast %70 : vector<8x1x1xf32> to vector<8x8x4xf32>
    %72 = arith.mulf %58, %71 : vector<8x8x4xf32>
    %73 = vector.shape_cast %47 : vector<8x1xf32> to vector<8x1x1xf32>
    %74 = vector.broadcast %73 : vector<8x1x1xf32> to vector<8x8x4xf32>
    %75 = arith.mulf %72, %74 : vector<8x8x4xf32>
    %76 = vector.shape_cast %48 : vector<8x1xf32> to vector<8x1x1xf32>
    %77 = vector.broadcast %76 : vector<8x1x1xf32> to vector<8x8x4xf32>
    %78 = arith.addf %75, %77 : vector<8x8x4xf32>
    %cst_34 = arith.constant 5.000000e-01 : f32
    %79 = vector.broadcast %cst_34 : f32 to vector<8x8x4xf32>
    %80 = arith.mulf %79, %78 : vector<8x8x4xf32>
    %cst_35 = arith.constant 0.707106769 : f32
    %81 = vector.broadcast %cst_35 : f32 to vector<8x8x4xf32>
    %82 = arith.mulf %78, %81 : vector<8x8x4xf32>
    %83 = math.erf %82 : vector<8x8x4xf32>
    %cst_36 = arith.constant 1.000000e+00 : f32
    %84 = vector.broadcast %cst_36 : f32 to vector<8x8x4xf32>
    %85 = arith.addf %84, %83 : vector<8x8x4xf32>
    %86 = arith.mulf %80, %85 : vector<8x8x4xf32>
    %87 = vector.shape_cast %86 : vector<8x8x4xf32> to vector<64x4xf32>
    %88 = arith.truncf %87 : vector<64x4xf32> to vector<64x4xbf16>
    %c0_37 = arith.constant 0 : index
    %c0_38 = arith.constant 0 : index
    %89 = vector.load %arg7[%c0_37, %c0_38] : memref<4x16xbf16, #tpu.memory_space<vmem>>, vector<4x16xbf16>
    %cst_39 = arith.constant dense<0.000000e+00> : vector<64x16xf32>
    %90 = tpu.matmul %88, %89, %cst_39 {dimension_numbers = #tpu.dot_dimension_numbers<[1], [0], [0], [1], [0, 0, 1, 1], [], []>} : vector<64x4xbf16>, vector<4x16xbf16>, vector<64x16xf32> -> vector<64x16xf32>
    %91 = vector.shape_cast %90 : vector<64x16xf32> to vector<8x8x16xf32>
    %92 = arith.addf %1, %91 : vector<8x8x16xf32>
    %c0_40 = arith.constant 0 : index
    %c0_41 = arith.constant 0 : index
    %c0_42 = arith.constant 0 : index
    %c0_43 = arith.constant 0 : index
    %93 = vector.load %arg8[%c0_40, %c0_41, %c0_42, %c0_43] : memref<1x8x8x16xf32, #tpu.memory_space<vmem>>, vector<1x8x8x16xf32>
    %94 = vector.shape_cast %93 : vector<1x8x8x16xf32> to vector<8x8x16xf32>
    %95 = vector.shape_cast %92 : vector<8x8x16xf32> to vector<1x8x8x16xf32>
    tpu.vector_store %arg8[%c0_40, %c0_41, %c0_42, %c0_43], %95 {strides = array<i32>} : memref<1x8x8x16xf32, #tpu.memory_space<vmem>>, vector<1x8x8x16xf32>,
    return
  }
  func.func @transform_0(%arg0: i32) -> (i32, i32, i32, i32) {
    %c0_i32 = arith.constant 0 : i32
    %c0_i32_0 = arith.constant 0 : i32
    %c0_i32_1 = arith.constant 0 : i32
    %c0_i32_2 = arith.constant 0 : i32
    return %arg0, %c0_i32, %c0_i32_0, %c0_i32_1 : i32, i32, i32, i32
  }
  func.func @transform_1(%arg0: i32) -> (i32, i32) {
    %c0_i32 = arith.constant 0 : i32
    %c0_i32_0 = arith.constant 0 : i32
    %c0_i32_1 = arith.constant 0 : i32
    return %c0_i32, %c0_i32_0 : i32, i32
  }
  func.func @transform_2(%arg0: i32) -> (i32, i32) {
    %c0_i32 = arith.constant 0 : i32
    %c0_i32_0 = arith.constant 0 : i32
    %c0_i32_1 = arith.constant 0 : i32
    return %c0_i32, %c0_i32_0 : i32, i32
  }
  func.func @transform_3(%arg0: i32) -> (i32, i32) {
    %c0_i32 = arith.constant 0 : i32
    %c0_i32_0 = arith.constant 0 : i32
    %c0_i32_1 = arith.constant 0 : i32
    return %c0_i32, %c0_i32_0 : i32, i32
  }
  func.func @transform_4(%arg0: i32) -> (i32, i32) {
    %c0_i32 = arith.constant 0 : i32
    %c0_i32_0 = arith.constant 0 : i32
    %c0_i32_1 = arith.constant 0 : i32
    return %c0_i32, %c0_i32_0 : i32, i32
  }
  func.func @transform_5(%arg0: i32) -> (i32, i32) {
    %c0_i32 = arith.constant 0 : i32
    %c0_i32_0 = arith.constant 0 : i32
    %c0_i32_1 = arith.constant 0 : i32
    return %c0_i32, %c0_i32_0 : i32, i32
  }
  func.func @transform_6(%arg0: i32) -> (i32, i32) {
    %c0_i32 = arith.constant 0 : i32
    %c0_i32_0 = arith.constant 0 : i32
    %c0_i32_1 = arith.constant 0 : i32
    return %c0_i32, %c0_i32_0 : i32, i32
  }
  func.func @transform_7(%arg0: i32) -> (i32, i32, i32, i32) {
    %c0_i32 = arith.constant 0 : i32
    %c0_i32_0 = arith.constant 0 : i32
    %c0_i32_1 = arith.constant 0 : i32
    %c0_i32_2 = arith.constant 0 : i32
    return %arg0, %c0_i32, %c0_i32_0, %c0_i32_1 : i32, i32, i32, i32
  }
}

module attributes {stable_mosaic.version = 11 : i64} {
  func.func @_tfc1_kernel(%arg0: i32, %arg1: memref<1x8x128xf32, #tpu.memory_space<vmem>>, %arg2: memref<9x128xf32, #tpu.memory_space<vmem>>, %arg3: memref<8x1xf32, #tpu.memory_space<vmem>>, %arg4: memref<8x1xf32, #tpu.memory_space<vmem>>, %arg5: memref<8x72xbf16, #tpu.memory_space<vmem>>, %arg6: memref<1x8x128xf32, #tpu.memory_space<vmem>>, %arg7: memref<72x128xbf16, #tpu.memory_space<vmem>>) attributes {dimension_semantics = [#tpu.dimension_semantics<parallel>], iteration_bounds = array<i64: 2>, scalar_prefetch = 0 : i64, scratch_operands = 1 : i64, tpu.core_type = #tpu.core_type<tc>, window_params = [{transform_indices = @transform_0, window_bounds = array<i64: 1, 8, 128>}, {pipeline_mode = #tpu.pipeline_mode<synchronous>, transform_indices = @transform_1, window_bounds = array<i64: 9, 128>}, {pipeline_mode = #tpu.pipeline_mode<synchronous>, transform_indices = @transform_2, window_bounds = array<i64: 8, 1>}, {pipeline_mode = #tpu.pipeline_mode<synchronous>, transform_indices = @transform_3, window_bounds = array<i64: 8, 1>}, {pipeline_mode = #tpu.pipeline_mode<synchronous>, transform_indices = @transform_4, window_bounds = array<i64: 8, 72>}, {transform_indices = @transform_5, window_bounds = array<i64: 1, 8, 128>}]} {
    %c0 = arith.constant 0 : index
    %c0_0 = arith.constant 0 : index
    %c0_1 = arith.constant 0 : index
    %0 = vector.load %arg1[%c0, %c0_0, %c0_1] : memref<1x8x128xf32, #tpu.memory_space<vmem>>, vector<1x8x128xf32>
    %1 = vector.shape_cast %0 : vector<1x8x128xf32> to vector<8x128xf32>
    %c0_2 = arith.constant 0 : index
    %c0_3 = arith.constant 0 : index
    %2 = vector.load %arg3[%c0_2, %c0_3] : memref<8x1xf32, #tpu.memory_space<vmem>>, vector<8x1xf32>
    %c0_4 = arith.constant 0 : index
    %c0_5 = arith.constant 0 : index
    %3 = vector.load %arg4[%c0_4, %c0_5] : memref<8x1xf32, #tpu.memory_space<vmem>>, vector<8x1xf32>
    %cst = arith.constant dense<0.000000e+00> : vector<8xf32>
    %4 = vector.multi_reduction <add>, %1, %cst [1] : vector<8x128xf32> to vector<8xf32>
    %5 = vector.shape_cast %4 : vector<8xf32> to vector<8x1xf32>
    %cst_6 = arith.constant 1.280000e+02 : f32
    %6 = vector.broadcast %cst_6 : f32 to vector<8x1xf32>
    %7 = arith.divf %5, %6 : vector<8x1xf32>
    %8 = vector.broadcast %7 : vector<8x1xf32> to vector<8x128xf32>
    %9 = arith.subf %1, %8 : vector<8x128xf32>
    %10 = arith.mulf %9, %9 : vector<8x128xf32>
    %cst_7 = arith.constant dense<0.000000e+00> : vector<8xf32>
    %11 = vector.multi_reduction <add>, %10, %cst_7 [1] : vector<8x128xf32> to vector<8xf32>
    %12 = vector.shape_cast %11 : vector<8xf32> to vector<8x1xf32>
    %cst_8 = arith.constant 1.280000e+02 : f32
    %13 = vector.broadcast %cst_8 : f32 to vector<8x1xf32>
    %14 = arith.divf %12, %13 : vector<8x1xf32>
    %cst_9 = arith.constant 9.99999974E-6 : f32
    %15 = vector.broadcast %cst_9 : f32 to vector<8x1xf32>
    %16 = arith.addf %14, %15 : vector<8x1xf32>
    %17 = math.rsqrt %16 : vector<8x1xf32>
    %18 = vector.broadcast %17 : vector<8x1xf32> to vector<8x128xf32>
    %19 = arith.mulf %9, %18 : vector<8x128xf32>
    %20 = vector.broadcast %2 : vector<8x1xf32> to vector<8x128xf32>
    %21 = arith.mulf %19, %20 : vector<8x128xf32>
    %22 = vector.broadcast %3 : vector<8x1xf32> to vector<8x128xf32>
    %23 = arith.addf %21, %22 : vector<8x128xf32>
    %cst_10 = arith.constant 5.000000e-01 : f32
    %24 = vector.broadcast %cst_10 : f32 to vector<8x128xf32>
    %25 = arith.mulf %24, %23 : vector<8x128xf32>
    %cst_11 = arith.constant 0.707106769 : f32
    %26 = vector.broadcast %cst_11 : f32 to vector<8x128xf32>
    %27 = arith.mulf %23, %26 : vector<8x128xf32>
    %28 = math.erf %27 : vector<8x128xf32>
    %cst_12 = arith.constant 1.000000e+00 : f32
    %29 = vector.broadcast %cst_12 : f32 to vector<8x128xf32>
    %30 = arith.addf %29, %28 : vector<8x128xf32>
    %31 = arith.mulf %25, %30 : vector<8x128xf32>
    %c0_13 = arith.constant 0 : index
    %c0_14 = arith.constant 0 : index
    %32 = vector.load %arg2[%c0_13, %c0_14] : memref<9x128xf32, #tpu.memory_space<vmem>>, vector<9x128xf32>
    %c17_i32 = arith.constant 17 : i32
    %33 = tpu.dynamic_rotate %31 by %c17_i32 dim 1 : vector<8x128xf32>, i32 -> vector<8x128xf32>
    %34 = vector.extract_strided_slice %32 {offsets = [0, 0], sizes = [1, 128], strides = [1, 1]} : vector<9x128xf32> to vector<1x128xf32>
    %35 = vector.broadcast %34 : vector<1x128xf32> to vector<8x128xf32>
    %36 = arith.mulf %33, %35 : vector<8x128xf32>
    %37 = arith.truncf %36 : vector<8x128xf32> to vector<8x128xbf16>
    %c0_15 = arith.constant 0 : index
    %c0_16 = arith.constant 0 : index
    %38 = vector.load %arg7[%c0_15, %c0_16] : memref<72x128xbf16, #tpu.memory_space<vmem>>, vector<8x128xbf16>
    tpu.vector_store %arg7[%c0_15, %c0_16], %37 {strides = array<i32>} : memref<72x128xbf16, #tpu.memory_space<vmem>>, vector<8x128xbf16>,
    %c16_i32 = arith.constant 16 : i32
    %39 = tpu.dynamic_rotate %31 by %c16_i32 dim 1 : vector<8x128xf32>, i32 -> vector<8x128xf32>
    %40 = vector.extract_strided_slice %32 {offsets = [1, 0], sizes = [1, 128], strides = [1, 1]} : vector<9x128xf32> to vector<1x128xf32>
    %41 = vector.broadcast %40 : vector<1x128xf32> to vector<8x128xf32>
    %42 = arith.mulf %39, %41 : vector<8x128xf32>
    %43 = arith.truncf %42 : vector<8x128xf32> to vector<8x128xbf16>
    %c8 = arith.constant 8 : index
    %c0_17 = arith.constant 0 : index
    %44 = vector.load %arg7[%c8, %c0_17] : memref<72x128xbf16, #tpu.memory_space<vmem>>, vector<8x128xbf16>
    tpu.vector_store %arg7[%c8, %c0_17], %43 {strides = array<i32>} : memref<72x128xbf16, #tpu.memory_space<vmem>>, vector<8x128xbf16>,
    %c15_i32 = arith.constant 15 : i32
    %45 = tpu.dynamic_rotate %31 by %c15_i32 dim 1 : vector<8x128xf32>, i32 -> vector<8x128xf32>
    %46 = vector.extract_strided_slice %32 {offsets = [2, 0], sizes = [1, 128], strides = [1, 1]} : vector<9x128xf32> to vector<1x128xf32>
    %47 = vector.broadcast %46 : vector<1x128xf32> to vector<8x128xf32>
    %48 = arith.mulf %45, %47 : vector<8x128xf32>
    %49 = arith.truncf %48 : vector<8x128xf32> to vector<8x128xbf16>
    %c16 = arith.constant 16 : index
    %c0_18 = arith.constant 0 : index
    %50 = vector.load %arg7[%c16, %c0_18] : memref<72x128xbf16, #tpu.memory_space<vmem>>, vector<8x128xbf16>
    tpu.vector_store %arg7[%c16, %c0_18], %49 {strides = array<i32>} : memref<72x128xbf16, #tpu.memory_space<vmem>>, vector<8x128xbf16>,
    %c1_i32 = arith.constant 1 : i32
    %51 = tpu.dynamic_rotate %31 by %c1_i32 dim 1 : vector<8x128xf32>, i32 -> vector<8x128xf32>
    %52 = vector.extract_strided_slice %32 {offsets = [3, 0], sizes = [1, 128], strides = [1, 1]} : vector<9x128xf32> to vector<1x128xf32>
    %53 = vector.broadcast %52 : vector<1x128xf32> to vector<8x128xf32>
    %54 = arith.mulf %51, %53 : vector<8x128xf32>
    %55 = arith.truncf %54 : vector<8x128xf32> to vector<8x128xbf16>
    %c24 = arith.constant 24 : index
    %c0_19 = arith.constant 0 : index
    %56 = vector.load %arg7[%c24, %c0_19] : memref<72x128xbf16, #tpu.memory_space<vmem>>, vector<8x128xbf16>
    tpu.vector_store %arg7[%c24, %c0_19], %55 {strides = array<i32>} : memref<72x128xbf16, #tpu.memory_space<vmem>>, vector<8x128xbf16>,
    %57 = arith.truncf %31 : vector<8x128xf32> to vector<8x128xbf16>
    %c32 = arith.constant 32 : index
    %c0_20 = arith.constant 0 : index
    %58 = vector.load %arg7[%c32, %c0_20] : memref<72x128xbf16, #tpu.memory_space<vmem>>, vector<8x128xbf16>
    tpu.vector_store %arg7[%c32, %c0_20], %57 {strides = array<i32>} : memref<72x128xbf16, #tpu.memory_space<vmem>>, vector<8x128xbf16>,
    %c127_i32 = arith.constant 127 : i32
    %59 = tpu.dynamic_rotate %31 by %c127_i32 dim 1 : vector<8x128xf32>, i32 -> vector<8x128xf32>
    %60 = vector.extract_strided_slice %32 {offsets = [5, 0], sizes = [1, 128], strides = [1, 1]} : vector<9x128xf32> to vector<1x128xf32>
    %61 = vector.broadcast %60 : vector<1x128xf32> to vector<8x128xf32>
    %62 = arith.mulf %59, %61 : vector<8x128xf32>
    %63 = arith.truncf %62 : vector<8x128xf32> to vector<8x128xbf16>
    %c40 = arith.constant 40 : index
    %c0_21 = arith.constant 0 : index
    %64 = vector.load %arg7[%c40, %c0_21] : memref<72x128xbf16, #tpu.memory_space<vmem>>, vector<8x128xbf16>
    tpu.vector_store %arg7[%c40, %c0_21], %63 {strides = array<i32>} : memref<72x128xbf16, #tpu.memory_space<vmem>>, vector<8x128xbf16>,
    %c113_i32 = arith.constant 113 : i32
    %65 = tpu.dynamic_rotate %31 by %c113_i32 dim 1 : vector<8x128xf32>, i32 -> vector<8x128xf32>
    %66 = vector.extract_strided_slice %32 {offsets = [6, 0], sizes = [1, 128], strides = [1, 1]} : vector<9x128xf32> to vector<1x128xf32>
    %67 = vector.broadcast %66 : vector<1x128xf32> to vector<8x128xf32>
    %68 = arith.mulf %65, %67 : vector<8x128xf32>
    %69 = arith.truncf %68 : vector<8x128xf32> to vector<8x128xbf16>
    %c48 = arith.constant 48 : index
    %c0_22 = arith.constant 0 : index
    %70 = vector.load %arg7[%c48, %c0_22] : memref<72x128xbf16, #tpu.memory_space<vmem>>, vector<8x128xbf16>
    tpu.vector_store %arg7[%c48, %c0_22], %69 {strides = array<i32>} : memref<72x128xbf16, #tpu.memory_space<vmem>>, vector<8x128xbf16>,
    %c112_i32 = arith.constant 112 : i32
    %71 = tpu.dynamic_rotate %31 by %c112_i32 dim 1 : vector<8x128xf32>, i32 -> vector<8x128xf32>
    %72 = vector.extract_strided_slice %32 {offsets = [7, 0], sizes = [1, 128], strides = [1, 1]} : vector<9x128xf32> to vector<1x128xf32>
    %73 = vector.broadcast %72 : vector<1x128xf32> to vector<8x128xf32>
    %74 = arith.mulf %71, %73 : vector<8x128xf32>
    %75 = arith.truncf %74 : vector<8x128xf32> to vector<8x128xbf16>
    %c56 = arith.constant 56 : index
    %c0_23 = arith.constant 0 : index
    %76 = vector.load %arg7[%c56, %c0_23] : memref<72x128xbf16, #tpu.memory_space<vmem>>, vector<8x128xbf16>
    tpu.vector_store %arg7[%c56, %c0_23], %75 {strides = array<i32>} : memref<72x128xbf16, #tpu.memory_space<vmem>>, vector<8x128xbf16>,
    %c111_i32 = arith.constant 111 : i32
    %77 = tpu.dynamic_rotate %31 by %c111_i32 dim 1 : vector<8x128xf32>, i32 -> vector<8x128xf32>
    %78 = vector.extract_strided_slice %32 {offsets = [8, 0], sizes = [1, 128], strides = [1, 1]} : vector<9x128xf32> to vector<1x128xf32>
    %79 = vector.broadcast %78 : vector<1x128xf32> to vector<8x128xf32>
    %80 = arith.mulf %77, %79 : vector<8x128xf32>
    %81 = arith.truncf %80 : vector<8x128xf32> to vector<8x128xbf16>
    %c64 = arith.constant 64 : index
    %c0_24 = arith.constant 0 : index
    %82 = vector.load %arg7[%c64, %c0_24] : memref<72x128xbf16, #tpu.memory_space<vmem>>, vector<8x128xbf16>
    tpu.vector_store %arg7[%c64, %c0_24], %81 {strides = array<i32>} : memref<72x128xbf16, #tpu.memory_space<vmem>>, vector<8x128xbf16>,
    %c0_25 = arith.constant 0 : index
    %c0_26 = arith.constant 0 : index
    %83 = vector.load %arg5[%c0_25, %c0_26] : memref<8x72xbf16, #tpu.memory_space<vmem>>, vector<8x72xbf16>
    %c0_27 = arith.constant 0 : index
    %c0_28 = arith.constant 0 : index
    %84 = vector.load %arg7[%c0_27, %c0_28] : memref<72x128xbf16, #tpu.memory_space<vmem>>, vector<72x128xbf16>
    %cst_29 = arith.constant dense<0.000000e+00> : vector<8x128xf32>
    %85 = tpu.matmul %83, %84, %cst_29 {dimension_numbers = #tpu.dot_dimension_numbers<[1], [0], [0], [1], [0, 0, 1, 1], [], []>} : vector<8x72xbf16>, vector<72x128xbf16>, vector<8x128xf32> -> vector<8x128xf32>
    %c0_30 = arith.constant 0 : index
    %c0_31 = arith.constant 0 : index
    %c0_32 = arith.constant 0 : index
    %86 = vector.load %arg6[%c0_30, %c0_31, %c0_32] : memref<1x8x128xf32, #tpu.memory_space<vmem>>, vector<1x8x128xf32>
    %87 = vector.shape_cast %86 : vector<1x8x128xf32> to vector<8x128xf32>
    %88 = vector.shape_cast %85 : vector<8x128xf32> to vector<1x8x128xf32>
    tpu.vector_store %arg6[%c0_30, %c0_31, %c0_32], %88 {strides = array<i32>} : memref<1x8x128xf32, #tpu.memory_space<vmem>>, vector<1x8x128xf32>,
    return
  }
  func.func @transform_0(%arg0: i32) -> (i32, i32, i32) {
    %c0_i32 = arith.constant 0 : i32
    %c0_i32_0 = arith.constant 0 : i32
    %c0_i32_1 = arith.constant 0 : i32
    return %arg0, %c0_i32, %c0_i32_0 : i32, i32, i32
  }
  func.func @transform_1(%arg0: i32) -> (i32, i32) {
    %c0_i32 = arith.constant 0 : i32
    %c0_i32_0 = arith.constant 0 : i32
    %c0_i32_1 = arith.constant 0 : i32
    return %c0_i32, %c0_i32_0 : i32, i32
  }
  func.func @transform_2(%arg0: i32) -> (i32, i32) {
    %c0_i32 = arith.constant 0 : i32
    %c0_i32_0 = arith.constant 0 : i32
    %c0_i32_1 = arith.constant 0 : i32
    return %c0_i32, %c0_i32_0 : i32, i32
  }
  func.func @transform_3(%arg0: i32) -> (i32, i32) {
    %c0_i32 = arith.constant 0 : i32
    %c0_i32_0 = arith.constant 0 : i32
    %c0_i32_1 = arith.constant 0 : i32
    return %c0_i32, %c0_i32_0 : i32, i32
  }
  func.func @transform_4(%arg0: i32) -> (i32, i32) {
    %c0_i32 = arith.constant 0 : i32
    %c0_i32_0 = arith.constant 0 : i32
    %c0_i32_1 = arith.constant 0 : i32
    return %c0_i32, %c0_i32_0 : i32, i32
  }
  func.func @transform_5(%arg0: i32) -> (i32, i32, i32) {
    %c0_i32 = arith.constant 0 : i32
    %c0_i32_0 = arith.constant 0 : i32
    %c0_i32_1 = arith.constant 0 : i32
    return %arg0, %c0_i32, %c0_i32_0 : i32, i32, i32
  }
}

module attributes {stable_mosaic.version = 11 : i64} {
  func.func @_tfc2_shortcut_kernel(%arg0: i32, %arg1: memref<1x8x128xf32, #tpu.memory_space<vmem>>, %arg2: memref<1x8x128xf32, #tpu.memory_space<vmem>>, %arg3: memref<9x128xf32, #tpu.memory_space<vmem>>, %arg4: memref<8x1xf32, #tpu.memory_space<vmem>>, %arg5: memref<8x1xf32, #tpu.memory_space<vmem>>, %arg6: memref<8x80xbf16, #tpu.memory_space<vmem>>, %arg7: memref<1x8x128xf32, #tpu.memory_space<vmem>>, %arg8: memref<80x128xbf16, #tpu.memory_space<vmem>>) attributes {dimension_semantics = [#tpu.dimension_semantics<parallel>], iteration_bounds = array<i64: 2>, scalar_prefetch = 0 : i64, scratch_operands = 1 : i64, tpu.core_type = #tpu.core_type<tc>, window_params = [{transform_indices = @transform_0, window_bounds = array<i64: 1, 8, 128>}, {transform_indices = @transform_1, window_bounds = array<i64: 1, 8, 128>}, {pipeline_mode = #tpu.pipeline_mode<synchronous>, transform_indices = @transform_2, window_bounds = array<i64: 9, 128>}, {pipeline_mode = #tpu.pipeline_mode<synchronous>, transform_indices = @transform_3, window_bounds = array<i64: 8, 1>}, {pipeline_mode = #tpu.pipeline_mode<synchronous>, transform_indices = @transform_4, window_bounds = array<i64: 8, 1>}, {pipeline_mode = #tpu.pipeline_mode<synchronous>, transform_indices = @transform_5, window_bounds = array<i64: 8, 80>}, {transform_indices = @transform_6, window_bounds = array<i64: 1, 8, 128>}]} {
    %c0 = arith.constant 0 : index
    %c0_0 = arith.constant 0 : index
    %c0_1 = arith.constant 0 : index
    %0 = vector.load %arg1[%c0, %c0_0, %c0_1] : memref<1x8x128xf32, #tpu.memory_space<vmem>>, vector<1x8x128xf32>
    %1 = vector.shape_cast %0 : vector<1x8x128xf32> to vector<8x128xf32>
    %c0_2 = arith.constant 0 : index
    %c0_3 = arith.constant 0 : index
    %2 = vector.load %arg4[%c0_2, %c0_3] : memref<8x1xf32, #tpu.memory_space<vmem>>, vector<8x1xf32>
    %c0_4 = arith.constant 0 : index
    %c0_5 = arith.constant 0 : index
    %3 = vector.load %arg5[%c0_4, %c0_5] : memref<8x1xf32, #tpu.memory_space<vmem>>, vector<8x1xf32>
    %cst = arith.constant dense<0.000000e+00> : vector<8xf32>
    %4 = vector.multi_reduction <add>, %1, %cst [1] : vector<8x128xf32> to vector<8xf32>
    %5 = vector.shape_cast %4 : vector<8xf32> to vector<8x1xf32>
    %cst_6 = arith.constant 1.280000e+02 : f32
    %6 = vector.broadcast %cst_6 : f32 to vector<8x1xf32>
    %7 = arith.divf %5, %6 : vector<8x1xf32>
    %8 = vector.broadcast %7 : vector<8x1xf32> to vector<8x128xf32>
    %9 = arith.subf %1, %8 : vector<8x128xf32>
    %10 = arith.mulf %9, %9 : vector<8x128xf32>
    %cst_7 = arith.constant dense<0.000000e+00> : vector<8xf32>
    %11 = vector.multi_reduction <add>, %10, %cst_7 [1] : vector<8x128xf32> to vector<8xf32>
    %12 = vector.shape_cast %11 : vector<8xf32> to vector<8x1xf32>
    %cst_8 = arith.constant 1.280000e+02 : f32
    %13 = vector.broadcast %cst_8 : f32 to vector<8x1xf32>
    %14 = arith.divf %12, %13 : vector<8x1xf32>
    %cst_9 = arith.constant 9.99999974E-6 : f32
    %15 = vector.broadcast %cst_9 : f32 to vector<8x1xf32>
    %16 = arith.addf %14, %15 : vector<8x1xf32>
    %17 = math.rsqrt %16 : vector<8x1xf32>
    %18 = vector.broadcast %17 : vector<8x1xf32> to vector<8x128xf32>
    %19 = arith.mulf %9, %18 : vector<8x128xf32>
    %20 = vector.broadcast %2 : vector<8x1xf32> to vector<8x128xf32>
    %21 = arith.mulf %19, %20 : vector<8x128xf32>
    %22 = vector.broadcast %3 : vector<8x1xf32> to vector<8x128xf32>
    %23 = arith.addf %21, %22 : vector<8x128xf32>
    %cst_10 = arith.constant 5.000000e-01 : f32
    %24 = vector.broadcast %cst_10 : f32 to vector<8x128xf32>
    %25 = arith.mulf %24, %23 : vector<8x128xf32>
    %cst_11 = arith.constant 0.707106769 : f32
    %26 = vector.broadcast %cst_11 : f32 to vector<8x128xf32>
    %27 = arith.mulf %23, %26 : vector<8x128xf32>
    %28 = math.erf %27 : vector<8x128xf32>
    %cst_12 = arith.constant 1.000000e+00 : f32
    %29 = vector.broadcast %cst_12 : f32 to vector<8x128xf32>
    %30 = arith.addf %29, %28 : vector<8x128xf32>
    %31 = arith.mulf %25, %30 : vector<8x128xf32>
    %c0_13 = arith.constant 0 : index
    %c0_14 = arith.constant 0 : index
    %32 = vector.load %arg3[%c0_13, %c0_14] : memref<9x128xf32, #tpu.memory_space<vmem>>, vector<9x128xf32>
    %c17_i32 = arith.constant 17 : i32
    %33 = tpu.dynamic_rotate %31 by %c17_i32 dim 1 : vector<8x128xf32>, i32 -> vector<8x128xf32>
    %34 = vector.extract_strided_slice %32 {offsets = [0, 0], sizes = [1, 128], strides = [1, 1]} : vector<9x128xf32> to vector<1x128xf32>
    %35 = vector.broadcast %34 : vector<1x128xf32> to vector<8x128xf32>
    %36 = arith.mulf %33, %35 : vector<8x128xf32>
    %37 = arith.truncf %36 : vector<8x128xf32> to vector<8x128xbf16>
    %c0_15 = arith.constant 0 : index
    %c0_16 = arith.constant 0 : index
    %38 = vector.load %arg8[%c0_15, %c0_16] : memref<80x128xbf16, #tpu.memory_space<vmem>>, vector<8x128xbf16>
    tpu.vector_store %arg8[%c0_15, %c0_16], %37 {strides = array<i32>} : memref<80x128xbf16, #tpu.memory_space<vmem>>, vector<8x128xbf16>,
    %c16_i32 = arith.constant 16 : i32
    %39 = tpu.dynamic_rotate %31 by %c16_i32 dim 1 : vector<8x128xf32>, i32 -> vector<8x128xf32>
    %40 = vector.extract_strided_slice %32 {offsets = [1, 0], sizes = [1, 128], strides = [1, 1]} : vector<9x128xf32> to vector<1x128xf32>
    %41 = vector.broadcast %40 : vector<1x128xf32> to vector<8x128xf32>
    %42 = arith.mulf %39, %41 : vector<8x128xf32>
    %43 = arith.truncf %42 : vector<8x128xf32> to vector<8x128xbf16>
    %c8 = arith.constant 8 : index
    %c0_17 = arith.constant 0 : index
    %44 = vector.load %arg8[%c8, %c0_17] : memref<80x128xbf16, #tpu.memory_space<vmem>>, vector<8x128xbf16>
    tpu.vector_store %arg8[%c8, %c0_17], %43 {strides = array<i32>} : memref<80x128xbf16, #tpu.memory_space<vmem>>, vector<8x128xbf16>,
    %c15_i32 = arith.constant 15 : i32
    %45 = tpu.dynamic_rotate %31 by %c15_i32 dim 1 : vector<8x128xf32>, i32 -> vector<8x128xf32>
    %46 = vector.extract_strided_slice %32 {offsets = [2, 0], sizes = [1, 128], strides = [1, 1]} : vector<9x128xf32> to vector<1x128xf32>
    %47 = vector.broadcast %46 : vector<1x128xf32> to vector<8x128xf32>
    %48 = arith.mulf %45, %47 : vector<8x128xf32>
    %49 = arith.truncf %48 : vector<8x128xf32> to vector<8x128xbf16>
    %c16 = arith.constant 16 : index
    %c0_18 = arith.constant 0 : index
    %50 = vector.load %arg8[%c16, %c0_18] : memref<80x128xbf16, #tpu.memory_space<vmem>>, vector<8x128xbf16>
    tpu.vector_store %arg8[%c16, %c0_18], %49 {strides = array<i32>} : memref<80x128xbf16, #tpu.memory_space<vmem>>, vector<8x128xbf16>,
    %c1_i32 = arith.constant 1 : i32
    %51 = tpu.dynamic_rotate %31 by %c1_i32 dim 1 : vector<8x128xf32>, i32 -> vector<8x128xf32>
    %52 = vector.extract_strided_slice %32 {offsets = [3, 0], sizes = [1, 128], strides = [1, 1]} : vector<9x128xf32> to vector<1x128xf32>
    %53 = vector.broadcast %52 : vector<1x128xf32> to vector<8x128xf32>
    %54 = arith.mulf %51, %53 : vector<8x128xf32>
    %55 = arith.truncf %54 : vector<8x128xf32> to vector<8x128xbf16>
    %c24 = arith.constant 24 : index
    %c0_19 = arith.constant 0 : index
    %56 = vector.load %arg8[%c24, %c0_19] : memref<80x128xbf16, #tpu.memory_space<vmem>>, vector<8x128xbf16>
    tpu.vector_store %arg8[%c24, %c0_19], %55 {strides = array<i32>} : memref<80x128xbf16, #tpu.memory_space<vmem>>, vector<8x128xbf16>,
    %57 = arith.truncf %31 : vector<8x128xf32> to vector<8x128xbf16>
    %c32 = arith.constant 32 : index
    %c0_20 = arith.constant 0 : index
    %58 = vector.load %arg8[%c32, %c0_20] : memref<80x128xbf16, #tpu.memory_space<vmem>>, vector<8x128xbf16>
    tpu.vector_store %arg8[%c32, %c0_20], %57 {strides = array<i32>} : memref<80x128xbf16, #tpu.memory_space<vmem>>, vector<8x128xbf16>,
    %c127_i32 = arith.constant 127 : i32
    %59 = tpu.dynamic_rotate %31 by %c127_i32 dim 1 : vector<8x128xf32>, i32 -> vector<8x128xf32>
    %60 = vector.extract_strided_slice %32 {offsets = [5, 0], sizes = [1, 128], strides = [1, 1]} : vector<9x128xf32> to vector<1x128xf32>
    %61 = vector.broadcast %60 : vector<1x128xf32> to vector<8x128xf32>
    %62 = arith.mulf %59, %61 : vector<8x128xf32>
    %63 = arith.truncf %62 : vector<8x128xf32> to vector<8x128xbf16>
    %c40 = arith.constant 40 : index
    %c0_21 = arith.constant 0 : index
    %64 = vector.load %arg8[%c40, %c0_21] : memref<80x128xbf16, #tpu.memory_space<vmem>>, vector<8x128xbf16>
    tpu.vector_store %arg8[%c40, %c0_21], %63 {strides = array<i32>} : memref<80x128xbf16, #tpu.memory_space<vmem>>, vector<8x128xbf16>,
    %c113_i32 = arith.constant 113 : i32
    %65 = tpu.dynamic_rotate %31 by %c113_i32 dim 1 : vector<8x128xf32>, i32 -> vector<8x128xf32>
    %66 = vector.extract_strided_slice %32 {offsets = [6, 0], sizes = [1, 128], strides = [1, 1]} : vector<9x128xf32> to vector<1x128xf32>
    %67 = vector.broadcast %66 : vector<1x128xf32> to vector<8x128xf32>
    %68 = arith.mulf %65, %67 : vector<8x128xf32>
    %69 = arith.truncf %68 : vector<8x128xf32> to vector<8x128xbf16>
    %c48 = arith.constant 48 : index
    %c0_22 = arith.constant 0 : index
    %70 = vector.load %arg8[%c48, %c0_22] : memref<80x128xbf16, #tpu.memory_space<vmem>>, vector<8x128xbf16>
    tpu.vector_store %arg8[%c48, %c0_22], %69 {strides = array<i32>} : memref<80x128xbf16, #tpu.memory_space<vmem>>, vector<8x128xbf16>,
    %c112_i32 = arith.constant 112 : i32
    %71 = tpu.dynamic_rotate %31 by %c112_i32 dim 1 : vector<8x128xf32>, i32 -> vector<8x128xf32>
    %72 = vector.extract_strided_slice %32 {offsets = [7, 0], sizes = [1, 128], strides = [1, 1]} : vector<9x128xf32> to vector<1x128xf32>
    %73 = vector.broadcast %72 : vector<1x128xf32> to vector<8x128xf32>
    %74 = arith.mulf %71, %73 : vector<8x128xf32>
    %75 = arith.truncf %74 : vector<8x128xf32> to vector<8x128xbf16>
    %c56 = arith.constant 56 : index
    %c0_23 = arith.constant 0 : index
    %76 = vector.load %arg8[%c56, %c0_23] : memref<80x128xbf16, #tpu.memory_space<vmem>>, vector<8x128xbf16>
    tpu.vector_store %arg8[%c56, %c0_23], %75 {strides = array<i32>} : memref<80x128xbf16, #tpu.memory_space<vmem>>, vector<8x128xbf16>,
    %c111_i32 = arith.constant 111 : i32
    %77 = tpu.dynamic_rotate %31 by %c111_i32 dim 1 : vector<8x128xf32>, i32 -> vector<8x128xf32>
    %78 = vector.extract_strided_slice %32 {offsets = [8, 0], sizes = [1, 128], strides = [1, 1]} : vector<9x128xf32> to vector<1x128xf32>
    %79 = vector.broadcast %78 : vector<1x128xf32> to vector<8x128xf32>
    %80 = arith.mulf %77, %79 : vector<8x128xf32>
    %81 = arith.truncf %80 : vector<8x128xf32> to vector<8x128xbf16>
    %c64 = arith.constant 64 : index
    %c0_24 = arith.constant 0 : index
    %82 = vector.load %arg8[%c64, %c0_24] : memref<80x128xbf16, #tpu.memory_space<vmem>>, vector<8x128xbf16>
    tpu.vector_store %arg8[%c64, %c0_24], %81 {strides = array<i32>} : memref<80x128xbf16, #tpu.memory_space<vmem>>, vector<8x128xbf16>,
    %c0_25 = arith.constant 0 : index
    %c0_26 = arith.constant 0 : index
    %c0_27 = arith.constant 0 : index
    %83 = vector.load %arg2[%c0_25, %c0_26, %c0_27] : memref<1x8x128xf32, #tpu.memory_space<vmem>>, vector<1x8x128xf32>
    %84 = vector.shape_cast %83 : vector<1x8x128xf32> to vector<8x128xf32>
    %85 = arith.truncf %84 : vector<8x128xf32> to vector<8x128xbf16>
    %c72 = arith.constant 72 : index
    %c0_28 = arith.constant 0 : index
    %86 = vector.load %arg8[%c72, %c0_28] : memref<80x128xbf16, #tpu.memory_space<vmem>>, vector<8x128xbf16>
    tpu.vector_store %arg8[%c72, %c0_28], %85 {strides = array<i32>} : memref<80x128xbf16, #tpu.memory_space<vmem>>, vector<8x128xbf16>,
    %c0_29 = arith.constant 0 : index
    %c0_30 = arith.constant 0 : index
    %87 = vector.load %arg6[%c0_29, %c0_30] : memref<8x80xbf16, #tpu.memory_space<vmem>>, vector<8x80xbf16>
    %c0_31 = arith.constant 0 : index
    %c0_32 = arith.constant 0 : index
    %88 = vector.load %arg8[%c0_31, %c0_32] : memref<80x128xbf16, #tpu.memory_space<vmem>>, vector<80x128xbf16>
    %cst_33 = arith.constant dense<0.000000e+00> : vector<8x128xf32>
    %89 = tpu.matmul %87, %88, %cst_33 {dimension_numbers = #tpu.dot_dimension_numbers<[1], [0], [0], [1], [0, 0, 1, 1], [], []>} : vector<8x80xbf16>, vector<80x128xbf16>, vector<8x128xf32> -> vector<8x128xf32>
    %c0_34 = arith.constant 0 : index
    %c0_35 = arith.constant 0 : index
    %c0_36 = arith.constant 0 : index
    %90 = vector.load %arg7[%c0_34, %c0_35, %c0_36] : memref<1x8x128xf32, #tpu.memory_space<vmem>>, vector<1x8x128xf32>
    %91 = vector.shape_cast %90 : vector<1x8x128xf32> to vector<8x128xf32>
    %92 = vector.shape_cast %89 : vector<8x128xf32> to vector<1x8x128xf32>
    tpu.vector_store %arg7[%c0_34, %c0_35, %c0_36], %92 {strides = array<i32>} : memref<1x8x128xf32, #tpu.memory_space<vmem>>, vector<1x8x128xf32>,
    return
  }
  func.func @transform_0(%arg0: i32) -> (i32, i32, i32) {
    %c0_i32 = arith.constant 0 : i32
    %c0_i32_0 = arith.constant 0 : i32
    %c0_i32_1 = arith.constant 0 : i32
    return %arg0, %c0_i32, %c0_i32_0 : i32, i32, i32
  }
  func.func @transform_1(%arg0: i32) -> (i32, i32, i32) {
    %c0_i32 = arith.constant 0 : i32
    %c0_i32_0 = arith.constant 0 : i32
    %c0_i32_1 = arith.constant 0 : i32
    return %arg0, %c0_i32, %c0_i32_0 : i32, i32, i32
  }
  func.func @transform_2(%arg0: i32) -> (i32, i32) {
    %c0_i32 = arith.constant 0 : i32
    %c0_i32_0 = arith.constant 0 : i32
    %c0_i32_1 = arith.constant 0 : i32
    return %c0_i32, %c0_i32_0 : i32, i32
  }
  func.func @transform_3(%arg0: i32) -> (i32, i32) {
    %c0_i32 = arith.constant 0 : i32
    %c0_i32_0 = arith.constant 0 : i32
    %c0_i32_1 = arith.constant 0 : i32
    return %c0_i32, %c0_i32_0 : i32, i32
  }
  func.func @transform_4(%arg0: i32) -> (i32, i32) {
    %c0_i32 = arith.constant 0 : i32
    %c0_i32_0 = arith.constant 0 : i32
    %c0_i32_1 = arith.constant 0 : i32
    return %c0_i32, %c0_i32_0 : i32, i32
  }
  func.func @transform_5(%arg0: i32) -> (i32, i32) {
    %c0_i32 = arith.constant 0 : i32
    %c0_i32_0 = arith.constant 0 : i32
    %c0_i32_1 = arith.constant 0 : i32
    return %c0_i32, %c0_i32_0 : i32, i32
  }
  func.func @transform_6(%arg0: i32) -> (i32, i32, i32) {
    %c0_i32 = arith.constant 0 : i32
    %c0_i32_0 = arith.constant 0 : i32
    %c0_i32_1 = arith.constant 0 : i32
    return %arg0, %c0_i32, %c0_i32_0 : i32, i32, i32
  }
}

</mosaic_0001>

<bundles_post_ra>
// kernel: mdx_forward.8
= control target key start
LH: loop header
LB: loop body
LE: loop exit
PB: predicated region body
PF: predicated region fallthrough
CT: control target
= control target key end

     0   :  { %s1517_s0 = inlined_call_operand.hbm [shape: f32[2,8,128], index: 0, kind: input, shape index: {}]   ;;  %s1518_s1 = inlined_call_operand.hbm [shape: f32[2,4,128], index: 1, kind: input, shape index: {}]   ;;  %s1519_s2 = inlined_call_operand.hbm [shape: f32[9,128], index: 2, kind: input, shape index: {}]   ;;  %s1520_s3 = inlined_call_operand.hbm [shape: f32[8,1], index: 3, kind: input, shape index: {}]   ;;  %s1521_s4 = inlined_call_operand.hbm [shape: f32[8,1], index: 4, kind: input, shape index: {}]   ;;  %s1522_s5 = inlined_call_operand.hbm [shape: bf16[8,76], index: 5, kind: input, shape index: {}]   ;;  %s1523_s6 = inlined_call_operand.hbm [shape: f32[2,8,128], index: 6, kind: output, shape index: {}]  }
   0x1   :  { %1528 = sst [smem:[#allocation21_spill]] %s1517_s0 }
   0x2   :  { %1529 = sst [smem:[#allocation22_spill]] %s1519_s2 }
   0x3   :  { %11 = vsyncpa [#allocation4], 0 }
   0x4   :  { %13 = vsyncpa [#allocation4 + $0x1], 0 }
   0x5   :  { %14 = vsyncpa [#allocation7], 0 }
   0x6   :  { %16 = vsyncpa [#allocation7 + $0x1], 0 }
   0x7   :  { %17 = vsyncpa [#allocation10], 0 }
   0x8   :  { %18 = vsyncpa [#allocation13], 0 }
   0x9   :  { %19 = vsyncpa [#allocation5], 0 }
   0xa   :  { %21 = vsyncpa [#allocation5 + $0x1], 0  ;;  %s1179_s21 = smov 0   ;;  %s1181_s22 = smov 0  }
   0xb   :  { %s1183_s23 = smov 0   ;;  %s1185_s24 = smov 0  }
   0xc LB: > { %s1124_s25 = smov [#allocation8]   ;;  %s1200_s27 = sadd.s32 4294967295, %s1122_s24   ;;  %s1122_s24 = sphi %s1185_s24, %s1556_s24   ;;  %s1118_s23 = sphi %s1183_s23, %s1555_s23   ;;  %s1114_s22 = sphi %s1181_s22, %s1554_s22   ;;  %s1110_s21 = sphi %s1179_s21, %s1553_s21  }
   0xd   : > { %s206_s26 = sshll.u32 %s1124_s25, 4  ;;  %p703_p0 = scmp.ge.s32.totalorder %s1122_s24, 1  ;;  %s1205_s26 = int_to_ptr.vmem [resolvable:$true] %s206_s26 }
   0xe   : > { %p1524_p1 = scmp.eq.s32.totalorder %s1200_s27, 0  ;;  %p194_p2 = scmp.lt.s32.totalorder %s1122_s24, 3 }
   0xf   : > { %s1125_s29 = smov [#allocation9]   ;;  %s1126_s8 = smov [#allocation11]  }
  0x10   : > { %p1207_p3 = pnand %p703_p0, %p194_p2  ;;  %s220_s30 = sshll.u32 %s1125_s29, 4  ;;  %s1220_s30 = int_to_ptr.vmem [resolvable:$true] %s220_s30 }
  0x11   : > { %s231_s9 = sshll.u32 %s1126_s8, 4  ;;  %s1532_s2 = sld [smem:[#allocation22_spill]]  ;;  %s1222_s9 = int_to_ptr.vmem [resolvable:$true] %s231_s9 }
  0x12   : > { %s1530_s28 = scalar_select %p1207_p3, 1, 0 }
  0x13   : > { %p774_p5 = pneg %p1207_p3 }
  0x15   : > { %p1216_p6 = pnand %p774_p5, %p1524_p1 }
  0x17   : > { %s868_s12 = scalar_lea.hbm %s1532_s2, 256  ;;  %p1232_p8 = pneg %p1216_p6 }
  0x18   : > { %p869_p7 = scmp.ne.s32.totalorder %s1532_s2, %s868_s12  ;;  %p875_p11 = scmp.lt.u32.totalorder %s868_s12, %s1532_s2 }
  0x1a   : > { %p871_p9 = pnand %p1232_p8, %p869_p7 }
  0x1c   : > { %p872_p10 = pneg %p871_p9 }
  0x1e   : > { %p877_p12 = pnand %p875_p11, %p872_p10 }
  0x20   : > { %880 = shalt.err (!%p877_p12)
}
  0x21   : > { %s881_s18 = scalar_lea.vmem %s1205_s26, 256  ;;  %p889_p5 = scmp.lt.s32.totalorder %s1205_s26, %s1205_s26 }
  0x22   : > { %p882_p13 = scmp.ne.s32.totalorder %s1205_s26, %s881_s18  ;;  %p890_p4 = scmp.lt.s32.totalorder %s881_s18, %s881_s18 }
  0x24   : > { %p884_p0 = pnand %p882_p13, %p1232_p8  ;;  %p891_p7 = por %p890_p4, %p889_p5 }
  0x26   : > { %p885_p2 = pneg %p884_p0 }
  0x28   : > { %p892_p9 = pnand %p891_p7, %p885_p2 }
  0x2a   : > { %895 = shalt.err (!%p892_p9)
}
  0x2b   : > { %s1127_s19 = smov 128   ;;  %s1128_s20 = smov 8  }
  0x2c   : > { %777 = dma.hbm_to_vmem [thread:$0]  (!%p1216_p6), %s1532_s2, 256, %s1205_s26, [#allocation7], %s1127_s19, %s1127_s19, %s1128_s20  }
  0x2d   : > { %s896_s11 = scalar_lea.hbm %s1520_s3, 128 }
  0x2e   : > { %p897_p4 = scmp.ne.s32.totalorder %s1520_s3, %s896_s11  ;;  %p903_p12 = scmp.lt.u32.totalorder %s896_s11, %s1520_s3 }
  0x30   : > { %p899_p10 = pnand %p897_p4, %p1232_p8 }
  0x32   : > { %p900_p11 = pneg %p899_p10 }
  0x34   : > { %p905_p13 = pnand %p903_p12, %p900_p11 }
  0x36   : > { %908 = shalt.err (!%p905_p13)
}
  0x37   : > { %s909_s26 = scalar_lea.vmem %s1220_s30, 128  ;;  %p917_p7 = scmp.lt.s32.totalorder %s1220_s30, %s1220_s30 }
  0x38   : > { %p910_p0 = scmp.ne.s32.totalorder %s1220_s30, %s909_s26  ;;  %p918_p9 = scmp.lt.s32.totalorder %s909_s26, %s909_s26 }
  0x3a   : > { %p912_p2 = pnand %p910_p0, %p1232_p8  ;;  %p919_p4 = por %p918_p9, %p917_p7 }
  0x3c   : > { %p913_p5 = pneg %p912_p2 }
  0x3e   : > { %p920_p10 = pnand %p919_p4, %p913_p5 }
  0x40   : > { %923 = shalt.err (!%p920_p10)
}
  0x41   : > { %780 = dma.hbm_to_vmem [thread:$0]  (!%p1216_p6), %s1520_s3, 128, %s1220_s30, [#allocation10]  }
  0x42   : > { %s924_s25 = scalar_lea.hbm %s1521_s4, 128 }
  0x43   : > { %p925_p11 = scmp.ne.s32.totalorder %s1521_s4, %s924_s25  ;;  %p931_p0 = scmp.lt.u32.totalorder %s924_s25, %s1521_s4 }
  0x45   : > { %p927_p12 = pnand %p925_p11, %p1232_p8 }
  0x47   : > { %p928_p13 = pneg %p927_p12 }
  0x49   : > { %p933_p2 = pnand %p931_p0, %p928_p13 }
  0x4b   : > { %936 = shalt.err (!%p933_p2)
}
  0x4c   : > { %s937_s30 = scalar_lea.vmem %s1222_s9, 128  ;;  %p945_p4 = scmp.lt.s32.totalorder %s1222_s9, %s1222_s9 }
  0x4d   : > { %p938_p5 = scmp.ne.s32.totalorder %s1222_s9, %s937_s30  ;;  %p946_p10 = scmp.lt.s32.totalorder %s937_s30, %s937_s30 }
  0x4f   : > { %p940_p7 = pnand %p938_p5, %p1232_p8  ;;  %p947_p11 = por %p946_p10, %p945_p4 }
  0x51   : > { %p941_p9 = pneg %p940_p7 }
  0x53   : > { %p948_p12 = pnand %p947_p11, %p941_p9 }
  0x55   : > { %951 = shalt.err (!%p948_p12)
}
  0x56   : > { %783 = dma.hbm_to_vmem [thread:$0]  (!%p1216_p6), %s1521_s4, 128, %s1222_s9, [#allocation10]  }
  0x57   : > { %s1129_s14 = smov [#allocation12]   ;;  %s952_s18 = scalar_lea.hbm %s1522_s5, 64 }
  0x58   : > { %s242_s16 = sshll.u32 %s1129_s14, 4  ;;  %p953_p13 = scmp.ne.s32.totalorder %s1522_s5, %s952_s18  ;;  %s243_s16 = int_to_ptr.vmem [resolvable:$true] %s242_s16 }
  0x59   : > { %p959_p5 = scmp.lt.u32.totalorder %s952_s18, %s1522_s5 }
  0x5a   : > { %p955_p0 = pnand %p953_p13, %p1232_p8 }
  0x5c   : > { %p956_p2 = pneg %p955_p0 }
  0x5e   : > { %p961_p7 = pnand %p959_p5, %p956_p2 }
  0x60   : > { %964 = shalt.err (!%p961_p7)
}
  0x61   : > { %s965_s9 = scalar_lea.vmem %s243_s16, 64  ;;  %p973_p11 = scmp.lt.s32.totalorder %s243_s16, %s243_s16 }
  0x62   : > { %p966_p9 = scmp.ne.s32.totalorder %s243_s16, %s965_s9  ;;  %p974_p12 = scmp.lt.s32.totalorder %s965_s9, %s965_s9 }
  0x64   : > { %p968_p4 = pnand %p966_p9, %p1232_p8  ;;  %p975_p1 = por %p974_p12, %p973_p11 }
  0x66   : > { %p969_p10 = pneg %p968_p4 }
  0x68   : > { %p976_p3 = pnand %p975_p1, %p969_p10 }
  0x6a   : > { %979 = shalt.err (!%p976_p3)
}
  0x6b   : > { %786 = dma.hbm_to_vmem [thread:$0]  (!%p1216_p6), %s1522_s5, 64, %s243_s16, [#allocation13]  }
  0x6c   : > { %s702_s15 = sadd.s32 4294967294, %s1122_s24   ;;  %s1319_s7 = sadd.s32 1, %s1122_s24  }
  0x6d   : > { %s31_s11 = ssub.s32 %s1122_s24, %s1319_s7  ;;  %s34_s30 = sadd.s32 1, %s1118_s23 }
  0x6e   : > { %p32_p1 = scmp.eq.s32.totalorder %s31_s11, 0  ;;  %p41_p3 = scmp.ne.s32.totalorder %s1118_s23, %s1114_s22 }
  0x6f   : > { %p42_p8 = scmp.eq.s32.totalorder %s1122_s24, 0  ;;  %p47_p13 = scmp.ne.s32.totalorder %s1114_s22, %s1110_s21 }
  0x70   : > { %s1330_s12 = scalar_select %p32_p1, %s1118_s23, %s34_s30  }
  0x71   : > { %p1332_p0 = por %p42_p8, %p41_p3  ;;  %p1535_p2 = scmp.eq.s32.totalorder %s1200_s27, 0 }
  0x72   : > { %p181_p5 = scmp.eq.s32.totalorder %s1200_s27, 1  ;;  %p187_p7 = scmp.eq.s32.totalorder %s702_s15, 1 }
  0x73   : > { %p1338_p6 = por %p1535_p2, %p47_p13  ;;  %p802_p9 = scmp.lt.s32.totalorder %s1122_s24, 2 }
  0x74   : > { %s1345_s16 = sand.u32 1, %s1118_s23   ;;  %p1347_p4 = por %p181_p5, %p41_p3 }
  0x75   : > { %s1536_s14 = scalar_select %p1338_p6, 1, 0 }
  0x76   : > { %s1537_s26 = scalar_select %p1347_p4, 1, 0 }
  0x77   : > { %p1351_p10 = por %p187_p7, %p47_p13  ;;  %s709_s18 = sshll.u32 %s1345_s16, 3 }
  0x78   : > { %s710_s19 = sshll.u32 %s1122_s24, 7  ;;  %s1539_s0 = sld [smem:[#allocation21_spill]] }
  0x79   : > { %s1538_s17 = scalar_select %p1351_p10, 1, 0 }
  0x7a   : > { %s257_s9 = scalar_lea.vmem [#allocation3], %s709_s18  ;;  %p1366_p11 = pnand %p802_p9, %p1332_p0 }
  0x7b   : > { %s264_s8 = sshll.u32 %s257_s9, 4  ;;  %s711_s11 = sshll.u32 %s1345_s16, 2  ;;  %s1362_s8 = int_to_ptr.vmem [resolvable:$true] %s264_s8 }
  0x7c   : > { %s254_s30 = scalar_lea.sflag [#allocation4], %s1345_s16  ;;  %p982_p1 = pneg %p1366_p11 }
  0x7e   : > { %s1360_s29 = scalar_lea.hbm %s1539_s0, %s710_s19  ;;  %s985_s13 = scalar_lea.hbm %s1539_s0, 256 }
  0x7f   : > { %s980_s19 = scalar_lea.hbm %s1360_s29, 128  ;;  %p986_p13 = scmp.lt.u32.totalorder %s1360_s29, %s1539_s0 }
  0x80   : > { %p981_p12 = scmp.ne.s32.totalorder %s1360_s29, %s980_s19  ;;  %p987_p0 = scmp.lt.u32.totalorder %s985_s13, %s980_s19 }
  0x81   : > { %p989_p5 = scmp.lt.u32.totalorder %s980_s19, %s1360_s29 }
  0x82   : > { %p983_p3 = pnand %p982_p1, %p981_p12  ;;  %p988_p2 = por %p987_p0, %p986_p13 }
  0x84   : > { %p984_p8 = pneg %p983_p3  ;;  %p990_p7 = por %p989_p5, %p988_p2 }
  0x86   : > { %p991_p9 = pnand %p990_p7, %p984_p8 }
  0x88   : > { %994 = shalt.err (!%p991_p9)
}
  0x89   : > { %s995_s15 = scalar_lea.vmem %s1362_s8, 128  ;;  %s1130_s18 = smov [#allocation3]  }
  0x8a   : > { %p996_p12 = scmp.ne.s32.totalorder %s1362_s8, %s995_s15  ;;  %s1000_s20 = sshll.u32 %s1130_s18, 4  ;;  %s1001_s20 = int_to_ptr.vmem [resolvable:$false] %s1000_s20 }
  0x8b   : > { %s1002_s25 = scalar_lea.vmem %s1001_s20, 256  ;;  %p1003_p4 = scmp.lt.s32.totalorder %s1362_s8, %s1001_s20 }
  0x8c   : > { %p998_p3 = pnand %p996_p12, %p982_p1  ;;  %p1004_p13 = scmp.lt.s32.totalorder %s1002_s25, %s995_s15 }
  0x8e   : > { %p999_p10 = pneg %p998_p3  ;;  %p1005_p0 = por %p1004_p13, %p1003_p4 }
  0x90   : > { %p1006_p2 = pnand %p1005_p0, %p999_p10 }
  0x92   : > { %1009 = shalt.err (!%p1006_p2)
}
  0x93   : > { %790 = dma.hbm_to_vmem [thread:$0]  (!%p1366_p11), %s1360_s29, 128, %s1362_s8, %s254_s30  }
  0x94   : > { %s712_s19 = sshll.u32 %s1122_s24, 6  ;;  %s275_s15 = scalar_lea.vmem [#allocation6], %s711_s11 }
  0x95   : > { %s1402_s18 = scalar_lea.hbm %s1518_s1, %s712_s19  ;;  %s282_s20 = sshll.u32 %s275_s15, 4  ;;  %s283_s20 = int_to_ptr.vmem [resolvable:$true] %s282_s20 }
  0x96   : > { %s1541_s25 = sand.u32 1, %s1122_s24   ;;  %s1010_s2 = scalar_lea.hbm %s1402_s18, 64 }
  0x97   : > { %s272_s0 = scalar_lea.sflag [#allocation7], %s1541_s25  ;;  %p1011_p4 = scmp.ne.s32.totalorder %s1402_s18, %s1010_s2 }
  0x98   : > { %s1015_s30 = scalar_lea.hbm %s1518_s1, 128  ;;  %p1016_p5 = scmp.lt.u32.totalorder %s1402_s18, %s1518_s1 }
  0x99   : > { %p1013_p10 = pnand %p1011_p4, %p982_p1  ;;  %p1017_p7 = scmp.lt.u32.totalorder %s1015_s30, %s1010_s2 }
  0x9a   : > { %p1019_p12 = scmp.lt.u32.totalorder %s1010_s2, %s1402_s18 }
  0x9b   : > { %p1014_p8 = pneg %p1013_p10  ;;  %p1018_p9 = por %p1017_p7, %p1016_p5 }
  0x9d   : > { %p1020_p3 = por %p1019_p12, %p1018_p9 }
  0x9f   : > { %p1021_p13 = pnand %p1020_p3, %p1014_p8 }
  0xa1   : > { %1024 = shalt.err (!%p1021_p13)
}
  0xa2   : > { %s1025_s11 = scalar_lea.vmem %s283_s20, 64  ;;  %s1131_s13 = smov [#allocation6]  }
  0xa3   : > { %p1026_p0 = scmp.ne.s32.totalorder %s283_s20, %s1025_s11  ;;  %s1030_s9 = sshll.u32 %s1131_s13, 4  ;;  %s1031_s9 = int_to_ptr.vmem [resolvable:$false] %s1030_s9 }
  0xa4   : > { %s1032_s15 = scalar_lea.vmem %s1031_s9, 128  ;;  %p1033_p10 = scmp.lt.s32.totalorder %s283_s20, %s1031_s9 }
  0xa5   : > { %p1028_p2 = pnand %p1026_p0, %p982_p1  ;;  %p1034_p6 = scmp.lt.s32.totalorder %s1032_s15, %s1025_s11 }
  0xa7   : > { %p1029_p4 = pneg %p1028_p2  ;;  %p1035_p5 = por %p1034_p6, %p1033_p10 }
  0xa9   : > { %p1036_p7 = pnand %p1035_p5, %p1029_p4 }
  0xab   : > { %1039 = shalt.err (!%p1036_p7)
}
  0xac   : > { %793 = dma.hbm_to_vmem [thread:$0]  (!%p1366_p11), %s1402_s18, 64, %s283_s20, %s272_s0  }
  0xad   : > { %p1542_p8 = scmp.ne.s32.totalorder %s1530_s28, 0 }
  0xae   : > { %s1430_s2 = sand.u32 (!%p1542_p8), 1, %s1114_s22   ;;  %p1543_p6 = scmp.ne.s32.totalorder (!%p1542_p8), %s1536_s14, 0 }
  0xaf   : > { %291 = sbr.rel (%p1542_p8) target bundleno = 906 (0x38a), region = 44  ;;  %s714_s25 = sshll.u32 (!%p1542_p8), %s1430_s2, 3 }
  0xb0   : > { %s294_s29 = scalar_lea.sflag (!%p1542_p8), [#allocation4], %s1430_s2  ;;  %s297_s8 = scalar_lea.vmem (!%p1542_p8), [#allocation3], %s714_s25 }
  0xb6   : > { %1085 = dma.done.wait (%p1543_p6), %s294_s29, 128  }
  0xb7   : > { %1087 = vsyncadd (%p1543_p6), %s294_s29, 4294967168  ;;  %s302_s0 = sand.u32 1, %s1200_s27   ;;  %s715_s28 = sshll.u32 %s1430_s2, 2 }
  0xb8   : > { %s303_s10 = scalar_lea.sflag [#allocation7], %s302_s0  ;;  %s1442_s18 = scalar_lea.vmem [#allocation6], %s715_s28 }
  0xb9   : > { %1089 = dma.done.wait (%p1543_p6), %s303_s10, 64  }
  0xba   : > { %1091 = vsyncadd (%p1543_p6), %s303_s10, 4294967232  ;;  %p1544_p11 = scmp.eq.s32.totalorder %s1200_s27, 0 }
  0xbc   : > { %1093 = dma.done.wait (%p1544_p11), [#allocation7], 256   ;;  %p1545_p1 = pmov %p1544_p11 }
  0xbe   : > { %1095 = vsyncadd (%p1545_p1), [#allocation7], 4294967040  ;;  %p1546_p9 = pmov %p1545_p1 }
  0xbf   : > { %p1547_p12 = pmov %p1545_p1 }
  0xc0   : > { %1097 = dma.done.wait (%p1546_p9), [#allocation10], 256  }
  0xc1   : > { %1099 = vsyncadd (%p1547_p12), [#allocation10], 4294967040  ;;  %p1548_p3 = pmov %p1545_p1 }
  0xc2   : > { %p1549_p13 = pmov %p1545_p1 }
  0xc3   : > { %1101 = dma.done.wait (%p1548_p3), [#allocation13], 64  }
  0xc4   : > { %1103 = vsyncadd (%p1549_p13), [#allocation13], 4294967232  ;;  %v357_v0 = vld [vmem:[%s297_s8] sm:$0xff]  ;;  %v1132_v2 = vmov 0   ;;  %v359_v3 = vld [vmem:[#allocation11] sm:$0xff]  ;;  %v1133_v24 = vmov 0.0   ;;  %v393_v26 = vlaneseq }
  0xc5   : > { %360 = vadd.xlane.f32.xlu0 %v357_v0  ;;  %v358_v1 = vld [vmem:[#allocation9] sm:$0xff]  ;;  %857 = vset.pattern.permute.xlu1 %v1132_v2  ;;  %v465_v18 = vld [vmem:[%s1442_s18] sm:$0xf]  ;;  %s1134_s14 = smov 16   ;;  %s1135_s20 = smov 17   ;;  %vm1142_vm0 = vmmov 0  }
  0xc6   : > { %858 = vset.pattern.permute.xlu0 %v1132_v2  ;;  %374 = vperm.xlu1 %857, %v358_v1   ;;  %v466_v19 = vpack.c.bf16 %v465_v18, %v465_v18  ;;  %s1136_s30 = smov 15   ;;  %s1137_s16 = smov 111   ;;  %v394_v27 = vshrl.u32 %v393_v26, 7  ;;  %v389_v30 = vld [vmem:[#allocation8] sm:$0xff]  ;;  %v721_v40 = vld [vmem:[#allocation8 + $0x8] ss:$0 sm:$0xff] }
  0xc7   : > { %738 = vmatprep.subr.bf16.mxu0 %v1133_v24  ;;  %s1138_s19 = smov 1   ;;  %s1139_s11 = smov 127   ;;  %748 = vmatprep.mubr.msk.bf16.mxu0 %vm1142_vm0, %v1133_v24  ;;  %vm512_vm1 = vcmask 1045504   ;;  %vm508_vm2 = vcmask 621568  }
  0xc8   : > { %467 = vst [vmem:[#allocation2 + $0x24] sm:$0x3] %v466_v19  ;;  %s1140_s13 = smov 113   ;;  %s1141_s9 = smov 112   ;;  %v404_v28 = vsub.s32 1, %v394_v27  ;;  %v395_v29 = vsub.s32 0, %v394_v27 }
  0xc9   : > { %v413_v33 = vsub.s32 2, %v394_v27  ;;  %v422_v39 = vsub.s32 3, %v394_v27  ;;  %v433_v48 = vsub.s32 5, %v394_v27  ;;  %v442_v54 = vsub.s32 6, %v394_v27  ;;  %s355_s15 = scalar_lea.vmem [#allocation14], %s714_s25  ;;  %s729_s8 = sshll.u32 %s1200_s27, 7 }
  0xca   : > { %380 = vperm.xlu1 %857, %v359_v3   ;;  %v405_v31 = vrot.slane %v389_v30, %v404_v28  ;;  %v396_v32 = vrot.slane %v389_v30, %v395_v29  ;;  %v451_v60 = vsub.s32 7, %v394_v27  ;;  %s571_s29 = sshll.u32 %s355_s15, 4  ;;  %s1475_s10 = scalar_lea.hbm %s1523_s6, %s729_s8  ;;  %s1470_s29 = int_to_ptr.vmem [resolvable:$true] %s571_s29 }
  0xcb   : > { %v414_v38 = vrot.slane %v389_v30, %v413_v33  ;;  %v423_v47 = vrot.slane %v389_v30, %v422_v39  ;;  %v434_v53 = vrot.slane %v389_v30, %v433_v48  ;;  %v443_v59 = vrot.slane %v389_v30, %v442_v54  ;;  %s558_s18 = scalar_lea.sflag [#allocation5], %s1430_s2  ;;  %p1550_p2 = scmp.ne.s32.totalorder %s1537_s26, 0 }
  0xcc   : > { %s1143_s27 = smov [#allocation14]  }
  0xcd   : > { %s1044_s25 = sshll.u32 %s1143_s27, 4  ;;  %s1045_s25 = int_to_ptr.vmem [resolvable:$false] %s1044_s25 }
  0xce   : > { %p1047_p5 = scmp.lt.s32.totalorder %s1470_s29, %s1045_s25 }
 0x145   : > { %v375_v11 = vpop.permute.xlu1 %374 }
 0x149   : > { %v381_v15 = vpop.permute.xlu1 %380 }
 0x152   : > { %v361_v4 = vpop.xlane.xlu0 %360 }
 0x153   : > { %v363_v5 = vmul.f32 0.0078125, %v361_v4 }
 0x155   : > { %v364_v6 = vsub.f32 %v357_v0, %v363_v5  ;;  %v452_v0 = vrot.slane %v389_v30, %v451_v60 }
 0x157   : > { %v365_v7 = vmul.f32 %v364_v6, %v364_v6 }
 0x159   : > { %366 = vadd.xlane.f32.xlu0 %v365_v7 }
 0x1e6   : > { %v367_v8 = vpop.xlane.xlu0 %366 }
 0x1e7   : > { %v368_v9 = vmul.f32 0.0078125, %v367_v8 }
 0x1e9   : > { %v369_v10 = vadd.f32 1e-05, %v368_v9 }
 0x1eb   : > { %864 = vrsqrt.f32 %v369_v10  ;;  %v468_v10 = vld [vmem:[#allocation12] sm:$0xf] }
 0x1f5   : > { %v865_v12 = vpop.eup %864 }
 0x1f6   : > { %v371_v13 = vmul.f32 %v865_v12, %v364_v6 }
 0x1f8   : > { %v377_v14 = vmul.f32 %v375_v11, %v371_v13 }
 0x1fa   : > { %v383_v16 = vadd.f32 %v381_v15, %v377_v14 }
 0x1fc   : > { %v385_v17 = vmul.f32 0.70710677, %v383_v16  ;;  %v384_v21 = vmul.f32 0.5, %v383_v16 }
 0x1fe   : > { %866 = verf.f32 %v385_v17 }
 0x208   : > { %v867_v20 = vpop.eup %866 }
 0x209   : > { %v387_v22 = vadd.f32 1.0, %v867_v20 }
 0x20b   : > { %v388_v23 = vmul.f32 %v387_v22, %v384_v21 }
 0x20d   : > { %400 = vrot.lane.b32.xlu1 %v388_v23, %s1134_s14  ;;  %391 = vrot.lane.b32.xlu0 %v388_v23, %s1135_s20  ;;  %v427_v25 = vpack.c.bf16 %v388_v23, %v388_v23  ;;  %s1040_s14 = scalar_lea.vmem %s1470_s29, 128  ;;  %s1046_s20 = scalar_lea.vmem %s1045_s25, 256 }
 0x20e   : > { %p1041_p0 = scmp.ne.s32.totalorder %s1470_s29, %s1040_s14  ;;  %p1048_p7 = scmp.lt.s32.totalorder %s1046_s20, %s1040_s14 }
 0x20f   : > { %428 = vst [vmem:[#allocation2 + $0x10] sm:$0xf] %v427_v25 }
 0x210   : > { %p1042_p4 = pnand %p1041_p0, %p1550_p2  ;;  %p1049_p8 = por %p1048_p7, %p1047_p5 }
 0x211   : > { %409 = vrot.lane.b32.xlu1 %v388_v23, %s1136_s30  ;;  %456 = vrot.lane.b32.xlu0 %v388_v23, %s1137_s16 }
 0x212   : > { %p1043_p10 = pneg %p1042_p4 }
 0x214   : > { %p1050_p6 = pnand %p1049_p8, %p1043_p10 }
 0x215   : > { %418 = vrot.lane.b32.xlu1 %v388_v23, %s1138_s19 }
 0x219   : > { %429 = vrot.lane.b32.xlu1 %v388_v23, %s1139_s11 }
 0x21d   : > { %438 = vrot.lane.b32.xlu1 %v388_v23, %s1140_s13 }
 0x221   : > { %447 = vrot.lane.b32.xlu1 %v388_v23, %s1141_s9 }
 0x27f   : > { %v401_v34 = vpop.permute.xlu1 %400  ;;  %v392_v35 = vpop.permute.xlu0 %391 }
 0x280   : > { %v406_v36 = vmul.f32 %v405_v31, %v401_v34  ;;  %v397_v37 = vmul.f32 %v396_v32, %v392_v35 }
 0x282   : > { %v407_v41 = vpack.c.bf16 %v406_v36, %v406_v36  ;;  %v398_v42 = vpack.c.bf16 %v397_v37, %v397_v37 }
 0x283   : > { %v410_v43 = vpop.permute.xlu1 %409  ;;  %v457_v44 = vpop.permute.xlu0 %456 }
 0x284   : > { %408 = vst [vmem:[#allocation2 + $0x4] sm:$0xf] %v407_v41  ;;  %399 = vst [vmem:[#allocation2] sm:$0xf] %v398_v42  ;;  %v415_v45 = vmul.f32 %v414_v38, %v410_v43  ;;  %v462_v46 = vmul.f32 %v721_v40, %v457_v44 }
 0x286   : > { %v416_v49 = vpack.c.bf16 %v415_v45, %v415_v45  ;;  %v463_v50 = vpack.c.bf16 %v462_v46, %v462_v46 }
 0x287   : > { %v419_v51 = vpop.permute.xlu1 %418 }
 0x288   : > { %417 = vst [vmem:[#allocation2 + $0x8] sm:$0xf] %v416_v49  ;;  %464 = vst [vmem:[#allocation2 + $0x20] sm:$0xf] %v463_v50  ;;  %v424_v52 = vmul.f32 %v423_v47, %v419_v51 }
 0x28a   : > { %v425_v55 = vpack.c.bf16 %v424_v52, %v424_v52 }
 0x28b   : > { %v430_v56 = vpop.permute.xlu1 %429  ;;  %v859_v57 = vld [vmem:[#allocation2] sm:$0xff]  }
 0x28c   : > { %426 = vst [vmem:[#allocation2 + $0xc] sm:$0xf] %v425_v55  ;;  %v435_v58 = vmul.f32 %v434_v53, %v430_v56  ;;  %739 = vmatpush3.bf16.msra.mxu0 %v859_v57 }
 0x28d   : > { %740 = vmatprep.subr.bf16.mxu0 %v1133_v24 }
 0x28e   : > { %v436_v61 = vpack.c.bf16 %v435_v58, %v435_v58 }
 0x28f   : > { %v439_v62 = vpop.permute.xlu1 %438  ;;  %v863_v8 = vld [vmem:[#allocation2 + $0x20] sm:$0x3f]  }
 0x290   : > { %437 = vst [vmem:[#allocation2 + $0x14] sm:$0xf] %v436_v61  ;;  %v444_v63 = vmul.f32 %v443_v59, %v439_v62  ;;  %v514_v9 = vsel %vm512_vm1, %v863_v8, 0 }
 0x292   : > { %v445_v1 = vpack.c.bf16 %v444_v63, %v444_v63 }
 0x293   : > { %v448_v2 = vpop.permute.xlu1 %447  ;;  %v860_v3 = vld [vmem:[#allocation2 + $0x8] sm:$0xff]  }
 0x294   : > { %446 = vst [vmem:[#allocation2 + $0x18] sm:$0xf] %v445_v1  ;;  %v453_v4 = vmul.f32 %v452_v0, %v448_v2  ;;  %741 = vmatpush3.bf16.msra.mxu0 %v860_v3 }
 0x295   : > { %742 = vmatprep.subr.bf16.mxu0 %v1133_v24 }
 0x296   : > { %v454_v5 = vpack.c.bf16 %v453_v4, %v453_v4 }
 0x297   : > { %v861_v6 = vld [vmem:[#allocation2 + $0x10] sm:$0xff]  }
 0x298   : > { %455 = vst [vmem:[#allocation2 + $0x1c] sm:$0xf] %v454_v5  ;;  %743 = vmatpush3.bf16.msra.mxu0 %v861_v6 }
 0x299   : > { %744 = vmatprep.subr.bf16.mxu0 %v1133_v24 }
 0x29f   : > { %v862_v7 = vld [vmem:[#allocation2 + $0x18] sm:$0xff]  }
 0x2a0   : > { %745 = vmatpush3.bf16.msra.mxu0 %v862_v7 }
 0x2a1   : > { %746 = vmatprep.subr.bf16.mxu0 %v1133_v24 }
 0x2a4   : > { %747 = vmatpush3.bf16.msra.mxu0 %v514_v9 }
 0x2a7   : > { %749 = vmatmul.mubr.msk.bf16.vlgmr.msra.gmra.mrb[0].mxu0 %vm508_vm2, %v468_v10 }
 0x37a   : > { %v550_v11 = vpop.f32.mrb[0].mxu0 }
 0x37b   : > { %556 = vst [vmem:[%s355_s15] sm:$0xff] %v550_v11  ;;  %v750_v12 = vpop.f32.mrb[1].mxu0 }
 0x37c   : > { %v553_v13 = vpop.f32.mrb[2].mxu0 }
 0x37d   : > { %1053 = shalt.err (!%p1050_p6)
}
 0x37e   : > { %s1054_s2 = scalar_lea.hbm %s1475_s10, 128  ;;  %s1058_s19 = scalar_lea.hbm %s1523_s6, 256 }
 0x37f   : > { %p1055_p11 = scmp.ne.s32.totalorder %s1475_s10, %s1054_s2  ;;  %p1059_p12 = scmp.lt.u32.totalorder %s1475_s10, %s1523_s6 }
 0x380   : > { %p1060_p3 = scmp.lt.u32.totalorder %s1058_s19, %s1054_s2  ;;  %p1062_p0 = scmp.lt.u32.totalorder %s1054_s2, %s1475_s10 }
 0x381   : > { %p1056_p1 = pnand %p1055_p11, %p1550_p2 }
 0x382   : > { %p1061_p13 = por %p1060_p3, %p1059_p12 }
 0x383   : > { %p1057_p9 = pneg %p1056_p1 }
 0x384   : > { %p1063_p4 = por %p1062_p0, %p1061_p13 }
 0x386   : > { %p1064_p10 = pnand %p1063_p4, %p1057_p9 }
 0x388   : > { %1067 = shalt.err (!%p1064_p10)
}
 0x389   : > { %772 = dma.vmem_to_hbm [thread:$0]  (%p1550_p2), %s1470_s29, 128, %s1475_s10, %s558_s18   ;;  %v751_v14 = vpop.f32.mrb[3].mxu0 }
 0x38a PF: > { %s583_s9 = sand.u32 1, %s1110_s21   ;;  %p1551_p5 = scmp.ne.s32.totalorder %s1538_s17, 0 }
 0x38b   : > { %p1552_p7 = scmp.ge.s32.totalorder %s1122_s24, 2  ;;  %s584_s15 = scalar_lea.sflag [#allocation5], %s583_s9 }
 0x38d   : > { %p795_p8 = pnand %p1552_p7, %p1551_p5 }
 0x38f   : > { %1105 = dma.done.wait (!%p795_p8), %s584_s15, 128  }
 0x390   : > { %1107 = vsyncadd (!%p795_p8), %s584_s15, 4294967168  ;;  %p24_p6 = scmp.ge.s32.totalorder %s1319_s7, 4   ;;  %s1553_s21 = smov %s1114_s22 }
 0x391   : > { %s1554_s22 = smov %s1118_s23  ;;  %s1555_s23 = smov %s1330_s12 }
 0x392   : > { %s1556_s24 = smov %s1319_s7  ;;  %26 = sbr.rel (!%p24_p6) target bundleno = 12 (0xc), region = 118 }
 0x399   :  { %589 = vsyncpa [#allocation4], 1 }
 0x39a   :  { %591 = vsyncpa [#allocation4 + $0x1], 1 }
 0x39b   :  { %592 = vsyncpa [#allocation7], 1 }
 0x39c   :  { %594 = vsyncpa [#allocation7 + $0x1], 1 }
 0x39d   :  { %595 = vsyncpa [#allocation10], 1 }
 0x39e   :  { %596 = vsyncpa [#allocation13], 1 }
 0x39f   :  { %597 = vsyncpa [#allocation5], 1 }
 0x3a0   :  { %599 = vsyncpa [#allocation5 + $0x1], 1 }

// kernel: mdx_forward.6
= control target key start
LH: loop header
LB: loop body
LE: loop exit
PB: predicated region body
PF: predicated region fallthrough
CT: control target
= control target key end

     0   :  { %10 = vsyncpa [#allocation4], 0  ;;  %s1324_s0 = inlined_call_operand.hbm [shape: f32[2,4,128], index: 0, kind: input, shape index: {}]   ;;  %s1325_s1 = inlined_call_operand.hbm [shape: f32[9,128], index: 1, kind: input, shape index: {}]   ;;  %s1326_s2 = inlined_call_operand.hbm [shape: f32[4,1], index: 2, kind: input, shape index: {}]   ;;  %s1327_s3 = inlined_call_operand.hbm [shape: f32[4,1], index: 3, kind: input, shape index: {}]   ;;  %s1328_s4 = inlined_call_operand.hbm [shape: bf16[8,36], index: 4, kind: input, shape index: {}]   ;;  %s1329_s5 = inlined_call_operand.hbm [shape: f32[2,8,128], index: 5, kind: output, shape index: {}]  }
   0x1   :  { %12 = vsyncpa [#allocation4 + $0x1], 0 }
   0x2   :  { %13 = vsyncpa [#allocation7], 0 }
   0x3   :  { %14 = vsyncpa [#allocation10], 0 }
   0x4   :  { %15 = vsyncpa [#allocation5], 0 }
   0x5   :  { %17 = vsyncpa [#allocation5 + $0x1], 0  ;;  %s1039_s18 = smov 0   ;;  %s1041_s19 = smov 0  }
   0x6   :  { %s1043_s20 = smov 0   ;;  %s1045_s21 = smov 0  }
   0x7 LB: > { %s990_s22 = smov [#allocation6]   ;;  %s1060_s24 = sadd.s32 4294967295, %s988_s21   ;;  %s988_s21 = sphi %s1045_s21, %s1353_s21   ;;  %s984_s20 = sphi %s1043_s20, %s1352_s20   ;;  %s980_s19 = sphi %s1041_s19, %s1351_s19   ;;  %s976_s18 = sphi %s1039_s18, %s1350_s18  }
   0x8   : > { %s176_s23 = sshll.u32 %s990_s22, 4  ;;  %p617_p0 = scmp.ge.s32.totalorder %s988_s21, 1  ;;  %s1065_s23 = int_to_ptr.vmem [resolvable:$true] %s176_s23 }
   0x9   : > { %p1330_p1 = scmp.eq.s32.totalorder %s1060_s24, 0  ;;  %p164_p2 = scmp.lt.s32.totalorder %s988_s21, 3 }
   0xa   : > { %s991_s26 = smov [#allocation9]   ;;  %s992_s29 = smov [#allocation8]  }
   0xb   : > { %p1067_p3 = pnand %p617_p0, %p164_p2  ;;  %s201_s27 = sshll.u32 %s991_s26, 4  ;;  %s1080_s27 = int_to_ptr.vmem [resolvable:$true] %s201_s27 }
   0xc   : > { %s190_s30 = sshll.u32 %s992_s29, 4  ;;  %s772_s8 = scalar_lea.hbm %s1325_s1, 256  ;;  %s1082_s30 = int_to_ptr.vmem [resolvable:$true] %s190_s30 }
   0xd   : > { %s1333_s25 = scalar_select %p1067_p3, 1, 0 }
   0xe   : > { %p683_p5 = pneg %p1067_p3  ;;  %p773_p7 = scmp.ne.s32.totalorder %s1325_s1, %s772_s8 }
   0xf   : > { %p779_p11 = scmp.lt.u32.totalorder %s772_s8, %s1325_s1 }
  0x10   : > { %p1076_p6 = pnand %p683_p5, %p1330_p1 }
  0x12   : > { %p1092_p8 = pneg %p1076_p6 }
  0x14   : > { %p775_p9 = pnand %p1092_p8, %p773_p7 }
  0x16   : > { %p776_p10 = pneg %p775_p9 }
  0x18   : > { %p781_p12 = pnand %p779_p11, %p776_p10 }
  0x1a   : > { %784 = shalt.err (!%p781_p12)
}
  0x1b   : > { %s785_s14 = scalar_lea.vmem %s1065_s23, 256  ;;  %p793_p5 = scmp.lt.s32.totalorder %s1065_s23, %s1065_s23 }
  0x1c   : > { %p786_p13 = scmp.ne.s32.totalorder %s1065_s23, %s785_s14  ;;  %p794_p4 = scmp.lt.s32.totalorder %s785_s14, %s785_s14 }
  0x1e   : > { %p788_p0 = pnand %p786_p13, %p1092_p8  ;;  %p795_p7 = por %p794_p4, %p793_p5 }
  0x20   : > { %p789_p2 = pneg %p788_p0 }
  0x22   : > { %p796_p9 = pnand %p795_p7, %p789_p2 }
  0x24   : > { %799 = shalt.err (!%p796_p9)
}
  0x25   : > { %s993_s15 = smov 128   ;;  %s994_s16 = smov 8  }
  0x26   : > { %686 = dma.hbm_to_vmem [thread:$0]  (!%p1076_p6), %s1325_s1, 256, %s1065_s23, [#allocation7], %s993_s15, %s993_s15, %s994_s16  }
  0x27   : > { %s800_s6 = scalar_lea.hbm %s1327_s3, 64 }
  0x28   : > { %p801_p4 = scmp.ne.s32.totalorder %s1327_s3, %s800_s6  ;;  %p807_p12 = scmp.lt.u32.totalorder %s800_s6, %s1327_s3 }
  0x2a   : > { %p803_p10 = pnand %p801_p4, %p1092_p8 }
  0x2c   : > { %p804_p11 = pneg %p803_p10 }
  0x2e   : > { %p809_p13 = pnand %p807_p12, %p804_p11 }
  0x30   : > { %812 = shalt.err (!%p809_p13)
}
  0x31   : > { %s813_s23 = scalar_lea.vmem %s1080_s27, 64  ;;  %p821_p7 = scmp.lt.s32.totalorder %s1080_s27, %s1080_s27 }
  0x32   : > { %p814_p0 = scmp.ne.s32.totalorder %s1080_s27, %s813_s23  ;;  %p822_p9 = scmp.lt.s32.totalorder %s813_s23, %s813_s23 }
  0x34   : > { %p816_p2 = pnand %p814_p0, %p1092_p8  ;;  %p823_p4 = por %p822_p9, %p821_p7 }
  0x36   : > { %p817_p5 = pneg %p816_p2 }
  0x38   : > { %p824_p10 = pnand %p823_p4, %p817_p5 }
  0x3a   : > { %827 = shalt.err (!%p824_p10)
}
  0x3b   : > { %692 = dma.hbm_to_vmem [thread:$0]  (!%p1076_p6), %s1327_s3, 64, %s1080_s27, [#allocation10]  }
  0x3c   : > { %s828_s16 = scalar_lea.hbm %s1326_s2, 64 }
  0x3d   : > { %p829_p11 = scmp.ne.s32.totalorder %s1326_s2, %s828_s16  ;;  %p835_p0 = scmp.lt.u32.totalorder %s828_s16, %s1326_s2 }
  0x3f   : > { %p831_p12 = pnand %p829_p11, %p1092_p8 }
  0x41   : > { %p832_p13 = pneg %p831_p12 }
  0x43   : > { %p837_p2 = pnand %p835_p0, %p832_p13 }
  0x45   : > { %840 = shalt.err (!%p837_p2)
}
  0x46   : > { %s841_s27 = scalar_lea.vmem %s1082_s30, 64  ;;  %p849_p4 = scmp.lt.s32.totalorder %s1082_s30, %s1082_s30 }
  0x47   : > { %p842_p5 = scmp.ne.s32.totalorder %s1082_s30, %s841_s27  ;;  %p850_p10 = scmp.lt.s32.totalorder %s841_s27, %s841_s27 }
  0x49   : > { %p844_p7 = pnand %p842_p5, %p1092_p8  ;;  %p851_p11 = por %p850_p10, %p849_p4 }
  0x4b   : > { %p845_p9 = pneg %p844_p7 }
  0x4d   : > { %p852_p12 = pnand %p851_p11, %p845_p9 }
  0x4f   : > { %855 = shalt.err (!%p852_p12)
}
  0x50   : > { %689 = dma.hbm_to_vmem [thread:$0]  (!%p1076_p6), %s1326_s2, 64, %s1082_s30, [#allocation7]  }
  0x51   : > { %s995_s8 = smov [#allocation11]   ;;  %s856_s12 = scalar_lea.hbm %s1328_s4, 64 }
  0x52   : > { %s212_s9 = sshll.u32 %s995_s8, 4  ;;  %p857_p13 = scmp.ne.s32.totalorder %s1328_s4, %s856_s12  ;;  %s213_s9 = int_to_ptr.vmem [resolvable:$true] %s212_s9 }
  0x53   : > { %p863_p5 = scmp.lt.u32.totalorder %s856_s12, %s1328_s4 }
  0x54   : > { %p859_p0 = pnand %p857_p13, %p1092_p8 }
  0x56   : > { %p860_p2 = pneg %p859_p0 }
  0x58   : > { %p865_p7 = pnand %p863_p5, %p860_p2 }
  0x5a   : > { %868 = shalt.err (!%p865_p7)
}
  0x5b   : > { %s869_s30 = scalar_lea.vmem %s213_s9, 64  ;;  %p877_p11 = scmp.lt.s32.totalorder %s213_s9, %s213_s9 }
  0x5c   : > { %p870_p9 = scmp.ne.s32.totalorder %s213_s9, %s869_s30  ;;  %p878_p12 = scmp.lt.s32.totalorder %s869_s30, %s869_s30 }
  0x5e   : > { %p872_p4 = pnand %p870_p9, %p1092_p8  ;;  %p879_p1 = por %p878_p12, %p877_p11 }
  0x60   : > { %p873_p10 = pneg %p872_p4 }
  0x62   : > { %p880_p3 = pnand %p879_p1, %p873_p10 }
  0x64   : > { %883 = shalt.err (!%p880_p3)
}
  0x65   : > { %695 = dma.hbm_to_vmem [thread:$0]  (!%p1076_p6), %s1328_s4, 64, %s213_s9, [#allocation10]  }
  0x66   : > { %s616_s11 = sadd.s32 4294967294, %s988_s21   ;;  %s1179_s28 = sadd.s32 1, %s988_s21  }
  0x67   : > { %s27_s26 = ssub.s32 %s988_s21, %s1179_s28  ;;  %s30_s29 = sadd.s32 1, %s984_s20 }
  0x68   : > { %p28_p1 = scmp.eq.s32.totalorder %s27_s26, 0  ;;  %p37_p3 = scmp.ne.s32.totalorder %s984_s20, %s980_s19 }
  0x69   : > { %p38_p8 = scmp.eq.s32.totalorder %s988_s21, 0  ;;  %p43_p13 = scmp.ne.s32.totalorder %s980_s19, %s976_s18 }
  0x6a   : > { %s1190_s27 = scalar_select %p28_p1, %s984_s20, %s30_s29  }
  0x6b   : > { %p1192_p0 = por %p38_p8, %p37_p3  ;;  %p1337_p2 = scmp.eq.s32.totalorder %s1060_s24, 0 }
  0x6c   : > { %p151_p5 = scmp.eq.s32.totalorder %s1060_s24, 1  ;;  %p157_p7 = scmp.eq.s32.totalorder %s616_s11, 1 }
  0x6d   : > { %p1198_p6 = por %p1337_p2, %p43_p13  ;;  %p708_p9 = scmp.lt.s32.totalorder %s988_s21, 2 }
  0x6e   : > { %s223_s8 = sand.u32 1, %s984_s20   ;;  %p1205_p4 = por %p151_p5, %p37_p3 }
  0x6f   : > { %p1209_p10 = por %p157_p7, %p43_p13  ;;  %s623_s23 = sshll.u32 %s223_s8, 2 }
  0x70   : > { %s1339_s9 = scalar_select %p1205_p4, 1, 0 }
  0x71   : > { %s1340_s10 = scalar_select %p1209_p10, 1, 0 }
  0x72   : > { %s624_s12 = sshll.u32 %s988_s21, 6  ;;  %s227_s16 = scalar_lea.vmem [#allocation3], %s623_s23 }
  0x73   : > { %s1217_s15 = scalar_lea.hbm %s1324_s0, %s624_s12  ;;  %s234_s30 = sshll.u32 %s227_s16, 4  ;;  %s1219_s30 = int_to_ptr.vmem [resolvable:$true] %s234_s30 }
  0x74   : > { %p1223_p11 = pnand %p708_p9, %p1192_p0  ;;  %s224_s22 = scalar_lea.sflag [#allocation4], %s223_s8 }
  0x75   : > { %s884_s11 = scalar_lea.hbm %s1217_s15, 64  ;;  %s889_s23 = scalar_lea.hbm %s1324_s0, 128 }
  0x76   : > { %p885_p12 = scmp.ne.s32.totalorder %s1217_s15, %s884_s11  ;;  %p886_p1 = pneg %p1223_p11 }
  0x77   : > { %p890_p13 = scmp.lt.u32.totalorder %s1217_s15, %s1324_s0  ;;  %p891_p0 = scmp.lt.u32.totalorder %s889_s23, %s884_s11 }
  0x78   : > { %p887_p3 = pnand %p886_p1, %p885_p12  ;;  %p893_p5 = scmp.lt.u32.totalorder %s884_s11, %s1217_s15 }
  0x79   : > { %p892_p2 = por %p891_p0, %p890_p13 }
  0x7a   : > { %p888_p8 = pneg %p887_p3 }
  0x7b   : > { %p894_p7 = por %p893_p5, %p892_p2 }
  0x7d   : > { %p895_p9 = pnand %p894_p7, %p888_p8 }
  0x7f   : > { %898 = shalt.err (!%p895_p9)
}
  0x80   : > { %s899_s8 = scalar_lea.vmem %s1219_s30, 64  ;;  %s996_s13 = smov [#allocation3]  }
  0x81   : > { %p900_p12 = scmp.ne.s32.totalorder %s1219_s30, %s899_s8  ;;  %s904_s14 = sshll.u32 %s996_s13, 4  ;;  %s905_s14 = int_to_ptr.vmem [resolvable:$false] %s904_s14 }
  0x82   : > { %s906_s16 = scalar_lea.vmem %s905_s14, 128  ;;  %p907_p4 = scmp.lt.s32.totalorder %s1219_s30, %s905_s14 }
  0x83   : > { %p902_p3 = pnand %p900_p12, %p886_p1  ;;  %p908_p13 = scmp.lt.s32.totalorder %s906_s16, %s899_s8 }
  0x85   : > { %p903_p10 = pneg %p902_p3  ;;  %p909_p0 = por %p908_p13, %p907_p4 }
  0x87   : > { %p910_p2 = pnand %p909_p0, %p903_p10 }
  0x89   : > { %913 = shalt.err (!%p910_p2)
}
  0x8a   : > { %699 = dma.hbm_to_vmem [thread:$0]  (!%p1223_p11), %s1217_s15, 64, %s1219_s30, %s224_s22  }
  0x8b   : > { %p1342_p8 = scmp.ne.s32.totalorder %s1333_s25, 0 }
  0x8c   : > { %s1255_s11 = sand.u32 (!%p1342_p8), 1, %s980_s19  }
  0x8d   : > { %243 = sbr.rel (%p1342_p8) target bundleno = 867 (0x363), region = 40  ;;  %s626_s26 = sshll.u32 (!%p1342_p8), %s1255_s11, 2 }
  0x8e   : > { %s246_s29 = scalar_lea.sflag (!%p1342_p8), [#allocation4], %s1255_s11  ;;  %s249_s23 = scalar_lea.vmem (!%p1342_p8), [#allocation3], %s626_s26 }
  0x94   : > { %959 = dma.done.wait (%p1198_p6), %s246_s29, 64  }
  0x95   : > { %961 = vsyncadd (%p1198_p6), %s246_s29, 4294967232  ;;  %p1343_p4 = scmp.eq.s32.totalorder %s1060_s24, 0 }
  0x97   : > { %963 = dma.done.wait (%p1343_p4), [#allocation7], 320   ;;  %p1344_p10 = pmov %p1343_p4 }
  0x98   : > { %p1345_p11 = pmov %p1343_p4 }
  0x99   : > { %965 = vsyncadd (%p1344_p10), [#allocation7], 4294966976 }
  0x9a   : > { %967 = dma.done.wait (%p1345_p11), [#allocation10], 128   ;;  %p1346_p1 = pmov %p1343_p4 }
  0x9b   : > { %vm296_vm0 = vcmask 1043456   ;;  %v293_v0 = vld [vmem:[%s249_s23] sm:$0xf]  ;;  %v294_v2 = vld [vmem:[#allocation8] sm:$0xf]  ;;  %v997_v3 = vmov 0   ;;  %v332_v26 = vlaneseq }
  0x9c   : > { %969 = vsyncadd (%p1346_p1), [#allocation10], 4294967168  ;;  %v297_v1 = vsel %vm296_vm0, %v293_v0, 0.0  ;;  %763 = vset.pattern.permute.xlu1 %v997_v3  ;;  %764 = vset.pattern.permute.xlu0 %v997_v3  ;;  %v295_v4 = vld [vmem:[#allocation9] sm:$0xf]  ;;  %s998_s25 = smov 1  }
  0x9d   : > { %298 = vadd.xlane.f32.xlu0 %v297_v1  ;;  %313 = vperm.xlu1 %763, %v294_v2   ;;  %s999_s7 = smov 16   ;;  %s1000_s15 = smov 17   ;;  %v1002_v25 = vmov 0.0   ;;  %vm1007_vm1 = vmmov 0   ;;  %v333_v27 = vshrl.u32 %v332_v26, 7  ;;  %v328_v30 = vld [vmem:[#allocation6] sm:$0xff] }
  0x9e   : > { %s1001_s30 = smov 111   ;;  %653 = vmatprep.subr.bf16.mxu0 %v1002_v25  ;;  %s1003_s17 = smov 15   ;;  %659 = vmatprep.mubr.msk.bf16.mxu0 %vm1007_vm1, %v1002_v25  ;;  %v636_v40 = vld [vmem:[#allocation6 + $0x8] ss:$0 sm:$0xff]  ;;  %vm449_vm2 = vcmask 1041408   ;;  %vm445_vm3 = vcmask 293888  }
  0x9f   : > { %s1004_s22 = smov 127   ;;  %s1005_s6 = smov 112   ;;  %v366_v28 = vsub.s32 3, %v333_v27  ;;  %v343_v29 = vsub.s32 1, %v333_v27  ;;  %v334_v33 = vsub.s32 0, %v333_v27  ;;  %v357_v36 = vsub.s32 2, %v333_v27 }
  0xa0   : > { %s1006_s12 = smov 113   ;;  %v382_v46 = vsub.s32 5, %v333_v27  ;;  %v405_v56 = vsub.s32 7, %v333_v27  ;;  %v396_v61 = vsub.s32 6, %v333_v27  ;;  %s631_s8 = sshll.u32 %s1255_s11, 3 }
  0xa1   : > { %319 = vperm.xlu1 %763, %v295_v4   ;;  %v367_v31 = vrot.slane %v328_v30, %v366_v28  ;;  %v344_v32 = vrot.slane %v328_v30, %v343_v29  ;;  %v335_v39 = vrot.slane %v328_v30, %v334_v33  ;;  %v358_v45 = vrot.slane %v328_v30, %v357_v36  ;;  %s291_s13 = scalar_lea.vmem [#allocation12], %s631_s8  ;;  %s642_s16 = sshll.u32 %s1060_s24, 7 }
  0xa2   : > { %v383_v55 = vrot.slane %v328_v30, %v382_v46  ;;  %v406_v60 = vrot.slane %v328_v30, %v405_v56  ;;  %v397_v2 = vrot.slane %v328_v30, %v396_v61  ;;  %s508_s14 = sshll.u32 %s291_s13, 4  ;;  %s1282_s23 = scalar_lea.hbm %s1329_s5, %s642_s16  ;;  %s1277_s14 = int_to_ptr.vmem [resolvable:$true] %s508_s14 }
  0xa3   : > { %p1347_p5 = scmp.ne.s32.totalorder %s1339_s9, 0  ;;  %s1008_s24 = smov [#allocation12]  }
 0x11c   : > { %v314_v13 = vpop.permute.xlu1 %313 }
 0x120   : > { %v320_v17 = vpop.permute.xlu1 %319 }
 0x12a   : > { %v299_v5 = vpop.xlane.xlu0 %298 }
 0x12b   : > { %v301_v6 = vmul.f32 0.0078125, %v299_v5 }
 0x12d   : > { %v302_v7 = vsub.f32 %v293_v0, %v301_v6 }
 0x12f   : > { %v303_v8 = vmul.f32 %v302_v7, %v302_v7 }
 0x131   : > { %v304_v9 = vsel %vm296_vm0, %v303_v8, 0.0 }
 0x132   : > { %305 = vadd.xlane.f32.xlu0 %v304_v9 }
 0x1bf   : > { %v306_v10 = vpop.xlane.xlu0 %305 }
 0x1c0   : > { %v307_v11 = vmul.f32 0.0078125, %v306_v10 }
 0x1c2   : > { %v308_v12 = vadd.f32 1e-05, %v307_v11 }
 0x1c4   : > { %768 = vrsqrt.f32 %v308_v12  ;;  %v424_v12 = vld [vmem:[#allocation11] sm:$0xf] }
 0x1ce   : > { %v769_v14 = vpop.eup %768 }
 0x1cf   : > { %v310_v15 = vmul.f32 %v769_v14, %v302_v7 }
 0x1d1   : > { %v316_v16 = vmul.f32 %v314_v13, %v310_v15 }
 0x1d3   : > { %v322_v18 = vadd.f32 %v320_v17, %v316_v16 }
 0x1d5   : > { %v324_v19 = vmul.f32 0.70710677, %v322_v18  ;;  %v323_v21 = vmul.f32 0.5, %v322_v18 }
 0x1d7   : > { %770 = verf.f32 %v324_v19 }
 0x1e1   : > { %v771_v20 = vpop.eup %770 }
 0x1e2   : > { %v326_v22 = vadd.f32 1.0, %v771_v20 }
 0x1e4   : > { %v327_v23 = vmul.f32 %v326_v22, %v323_v21 }
 0x1e6   : > { %362 = vrot.lane.b32.xlu1 %v327_v23, %s998_s25  ;;  %339 = vrot.lane.b32.xlu0 %v327_v23, %s999_s7  ;;  %v376_v24 = vpack.c.bf16 %v327_v23, %v327_v23  ;;  %s495_s25 = scalar_lea.sflag [#allocation5], %s1255_s11  ;;  %s914_s7 = scalar_lea.vmem %s1277_s14, 128 }
 0x1e7   : > { %p915_p6 = scmp.ne.s32.totalorder %s1277_s14, %s914_s7 }
 0x1e8   : > { %377 = vst [vmem:[#allocation2 + $0x8] sm:$0x3] %v376_v24 }
 0x1e9   : > { %p916_p7 = pnand %p915_p6, %p1347_p5 }
 0x1ea   : > { %330 = vrot.lane.b32.xlu1 %v327_v23, %s1000_s15  ;;  %415 = vrot.lane.b32.xlu0 %v327_v23, %s1001_s30  ;;  %s918_s15 = sshll.u32 %s1008_s24, 4  ;;  %s919_s15 = int_to_ptr.vmem [resolvable:$false] %s918_s15 }
 0x1eb   : > { %p917_p9 = pneg %p916_p7  ;;  %s920_s30 = scalar_lea.vmem %s919_s15, 256 }
 0x1ec   : > { %p921_p12 = scmp.lt.s32.totalorder %s1277_s14, %s919_s15  ;;  %p922_p3 = scmp.lt.s32.totalorder %s920_s30, %s914_s7 }
 0x1ee   : > { %353 = vrot.lane.b32.xlu1 %v327_v23, %s1003_s17  ;;  %p923_p13 = por %p922_p3, %p921_p12 }
 0x1f0   : > { %p924_p0 = pnand %p923_p13, %p917_p9 }
 0x1f2   : > { %378 = vrot.lane.b32.xlu1 %v327_v23, %s1004_s22 }
 0x1f6   : > { %401 = vrot.lane.b32.xlu1 %v327_v23, %s1005_s6 }
 0x1fa   : > { %392 = vrot.lane.b32.xlu1 %v327_v23, %s1006_s12 }
 0x258   : > { %v363_v34 = vpop.permute.xlu1 %362  ;;  %v340_v35 = vpop.permute.xlu0 %339 }
 0x259   : > { %v368_v37 = vmul.f32 %v367_v31, %v363_v34  ;;  %v345_v38 = vmul.f32 %v344_v32, %v340_v35 }
 0x25b   : > { %v646_v41 = vpack.c.bf16 %v368_v37, %v368_v37  ;;  %v645_v42 = vpack.c.bf16 %v345_v38, %v345_v38 }
 0x25c   : > { %v331_v43 = vpop.permute.xlu1 %330  ;;  %v416_v44 = vpop.permute.xlu0 %415 }
 0x25d   : > { %v373_v47 = vrot.slane %v646_v41, 6  ;;  %v350_v48 = vrot.slane %v645_v42, 6  ;;  %v336_v49 = vmul.f32 %v335_v39, %v331_v43  ;;  %v421_v50 = vmul.f32 %v636_v40, %v416_v44 }
 0x25f   : > { %375 = vst [vmem:[#allocation2 + $0x4] sm:$0xc] %v373_v47  ;;  %352 = vst [vmem:[#allocation2] sm:$0xc] %v350_v48  ;;  %v337_v51 = vpack.c.bf16 %v336_v49, %v336_v49  ;;  %v422_v52 = vpack.c.bf16 %v421_v50, %v421_v50 }
 0x260   : > { %v354_v53 = vpop.permute.xlu1 %353 }
 0x261   : > { %338 = vst [vmem:[#allocation2] sm:$0x3] %v337_v51  ;;  %423 = vst [vmem:[#allocation2 + $0x10] sm:$0x3] %v422_v52  ;;  %v359_v54 = vmul.f32 %v358_v45, %v354_v53 }
 0x263   : > { %v360_v57 = vpack.c.bf16 %v359_v54, %v359_v54 }
 0x264   : > { %v379_v58 = vpop.permute.xlu1 %378 }
 0x265   : > { %361 = vst [vmem:[#allocation2 + $0x4] sm:$0x3] %v360_v57  ;;  %v384_v59 = vmul.f32 %v383_v55, %v379_v58 }
 0x267   : > { %v647_v62 = vpack.c.bf16 %v384_v59, %v384_v59 }
 0x268   : > { %v402_v63 = vpop.permute.xlu1 %401  ;;  %v767_v10 = vld [vmem:[#allocation2 + $0x10] ss:$0 sps:$4 sm:$0x33]  }
 0x269   : > { %v389_v0 = vrot.slane %v647_v62, 6  ;;  %v407_v1 = vmul.f32 %v406_v60, %v402_v63  ;;  %v451_v11 = vsel %vm449_vm2, %v767_v10, 0 }
 0x26b   : > { %391 = vst [vmem:[#allocation2 + $0x8] sm:$0xc] %v389_v0  ;;  %v648_v3 = vpack.c.bf16 %v407_v1, %v407_v1 }
 0x26c   : > { %v393_v4 = vpop.permute.xlu1 %392  ;;  %v765_v5 = vld [vmem:[#allocation2] sm:$0xff]  }
 0x26d   : > { %v412_v6 = vrot.slane %v648_v3, 6  ;;  %v398_v7 = vmul.f32 %v397_v2, %v393_v4  ;;  %654 = vmatpush3.bf16.msra.mxu0 %v765_v5 }
 0x26e   : > { %655 = vmatprep.subr.bf16.mxu0 %v1002_v25 }
 0x26f   : > { %414 = vst [vmem:[#allocation2 + $0xc] sm:$0xc] %v412_v6  ;;  %v399_v8 = vpack.c.bf16 %v398_v7, %v398_v7 }
 0x271   : > { %400 = vst [vmem:[#allocation2 + $0xc] sm:$0x3] %v399_v8 }
 0x278   : > { %v766_v9 = vld [vmem:[#allocation2 + $0x8] sm:$0xff]  }
 0x279   : > { %656 = vmatpush3.bf16.msra.mxu0 %v766_v9 }
 0x27a   : > { %657 = vmatprep.subr.bf16.mxu0 %v1002_v25 }
 0x27d   : > { %658 = vmatpush3.bf16.msra.mxu0 %v451_v11 }
 0x280   : > { %660 = vmatmul.mubr.msk.bf16.vlgmr.msra.gmra.mrb[0].mxu0 %vm445_vm3, %v424_v12 }
 0x353   : > { %v487_v13 = vpop.f32.mrb[0].mxu0 }
 0x354   : > { %493 = vst [vmem:[%s291_s13] sm:$0xff] %v487_v13  ;;  %v661_v14 = vpop.f32.mrb[1].mxu0 }
 0x355   : > { %v490_v15 = vpop.f32.mrb[2].mxu0 }
 0x356   : > { %927 = shalt.err (!%p924_p0)
}
 0x357   : > { %s928_s11 = scalar_lea.hbm %s1282_s23, 128  ;;  %s932_s6 = scalar_lea.hbm %s1329_s5, 256 }
 0x358   : > { %p929_p2 = scmp.ne.s32.totalorder %s1282_s23, %s928_s11  ;;  %p933_p10 = scmp.lt.u32.totalorder %s1282_s23, %s1329_s5 }
 0x359   : > { %p934_p11 = scmp.lt.u32.totalorder %s932_s6, %s928_s11  ;;  %p936_p6 = scmp.lt.u32.totalorder %s928_s11, %s1282_s23 }
 0x35a   : > { %p930_p8 = pnand %p929_p2, %p1347_p5 }
 0x35b   : > { %p935_p1 = por %p934_p11, %p933_p10 }
 0x35c   : > { %p931_p4 = pneg %p930_p8 }
 0x35d   : > { %p937_p7 = por %p936_p6, %p935_p1 }
 0x35f   : > { %p938_p9 = pnand %p937_p7, %p931_p4 }
 0x361   : > { %941 = shalt.err (!%p938_p9)
}
 0x362   : > { %681 = dma.vmem_to_hbm [thread:$0]  (%p1347_p5), %s1277_s14, 128, %s1282_s23, %s495_s25   ;;  %v662_v16 = vpop.f32.mrb[3].mxu0 }
 0x363 PF: > { %s520_s13 = sand.u32 1, %s976_s18   ;;  %p1348_p12 = scmp.ne.s32.totalorder %s1340_s10, 0 }
 0x364   : > { %p1349_p3 = scmp.ge.s32.totalorder %s988_s21, 2  ;;  %s521_s16 = scalar_lea.sflag [#allocation5], %s520_s13 }
 0x366   : > { %p701_p13 = pnand %p1349_p3, %p1348_p12 }
 0x368   : > { %971 = dma.done.wait (!%p701_p13), %s521_s16, 128  }
 0x369   : > { %973 = vsyncadd (!%p701_p13), %s521_s16, 4294967168  ;;  %p20_p0 = scmp.ge.s32.totalorder %s1179_s28, 4   ;;  %s1350_s18 = smov %s980_s19 }
 0x36a   : > { %s1351_s19 = smov %s984_s20  ;;  %s1352_s20 = smov %s1190_s27 }
 0x36b   : > { %s1353_s21 = smov %s1179_s28  ;;  %22 = sbr.rel (!%p20_p0) target bundleno = 7 (0x7), region = 101 }
 0x372   :  { %526 = vsyncpa [#allocation4], 1 }
 0x373   :  { %528 = vsyncpa [#allocation4 + $0x1], 1 }
 0x374   :  { %529 = vsyncpa [#allocation7], 1 }
 0x375   :  { %530 = vsyncpa [#allocation10], 1 }
 0x376   :  { %531 = vsyncpa [#allocation5], 1 }
 0x377   :  { %533 = vsyncpa [#allocation5 + $0x1], 1 }

// kernel: mdx_forward.9
= control target key start
LH: loop header
LB: loop body
LE: loop exit
PB: predicated region body
PF: predicated region fallthrough
CT: control target
= control target key end

     0   :  { %10 = vsyncpa [#allocation4], 0  ;;  %s1324_s0 = inlined_call_operand.hbm [shape: f32[2,8,128], index: 0, kind: input, shape index: {}]   ;;  %s1325_s1 = inlined_call_operand.hbm [shape: f32[9,128], index: 1, kind: input, shape index: {}]   ;;  %s1326_s2 = inlined_call_operand.hbm [shape: f32[8,1], index: 2, kind: input, shape index: {}]   ;;  %s1327_s3 = inlined_call_operand.hbm [shape: f32[8,1], index: 3, kind: input, shape index: {}]   ;;  %s1328_s4 = inlined_call_operand.hbm [shape: bf16[8,72], index: 4, kind: input, shape index: {}]   ;;  %s1329_s5 = inlined_call_operand.hbm [shape: f32[2,8,128], index: 5, kind: output, shape index: {}]  }
   0x1   :  { %12 = vsyncpa [#allocation4 + $0x1], 0 }
   0x2   :  { %13 = vsyncpa [#allocation7], 0 }
   0x3   :  { %14 = vsyncpa [#allocation10], 0 }
   0x4   :  { %15 = vsyncpa [#allocation5], 0 }
   0x5   :  { %17 = vsyncpa [#allocation5 + $0x1], 0  ;;  %s1034_s18 = smov 0   ;;  %s1036_s19 = smov 0  }
   0x6   :  { %s1038_s20 = smov 0   ;;  %s1040_s21 = smov 0  }
   0x7 LB: > { %s985_s22 = smov [#allocation6]   ;;  %s1055_s24 = sadd.s32 4294967295, %s983_s21   ;;  %s983_s21 = sphi %s1040_s21, %s1353_s21   ;;  %s979_s20 = sphi %s1038_s20, %s1352_s20   ;;  %s975_s19 = sphi %s1036_s19, %s1351_s19   ;;  %s971_s18 = sphi %s1034_s18, %s1350_s18  }
   0x8   : > { %s176_s23 = sshll.u32 %s985_s22, 4  ;;  %p610_p0 = scmp.ge.s32.totalorder %s983_s21, 1  ;;  %s1060_s23 = int_to_ptr.vmem [resolvable:$true] %s176_s23 }
   0x9   : > { %p1330_p1 = scmp.eq.s32.totalorder %s1055_s24, 0  ;;  %p164_p2 = scmp.lt.s32.totalorder %s983_s21, 3 }
   0xa   : > { %s986_s26 = smov [#allocation9]   ;;  %s987_s29 = smov [#allocation8]  }
   0xb   : > { %p1062_p3 = pnand %p610_p0, %p164_p2  ;;  %s201_s27 = sshll.u32 %s986_s26, 4  ;;  %s1075_s27 = int_to_ptr.vmem [resolvable:$true] %s201_s27 }
   0xc   : > { %s190_s30 = sshll.u32 %s987_s29, 4  ;;  %s767_s8 = scalar_lea.hbm %s1325_s1, 256  ;;  %s1077_s30 = int_to_ptr.vmem [resolvable:$true] %s190_s30 }
   0xd   : > { %s1333_s25 = scalar_select %p1062_p3, 1, 0 }
   0xe   : > { %p676_p5 = pneg %p1062_p3  ;;  %p768_p7 = scmp.ne.s32.totalorder %s1325_s1, %s767_s8 }
   0xf   : > { %p774_p11 = scmp.lt.u32.totalorder %s767_s8, %s1325_s1 }
  0x10   : > { %p1071_p6 = pnand %p676_p5, %p1330_p1 }
  0x12   : > { %p1087_p8 = pneg %p1071_p6 }
  0x14   : > { %p770_p9 = pnand %p1087_p8, %p768_p7 }
  0x16   : > { %p771_p10 = pneg %p770_p9 }
  0x18   : > { %p776_p12 = pnand %p774_p11, %p771_p10 }
  0x1a   : > { %779 = shalt.err (!%p776_p12)
}
  0x1b   : > { %s780_s14 = scalar_lea.vmem %s1060_s23, 256  ;;  %p788_p5 = scmp.lt.s32.totalorder %s1060_s23, %s1060_s23 }
  0x1c   : > { %p781_p13 = scmp.ne.s32.totalorder %s1060_s23, %s780_s14  ;;  %p789_p4 = scmp.lt.s32.totalorder %s780_s14, %s780_s14 }
  0x1e   : > { %p783_p0 = pnand %p781_p13, %p1087_p8  ;;  %p790_p7 = por %p789_p4, %p788_p5 }
  0x20   : > { %p784_p2 = pneg %p783_p0 }
  0x22   : > { %p791_p9 = pnand %p790_p7, %p784_p2 }
  0x24   : > { %794 = shalt.err (!%p791_p9)
}
  0x25   : > { %s988_s15 = smov 128   ;;  %s989_s16 = smov 8  }
  0x26   : > { %679 = dma.hbm_to_vmem [thread:$0]  (!%p1071_p6), %s1325_s1, 256, %s1060_s23, [#allocation7], %s988_s15, %s988_s15, %s989_s16  }
  0x27   : > { %s795_s6 = scalar_lea.hbm %s1327_s3, 128 }
  0x28   : > { %p796_p4 = scmp.ne.s32.totalorder %s1327_s3, %s795_s6  ;;  %p802_p12 = scmp.lt.u32.totalorder %s795_s6, %s1327_s3 }
  0x2a   : > { %p798_p10 = pnand %p796_p4, %p1087_p8 }
  0x2c   : > { %p799_p11 = pneg %p798_p10 }
  0x2e   : > { %p804_p13 = pnand %p802_p12, %p799_p11 }
  0x30   : > { %807 = shalt.err (!%p804_p13)
}
  0x31   : > { %s808_s23 = scalar_lea.vmem %s1075_s27, 128  ;;  %p816_p7 = scmp.lt.s32.totalorder %s1075_s27, %s1075_s27 }
  0x32   : > { %p809_p0 = scmp.ne.s32.totalorder %s1075_s27, %s808_s23  ;;  %p817_p9 = scmp.lt.s32.totalorder %s808_s23, %s808_s23 }
  0x34   : > { %p811_p2 = pnand %p809_p0, %p1087_p8  ;;  %p818_p4 = por %p817_p9, %p816_p7 }
  0x36   : > { %p812_p5 = pneg %p811_p2 }
  0x38   : > { %p819_p10 = pnand %p818_p4, %p812_p5 }
  0x3a   : > { %822 = shalt.err (!%p819_p10)
}
  0x3b   : > { %685 = dma.hbm_to_vmem [thread:$0]  (!%p1071_p6), %s1327_s3, 128, %s1075_s27, [#allocation10]  }
  0x3c   : > { %s823_s16 = scalar_lea.hbm %s1326_s2, 128 }
  0x3d   : > { %p824_p11 = scmp.ne.s32.totalorder %s1326_s2, %s823_s16  ;;  %p830_p0 = scmp.lt.u32.totalorder %s823_s16, %s1326_s2 }
  0x3f   : > { %p826_p12 = pnand %p824_p11, %p1087_p8 }
  0x41   : > { %p827_p13 = pneg %p826_p12 }
  0x43   : > { %p832_p2 = pnand %p830_p0, %p827_p13 }
  0x45   : > { %835 = shalt.err (!%p832_p2)
}
  0x46   : > { %s836_s27 = scalar_lea.vmem %s1077_s30, 128  ;;  %p844_p4 = scmp.lt.s32.totalorder %s1077_s30, %s1077_s30 }
  0x47   : > { %p837_p5 = scmp.ne.s32.totalorder %s1077_s30, %s836_s27  ;;  %p845_p10 = scmp.lt.s32.totalorder %s836_s27, %s836_s27 }
  0x49   : > { %p839_p7 = pnand %p837_p5, %p1087_p8  ;;  %p846_p11 = por %p845_p10, %p844_p4 }
  0x4b   : > { %p840_p9 = pneg %p839_p7 }
  0x4d   : > { %p847_p12 = pnand %p846_p11, %p840_p9 }
  0x4f   : > { %850 = shalt.err (!%p847_p12)
}
  0x50   : > { %682 = dma.hbm_to_vmem [thread:$0]  (!%p1071_p6), %s1326_s2, 128, %s1077_s30, [#allocation7]  }
  0x51   : > { %s990_s8 = smov [#allocation11]   ;;  %s851_s12 = scalar_lea.hbm %s1328_s4, 64 }
  0x52   : > { %s212_s9 = sshll.u32 %s990_s8, 4  ;;  %p852_p13 = scmp.ne.s32.totalorder %s1328_s4, %s851_s12  ;;  %s213_s9 = int_to_ptr.vmem [resolvable:$true] %s212_s9 }
  0x53   : > { %p858_p5 = scmp.lt.u32.totalorder %s851_s12, %s1328_s4 }
  0x54   : > { %p854_p0 = pnand %p852_p13, %p1087_p8 }
  0x56   : > { %p855_p2 = pneg %p854_p0 }
  0x58   : > { %p860_p7 = pnand %p858_p5, %p855_p2 }
  0x5a   : > { %863 = shalt.err (!%p860_p7)
}
  0x5b   : > { %s864_s30 = scalar_lea.vmem %s213_s9, 64  ;;  %p872_p11 = scmp.lt.s32.totalorder %s213_s9, %s213_s9 }
  0x5c   : > { %p865_p9 = scmp.ne.s32.totalorder %s213_s9, %s864_s30  ;;  %p873_p12 = scmp.lt.s32.totalorder %s864_s30, %s864_s30 }
  0x5e   : > { %p867_p4 = pnand %p865_p9, %p1087_p8  ;;  %p874_p1 = por %p873_p12, %p872_p11 }
  0x60   : > { %p868_p10 = pneg %p867_p4 }
  0x62   : > { %p875_p3 = pnand %p874_p1, %p868_p10 }
  0x64   : > { %878 = shalt.err (!%p875_p3)
}
  0x65   : > { %688 = dma.hbm_to_vmem [thread:$0]  (!%p1071_p6), %s1328_s4, 64, %s213_s9, [#allocation10]  }
  0x66   : > { %s609_s11 = sadd.s32 4294967294, %s983_s21   ;;  %s1174_s28 = sadd.s32 1, %s983_s21  }
  0x67   : > { %s27_s26 = ssub.s32 %s983_s21, %s1174_s28  ;;  %s30_s29 = sadd.s32 1, %s979_s20 }
  0x68   : > { %p28_p1 = scmp.eq.s32.totalorder %s27_s26, 0  ;;  %p37_p3 = scmp.ne.s32.totalorder %s979_s20, %s975_s19 }
  0x69   : > { %p38_p8 = scmp.eq.s32.totalorder %s983_s21, 0  ;;  %p43_p13 = scmp.ne.s32.totalorder %s975_s19, %s971_s18 }
  0x6a   : > { %s1185_s27 = scalar_select %p28_p1, %s979_s20, %s30_s29  }
  0x6b   : > { %p1187_p0 = por %p38_p8, %p37_p3  ;;  %p1337_p2 = scmp.eq.s32.totalorder %s1055_s24, 0 }
  0x6c   : > { %p151_p5 = scmp.eq.s32.totalorder %s1055_s24, 1  ;;  %p157_p7 = scmp.eq.s32.totalorder %s609_s11, 1 }
  0x6d   : > { %p1193_p6 = por %p1337_p2, %p43_p13  ;;  %p701_p9 = scmp.lt.s32.totalorder %s983_s21, 2 }
  0x6e   : > { %s223_s8 = sand.u32 1, %s979_s20   ;;  %p1200_p4 = por %p151_p5, %p37_p3 }
  0x6f   : > { %p1204_p10 = por %p157_p7, %p43_p13  ;;  %s616_s23 = sshll.u32 %s223_s8, 3 }
  0x70   : > { %s1339_s9 = scalar_select %p1200_p4, 1, 0 }
  0x71   : > { %s1340_s10 = scalar_select %p1204_p10, 1, 0 }
  0x72   : > { %s617_s12 = sshll.u32 %s983_s21, 7  ;;  %s227_s16 = scalar_lea.vmem [#allocation3], %s616_s23 }
  0x73   : > { %s1212_s15 = scalar_lea.hbm %s1324_s0, %s617_s12  ;;  %s234_s30 = sshll.u32 %s227_s16, 4  ;;  %s1214_s30 = int_to_ptr.vmem [resolvable:$true] %s234_s30 }
  0x74   : > { %p1218_p11 = pnand %p701_p9, %p1187_p0  ;;  %s224_s22 = scalar_lea.sflag [#allocation4], %s223_s8 }
  0x75   : > { %s879_s11 = scalar_lea.hbm %s1212_s15, 128  ;;  %s884_s23 = scalar_lea.hbm %s1324_s0, 256 }
  0x76   : > { %p880_p12 = scmp.ne.s32.totalorder %s1212_s15, %s879_s11  ;;  %p881_p1 = pneg %p1218_p11 }
  0x77   : > { %p885_p13 = scmp.lt.u32.totalorder %s1212_s15, %s1324_s0  ;;  %p886_p0 = scmp.lt.u32.totalorder %s884_s23, %s879_s11 }
  0x78   : > { %p882_p3 = pnand %p881_p1, %p880_p12  ;;  %p888_p5 = scmp.lt.u32.totalorder %s879_s11, %s1212_s15 }
  0x79   : > { %p887_p2 = por %p886_p0, %p885_p13 }
  0x7a   : > { %p883_p8 = pneg %p882_p3 }
  0x7b   : > { %p889_p7 = por %p888_p5, %p887_p2 }
  0x7d   : > { %p890_p9 = pnand %p889_p7, %p883_p8 }
  0x7f   : > { %893 = shalt.err (!%p890_p9)
}
  0x80   : > { %s894_s8 = scalar_lea.vmem %s1214_s30, 128  ;;  %s991_s13 = smov [#allocation3]  }
  0x81   : > { %p895_p12 = scmp.ne.s32.totalorder %s1214_s30, %s894_s8  ;;  %s899_s14 = sshll.u32 %s991_s13, 4  ;;  %s900_s14 = int_to_ptr.vmem [resolvable:$false] %s899_s14 }
  0x82   : > { %s901_s16 = scalar_lea.vmem %s900_s14, 256  ;;  %p902_p4 = scmp.lt.s32.totalorder %s1214_s30, %s900_s14 }
  0x83   : > { %p897_p3 = pnand %p895_p12, %p881_p1  ;;  %p903_p13 = scmp.lt.s32.totalorder %s901_s16, %s894_s8 }
  0x85   : > { %p898_p10 = pneg %p897_p3  ;;  %p904_p0 = por %p903_p13, %p902_p4 }
  0x87   : > { %p905_p2 = pnand %p904_p0, %p898_p10 }
  0x89   : > { %908 = shalt.err (!%p905_p2)
}
  0x8a   : > { %692 = dma.hbm_to_vmem [thread:$0]  (!%p1218_p11), %s1212_s15, 128, %s1214_s30, %s224_s22  }
  0x8b   : > { %p1342_p8 = scmp.ne.s32.totalorder %s1333_s25, 0 }
  0x8c   : > { %s1250_s11 = sand.u32 (!%p1342_p8), 1, %s975_s19  }
  0x8d   : > { %243 = sbr.rel (%p1342_p8) target bundleno = 865 (0x361), region = 40  ;;  %s619_s26 = sshll.u32 (!%p1342_p8), %s1250_s11, 3 }
  0x8e   : > { %s246_s29 = scalar_lea.sflag (!%p1342_p8), [#allocation4], %s1250_s11  ;;  %s249_s23 = scalar_lea.vmem (!%p1342_p8), [#allocation3], %s619_s26 }
  0x94   : > { %954 = dma.done.wait (%p1193_p6), %s246_s29, 128  }
  0x95   : > { %956 = vsyncadd (%p1193_p6), %s246_s29, 4294967168  ;;  %p1343_p4 = scmp.eq.s32.totalorder %s1055_s24, 0 }
  0x97   : > { %958 = dma.done.wait (%p1343_p4), [#allocation7], 384   ;;  %p1344_p10 = pmov %p1343_p4 }
  0x98   : > { %p1345_p11 = pmov %p1343_p4 }
  0x99   : > { %960 = vsyncadd (%p1344_p10), [#allocation7], 4294966912 }
  0x9a   : > { %962 = dma.done.wait (%p1345_p11), [#allocation10], 192   ;;  %p1346_p1 = pmov %p1343_p4 }
  0x9b   : > { %v293_v0 = vld [vmem:[%s249_s23] sm:$0xff]  ;;  %v992_v2 = vmov 0   ;;  %v993_v22 = vmov 0.0   ;;  %s994_s25 = smov 16   ;;  %s995_s7 = smov 17   ;;  %vm1002_vm0 = vmmov 0   ;;  %v329_v24 = vlaneseq }
  0x9c   : > { %964 = vsyncadd (%p1346_p1), [#allocation10], 4294967104  ;;  %296 = vadd.xlane.f32.xlu0 %v293_v0  ;;  %v294_v1 = vld [vmem:[#allocation8] sm:$0xff]  ;;  %756 = vset.pattern.permute.xlu1 %v992_v2  ;;  %v295_v3 = vld [vmem:[#allocation9] sm:$0xff]  ;;  %s996_s15 = smov 15   ;;  %s997_s30 = smov 111  }
  0x9d   : > { %757 = vset.pattern.permute.xlu0 %v992_v2  ;;  %310 = vperm.xlu1 %756, %v294_v1   ;;  %s998_s17 = smov 1   ;;  %s999_s22 = smov 127   ;;  %v330_v25 = vshrl.u32 %v329_v24, 7  ;;  %v325_v28 = vld [vmem:[#allocation6] sm:$0xff]  ;;  %v625_v38 = vld [vmem:[#allocation6 + $0x8] ss:$0 sm:$0xff] }
  0x9e   : > { %642 = vmatprep.subr.bf16.mxu0 %v993_v22  ;;  %s1000_s6 = smov 113   ;;  %s1001_s12 = smov 112   ;;  %652 = vmatprep.mubr.msk.bf16.mxu0 %vm1002_vm0, %v993_v22  ;;  %vm442_vm1 = vcmask 1043456   ;;  %vm438_vm2 = vcmask 588800  }
  0x9f   : > { %v340_v26 = vsub.s32 1, %v330_v25  ;;  %v331_v27 = vsub.s32 0, %v330_v25  ;;  %v349_v31 = vsub.s32 2, %v330_v25  ;;  %v358_v37 = vsub.s32 3, %v330_v25  ;;  %s291_s8 = scalar_lea.vmem [#allocation12], %s619_s26  ;;  %s633_s14 = sshll.u32 %s1055_s24, 7 }
  0xa0   : > { %v369_v46 = vsub.s32 5, %v330_v25  ;;  %v378_v52 = vsub.s32 6, %v330_v25  ;;  %v387_v58 = vsub.s32 7, %v330_v25  ;;  %s501_s13 = sshll.u32 %s291_s8, 4  ;;  %s1282_s23 = scalar_lea.hbm %s1329_s5, %s633_s14  ;;  %s1277_s13 = int_to_ptr.vmem [resolvable:$true] %s501_s13 }
  0xa1   : > { %316 = vperm.xlu1 %756, %v295_v3   ;;  %v341_v29 = vrot.slane %v325_v28, %v340_v26  ;;  %v332_v30 = vrot.slane %v325_v28, %v331_v27  ;;  %v350_v36 = vrot.slane %v325_v28, %v349_v31  ;;  %v359_v45 = vrot.slane %v325_v28, %v358_v37  ;;  %p1347_p5 = scmp.ne.s32.totalorder %s1339_s9, 0  ;;  %s1003_s24 = smov [#allocation12]  }
  0xa2   : > { %v370_v51 = vrot.slane %v325_v28, %v369_v46  ;;  %v379_v57 = vrot.slane %v325_v28, %v378_v52  ;;  %v388_v62 = vrot.slane %v325_v28, %v387_v58  ;;  %s913_s26 = sshll.u32 %s1003_s24, 4  ;;  %s914_s26 = int_to_ptr.vmem [resolvable:$false] %s913_s26 }
  0xa3   : > { %p916_p12 = scmp.lt.s32.totalorder %s1277_s13, %s914_s26 }
 0x11c   : > { %v311_v11 = vpop.permute.xlu1 %310 }
 0x120   : > { %v317_v15 = vpop.permute.xlu1 %316 }
 0x129   : > { %v297_v4 = vpop.xlane.xlu0 %296 }
 0x12a   : > { %v299_v5 = vmul.f32 0.0078125, %v297_v4 }
 0x12c   : > { %v300_v6 = vsub.f32 %v293_v0, %v299_v5 }
 0x12e   : > { %v301_v7 = vmul.f32 %v300_v6, %v300_v6 }
 0x130   : > { %302 = vadd.xlane.f32.xlu0 %v301_v7 }
 0x1bd   : > { %v303_v8 = vpop.xlane.xlu0 %302 }
 0x1be   : > { %v304_v9 = vmul.f32 0.0078125, %v303_v8  ;;  %v401_v8 = vld [vmem:[#allocation11] sm:$0xf] }
 0x1c0   : > { %v305_v10 = vadd.f32 1e-05, %v304_v9 }
 0x1c2   : > { %763 = vrsqrt.f32 %v305_v10 }
 0x1cc   : > { %v764_v12 = vpop.eup %763 }
 0x1cd   : > { %v307_v13 = vmul.f32 %v764_v12, %v300_v6 }
 0x1cf   : > { %v313_v14 = vmul.f32 %v311_v11, %v307_v13 }
 0x1d1   : > { %v319_v16 = vadd.f32 %v317_v15, %v313_v14 }
 0x1d3   : > { %v321_v17 = vmul.f32 0.70710677, %v319_v16  ;;  %v320_v19 = vmul.f32 0.5, %v319_v16 }
 0x1d5   : > { %765 = verf.f32 %v321_v17 }
 0x1df   : > { %v766_v18 = vpop.eup %765 }
 0x1e0   : > { %v323_v20 = vadd.f32 1.0, %v766_v18 }
 0x1e2   : > { %v324_v21 = vmul.f32 %v323_v20, %v320_v19 }
 0x1e4   : > { %336 = vrot.lane.b32.xlu1 %v324_v21, %s994_s25  ;;  %327 = vrot.lane.b32.xlu0 %v324_v21, %s995_s7  ;;  %v363_v23 = vpack.c.bf16 %v324_v21, %v324_v21  ;;  %s488_s25 = scalar_lea.sflag [#allocation5], %s1250_s11  ;;  %s909_s7 = scalar_lea.vmem %s1277_s13, 128 }
 0x1e5   : > { %p910_p6 = scmp.ne.s32.totalorder %s1277_s13, %s909_s7 }
 0x1e6   : > { %364 = vst [vmem:[#allocation2 + $0x10] sm:$0xf] %v363_v23 }
 0x1e7   : > { %p911_p7 = pnand %p910_p6, %p1347_p5 }
 0x1e8   : > { %345 = vrot.lane.b32.xlu1 %v324_v21, %s996_s15  ;;  %392 = vrot.lane.b32.xlu0 %v324_v21, %s997_s30  ;;  %s915_s15 = scalar_lea.vmem %s914_s26, 256 }
 0x1e9   : > { %p912_p9 = pneg %p911_p7  ;;  %p917_p3 = scmp.lt.s32.totalorder %s915_s15, %s909_s7 }
 0x1eb   : > { %p918_p13 = por %p917_p3, %p916_p12 }
 0x1ec   : > { %354 = vrot.lane.b32.xlu1 %v324_v21, %s998_s17 }
 0x1ed   : > { %p919_p0 = pnand %p918_p13, %p912_p9 }
 0x1f0   : > { %365 = vrot.lane.b32.xlu1 %v324_v21, %s999_s22 }
 0x1f4   : > { %374 = vrot.lane.b32.xlu1 %v324_v21, %s1000_s6 }
 0x1f8   : > { %383 = vrot.lane.b32.xlu1 %v324_v21, %s1001_s12 }
 0x256   : > { %v337_v32 = vpop.permute.xlu1 %336  ;;  %v328_v33 = vpop.permute.xlu0 %327 }
 0x257   : > { %v342_v34 = vmul.f32 %v341_v29, %v337_v32  ;;  %v333_v35 = vmul.f32 %v332_v30, %v328_v33 }
 0x259   : > { %v343_v39 = vpack.c.bf16 %v342_v34, %v342_v34  ;;  %v334_v40 = vpack.c.bf16 %v333_v35, %v333_v35 }
 0x25a   : > { %v346_v41 = vpop.permute.xlu1 %345  ;;  %v393_v42 = vpop.permute.xlu0 %392 }
 0x25b   : > { %344 = vst [vmem:[#allocation2 + $0x4] sm:$0xf] %v343_v39  ;;  %335 = vst [vmem:[#allocation2] sm:$0xf] %v334_v40  ;;  %v351_v43 = vmul.f32 %v350_v36, %v346_v41  ;;  %v398_v44 = vmul.f32 %v625_v38, %v393_v42 }
 0x25d   : > { %v352_v47 = vpack.c.bf16 %v351_v43, %v351_v43  ;;  %v399_v48 = vpack.c.bf16 %v398_v44, %v398_v44 }
 0x25e   : > { %v355_v49 = vpop.permute.xlu1 %354 }
 0x25f   : > { %353 = vst [vmem:[#allocation2 + $0x8] sm:$0xf] %v352_v47  ;;  %400 = vst [vmem:[#allocation2 + $0x20] sm:$0xf] %v399_v48  ;;  %v360_v50 = vmul.f32 %v359_v45, %v355_v49 }
 0x261   : > { %v361_v53 = vpack.c.bf16 %v360_v50, %v360_v50 }
 0x262   : > { %v366_v54 = vpop.permute.xlu1 %365  ;;  %v758_v55 = vld [vmem:[#allocation2] sm:$0xff]  }
 0x263   : > { %362 = vst [vmem:[#allocation2 + $0xc] sm:$0xf] %v361_v53  ;;  %v371_v56 = vmul.f32 %v370_v51, %v366_v54  ;;  %643 = vmatpush3.bf16.msra.mxu0 %v758_v55 }
 0x264   : > { %644 = vmatprep.subr.bf16.mxu0 %v993_v22 }
 0x265   : > { %v372_v59 = vpack.c.bf16 %v371_v56, %v371_v56 }
 0x266   : > { %v375_v60 = vpop.permute.xlu1 %374  ;;  %v762_v6 = vld [vmem:[#allocation2 + $0x20] ss:$0 sps:$4 sm:$0xff]  }
 0x267   : > { %373 = vst [vmem:[#allocation2 + $0x14] sm:$0xf] %v372_v59  ;;  %v380_v61 = vmul.f32 %v379_v57, %v375_v60  ;;  %v444_v7 = vsel %vm442_vm1, %v762_v6, 0 }
 0x269   : > { %v381_v63 = vpack.c.bf16 %v380_v61, %v380_v61 }
 0x26a   : > { %v384_v0 = vpop.permute.xlu1 %383  ;;  %v759_v1 = vld [vmem:[#allocation2 + $0x8] sm:$0xff]  }
 0x26b   : > { %382 = vst [vmem:[#allocation2 + $0x18] sm:$0xf] %v381_v63  ;;  %v389_v2 = vmul.f32 %v388_v62, %v384_v0  ;;  %645 = vmatpush3.bf16.msra.mxu0 %v759_v1 }
 0x26c   : > { %646 = vmatprep.subr.bf16.mxu0 %v993_v22 }
 0x26d   : > { %v390_v3 = vpack.c.bf16 %v389_v2, %v389_v2 }
 0x26e   : > { %v760_v4 = vld [vmem:[#allocation2 + $0x10] sm:$0xff]  }
 0x26f   : > { %391 = vst [vmem:[#allocation2 + $0x1c] sm:$0xf] %v390_v3  ;;  %647 = vmatpush3.bf16.msra.mxu0 %v760_v4 }
 0x270   : > { %648 = vmatprep.subr.bf16.mxu0 %v993_v22 }
 0x276   : > { %v761_v5 = vld [vmem:[#allocation2 + $0x18] sm:$0xff]  }
 0x277   : > { %649 = vmatpush3.bf16.msra.mxu0 %v761_v5 }
 0x278   : > { %650 = vmatprep.subr.bf16.mxu0 %v993_v22 }
 0x27b   : > { %651 = vmatpush3.bf16.msra.mxu0 %v444_v7 }
 0x27e   : > { %653 = vmatmul.mubr.msk.bf16.vlgmr.msra.gmra.mrb[0].mxu0 %vm438_vm2, %v401_v8 }
 0x351   : > { %v480_v9 = vpop.f32.mrb[0].mxu0 }
 0x352   : > { %486 = vst [vmem:[%s291_s8] sm:$0xff] %v480_v9  ;;  %v654_v10 = vpop.f32.mrb[1].mxu0 }
 0x353   : > { %v483_v11 = vpop.f32.mrb[2].mxu0 }
 0x354   : > { %922 = shalt.err (!%p919_p0)
}
 0x355   : > { %s923_s11 = scalar_lea.hbm %s1282_s23, 128  ;;  %s927_s22 = scalar_lea.hbm %s1329_s5, 256 }
 0x356   : > { %p924_p2 = scmp.ne.s32.totalorder %s1282_s23, %s923_s11  ;;  %p928_p10 = scmp.lt.u32.totalorder %s1282_s23, %s1329_s5 }
 0x357   : > { %p929_p11 = scmp.lt.u32.totalorder %s927_s22, %s923_s11  ;;  %p931_p6 = scmp.lt.u32.totalorder %s923_s11, %s1282_s23 }
 0x358   : > { %p925_p8 = pnand %p924_p2, %p1347_p5 }
 0x359   : > { %p930_p1 = por %p929_p11, %p928_p10 }
 0x35a   : > { %p926_p4 = pneg %p925_p8 }
 0x35b   : > { %p932_p7 = por %p931_p6, %p930_p1 }
 0x35d   : > { %p933_p9 = pnand %p932_p7, %p926_p4 }
 0x35f   : > { %936 = shalt.err (!%p933_p9)
}
 0x360   : > { %674 = dma.vmem_to_hbm [thread:$0]  (%p1347_p5), %s1277_s13, 128, %s1282_s23, %s488_s25   ;;  %v655_v12 = vpop.f32.mrb[3].mxu0 }
 0x361 PF: > { %s513_s8 = sand.u32 1, %s971_s18   ;;  %p1348_p12 = scmp.ne.s32.totalorder %s1340_s10, 0 }
 0x362   : > { %p1349_p3 = scmp.ge.s32.totalorder %s983_s21, 2  ;;  %s514_s14 = scalar_lea.sflag [#allocation5], %s513_s8 }
 0x364   : > { %p694_p13 = pnand %p1349_p3, %p1348_p12 }
 0x366   : > { %966 = dma.done.wait (!%p694_p13), %s514_s14, 128  }
 0x367   : > { %968 = vsyncadd (!%p694_p13), %s514_s14, 4294967168  ;;  %p20_p0 = scmp.ge.s32.totalorder %s1174_s28, 4   ;;  %s1350_s18 = smov %s975_s19 }
 0x368   : > { %s1351_s19 = smov %s979_s20  ;;  %s1352_s20 = smov %s1185_s27 }
 0x369   : > { %s1353_s21 = smov %s1174_s28  ;;  %22 = sbr.rel (!%p20_p0) target bundleno = 7 (0x7), region = 101 }
 0x370   :  { %519 = vsyncpa [#allocation4], 1 }
 0x371   :  { %521 = vsyncpa [#allocation4 + $0x1], 1 }
 0x372   :  { %522 = vsyncpa [#allocation7], 1 }
 0x373   :  { %523 = vsyncpa [#allocation10], 1 }
 0x374   :  { %524 = vsyncpa [#allocation5], 1 }
 0x375   :  { %526 = vsyncpa [#allocation5 + $0x1], 1 }

// kernel: mdx_forward.7
= control target key start
LH: loop header
LB: loop body
LE: loop exit
PB: predicated region body
PF: predicated region fallthrough
CT: control target
= control target key end

     0   :  { %12 = vsyncpa [#allocation3], 0  ;;  %s2981_s0 = inlined_call_operand.hbm [shape: f32[2,8,8,16], index: 0, kind: input, shape index: {}]   ;;  %s2982_s1 = inlined_call_operand.hbm [shape: f32[8,1], index: 1, kind: input, shape index: {}]   ;;  %s2983_s2 = inlined_call_operand.hbm [shape: f32[8,1], index: 2, kind: input, shape index: {}]   ;;  %s2984_s3 = inlined_call_operand.hbm [shape: bf16[16,4], index: 3, kind: input, shape index: {}]   ;;  %s2985_s4 = inlined_call_operand.hbm [shape: f32[8,1], index: 4, kind: input, shape index: {}]   ;;  %s2986_s5 = inlined_call_operand.hbm [shape: f32[8,1], index: 5, kind: input, shape index: {}]   ;;  %s2987_s6 = inlined_call_operand.hbm [shape: bf16[4,16], index: 6, kind: input, shape index: {}]   ;;  %s2988_s7 = inlined_call_operand.hbm [shape: f32[2,8,8,16], index: 7, kind: output, shape index: {}]  }
   0x1   :  { %14 = vsyncpa [#allocation3 + $0x1], 0 }
   0x2   :  { %15 = vsyncpa [#allocation6], 0 }
   0x3   :  { %16 = vsyncpa [#allocation9], 0 }
   0x4   :  { %17 = vsyncpa [#allocation12], 0 }
   0x5   :  { %18 = vsyncpa [#allocation4], 0 }
   0x6   :  { %20 = vsyncpa [#allocation4 + $0x1], 0  ;;  %s2323_s24 = smov 0   ;;  %s2325_s25 = smov 0  }
   0x7   :  { %s2327_s26 = smov 0   ;;  %s2329_s27 = smov 0  }
   0x8 LB: > { %s2267_s28 = smov [#allocation5]   ;;  %s2344_s30 = sadd.s32 4294967295, %s2265_s27   ;;  %s2265_s27 = sphi %s2329_s27, %s3014_s27   ;;  %s2261_s26 = sphi %s2327_s26, %s3013_s26   ;;  %s2257_s25 = sphi %s2325_s25, %s3012_s25   ;;  %s2253_s24 = sphi %s2323_s24, %s3011_s24  }
   0x9   : > { %s222_s29 = sshll.u32 %s2267_s28, 4  ;;  %p1728_p0 = scmp.ge.s32.totalorder %s2265_s27, 1  ;;  %s223_s29 = int_to_ptr.vmem [resolvable:$true] %s222_s29 }
   0xa   : > { %p2989_p1 = scmp.eq.s32.totalorder %s2344_s30, 0  ;;  %p209_p2 = scmp.lt.s32.totalorder %s2265_s27, 3 }
   0xb   : > { %s2268_s9 = smov [#allocation8]   ;;  %s2269_s12 = smov [#allocation11]  }
   0xc   : > { %p2349_p3 = pnand %p1728_p0, %p209_p2  ;;  %s243_s10 = sshll.u32 %s2268_s9, 4  ;;  %s2356_s10 = int_to_ptr.vmem [resolvable:$true] %s243_s10 }
   0xd   : > { %s268_s13 = sshll.u32 %s2269_s12, 4  ;;  %s1989_s16 = scalar_lea.hbm %s2982_s1, 128  ;;  %s2364_s13 = int_to_ptr.vmem [resolvable:$true] %s268_s13 }
   0xe   : > { %s2992_s8 = scalar_select %p2349_p3, 1, 0 }
   0xf   : > { %p1823_p5 = pneg %p2349_p3  ;;  %p1990_p7 = scmp.ne.s32.totalorder %s2982_s1, %s1989_s16 }
  0x10   : > { %p1996_p11 = scmp.lt.u32.totalorder %s1989_s16, %s2982_s1 }
  0x11   : > { %p2360_p6 = pnand %p1823_p5, %p2989_p1 }
  0x13   : > { %p2374_p8 = pneg %p2360_p6 }
  0x15   : > { %p1992_p9 = pnand %p2374_p8, %p1990_p7 }
  0x17   : > { %p1993_p10 = pneg %p1992_p9 }
  0x19   : > { %p1998_p12 = pnand %p1996_p11, %p1993_p10 }
  0x1b   : > { %2001 = shalt.err (!%p1998_p12)
}
  0x1c   : > { %s2002_s22 = scalar_lea.vmem %s223_s29, 128  ;;  %p2010_p5 = scmp.lt.s32.totalorder %s223_s29, %s223_s29 }
  0x1d   : > { %p2003_p13 = scmp.ne.s32.totalorder %s223_s29, %s2002_s22  ;;  %p2011_p4 = scmp.lt.s32.totalorder %s2002_s22, %s2002_s22 }
  0x1f   : > { %p2005_p0 = pnand %p2003_p13, %p2374_p8  ;;  %p2012_p1 = por %p2011_p4, %p2010_p5 }
  0x21   : > { %p2006_p2 = pneg %p2005_p0 }
  0x23   : > { %p2013_p3 = pnand %p2012_p1, %p2006_p2 }
  0x25   : > { %2016 = shalt.err (!%p2013_p3)
}
  0x26   : > { %1826 = dma.hbm_to_vmem [thread:$0]  (!%p2360_p6), %s2982_s1, 128, %s223_s29, [#allocation6]  }
  0x27   : > { %s2017_s14 = scalar_lea.hbm %s2984_s3, 128 }
  0x28   : > { %p2018_p7 = scmp.ne.s32.totalorder %s2984_s3, %s2017_s14  ;;  %p2024_p1 = scmp.lt.u32.totalorder %s2017_s14, %s2984_s3 }
  0x2a   : > { %p2020_p9 = pnand %p2018_p7, %p2374_p8 }
  0x2c   : > { %p2021_p4 = pneg %p2020_p9 }
  0x2e   : > { %p2026_p3 = pnand %p2024_p1, %p2021_p4 }
  0x30   : > { %2029 = shalt.err (!%p2026_p3)
}
  0x31   : > { %s2030_s29 = scalar_lea.vmem %s2356_s10, 128  ;;  %p2038_p13 = scmp.lt.s32.totalorder %s2356_s10, %s2356_s10 }
  0x32   : > { %p2031_p10 = scmp.ne.s32.totalorder %s2356_s10, %s2030_s29  ;;  %p2039_p0 = scmp.lt.s32.totalorder %s2030_s29, %s2030_s29 }
  0x34   : > { %p2033_p11 = pnand %p2031_p10, %p2374_p8  ;;  %p2040_p2 = por %p2039_p0, %p2038_p13 }
  0x36   : > { %p2034_p12 = pneg %p2033_p11 }
  0x38   : > { %p2041_p5 = pnand %p2040_p2, %p2034_p12 }
  0x3a   : > { %2044 = shalt.err (!%p2041_p5)
}
  0x3b   : > { %s2270_s20 = smov 64   ;;  %s2271_s21 = smov 4  }
  0x3c   : > { %1832 = dma.hbm_to_vmem [thread:$0]  (!%p2360_p6), %s2984_s3, 128, %s2356_s10, [#allocation9], %s2270_s20, %s2270_s20, %s2271_s21  }
  0x3d   : > { %s2045_s12 = scalar_lea.hbm %s2986_s5, 128 }
  0x3e   : > { %p2046_p7 = scmp.ne.s32.totalorder %s2986_s5, %s2045_s12  ;;  %p2052_p1 = scmp.lt.u32.totalorder %s2045_s12, %s2986_s5 }
  0x40   : > { %p2048_p9 = pnand %p2046_p7, %p2374_p8 }
  0x42   : > { %p2049_p4 = pneg %p2048_p9 }
  0x44   : > { %p2054_p3 = pnand %p2052_p1, %p2049_p4 }
  0x46   : > { %2057 = shalt.err (!%p2054_p3)
}
  0x47   : > { %s2058_s10 = scalar_lea.vmem %s2364_s13, 128  ;;  %p2066_p13 = scmp.lt.s32.totalorder %s2364_s13, %s2364_s13 }
  0x48   : > { %p2059_p10 = scmp.ne.s32.totalorder %s2364_s13, %s2058_s10  ;;  %p2067_p0 = scmp.lt.s32.totalorder %s2058_s10, %s2058_s10 }
  0x4a   : > { %p2061_p11 = pnand %p2059_p10, %p2374_p8  ;;  %p2068_p2 = por %p2067_p0, %p2066_p13 }
  0x4c   : > { %p2062_p12 = pneg %p2061_p11 }
  0x4e   : > { %p2069_p5 = pnand %p2068_p2, %p2062_p12 }
  0x50   : > { %2072 = shalt.err (!%p2069_p5)
}
  0x51   : > { %1838 = dma.hbm_to_vmem [thread:$0]  (!%p2360_p6), %s2986_s5, 128, %s2364_s13, [#allocation12]  }
  0x52   : > { %s2272_s20 = smov [#allocation7]   ;;  %s2273_s22 = smov [#allocation10]  }
  0x53   : > { %s233_s21 = sshll.u32 %s2272_s20, 4  ;;  %s257_s23 = sshll.u32 %s2273_s22, 4  ;;  %s234_s21 = int_to_ptr.vmem [resolvable:$true] %s233_s21  ;;  %s258_s23 = int_to_ptr.vmem [resolvable:$true] %s257_s23 }
  0x54   : > { %s2073_s12 = scalar_lea.hbm %s2983_s2, 128 }
  0x55   : > { %p2074_p7 = scmp.ne.s32.totalorder %s2983_s2, %s2073_s12  ;;  %p2080_p1 = scmp.lt.u32.totalorder %s2073_s12, %s2983_s2 }
  0x57   : > { %p2076_p9 = pnand %p2074_p7, %p2374_p8 }
  0x59   : > { %p2077_p4 = pneg %p2076_p9 }
  0x5b   : > { %p2082_p3 = pnand %p2080_p1, %p2077_p4 }
  0x5d   : > { %2085 = shalt.err (!%p2082_p3)
}
  0x5e   : > { %s2086_s13 = scalar_lea.vmem %s234_s21, 128  ;;  %p2094_p13 = scmp.lt.s32.totalorder %s234_s21, %s234_s21 }
  0x5f   : > { %p2087_p10 = scmp.ne.s32.totalorder %s234_s21, %s2086_s13  ;;  %p2095_p0 = scmp.lt.s32.totalorder %s2086_s13, %s2086_s13 }
  0x61   : > { %p2089_p11 = pnand %p2087_p10, %p2374_p8  ;;  %p2096_p2 = por %p2095_p0, %p2094_p13 }
  0x63   : > { %p2090_p12 = pneg %p2089_p11 }
  0x65   : > { %p2097_p5 = pnand %p2096_p2, %p2090_p12 }
  0x67   : > { %2100 = shalt.err (!%p2097_p5)
}
  0x68   : > { %1829 = dma.hbm_to_vmem [thread:$0]  (!%p2360_p6), %s2983_s2, 128, %s234_s21, [#allocation6]  }
  0x69   : > { %s2101_s22 = scalar_lea.hbm %s2985_s4, 128 }
  0x6a   : > { %p2102_p7 = scmp.ne.s32.totalorder %s2985_s4, %s2101_s22  ;;  %p2108_p1 = scmp.lt.u32.totalorder %s2101_s22, %s2985_s4 }
  0x6c   : > { %p2104_p9 = pnand %p2102_p7, %p2374_p8 }
  0x6e   : > { %p2105_p4 = pneg %p2104_p9 }
  0x70   : > { %p2110_p3 = pnand %p2108_p1, %p2105_p4 }
  0x72   : > { %2113 = shalt.err (!%p2110_p3)
}
  0x73   : > { %s2114_s15 = scalar_lea.vmem %s258_s23, 128  ;;  %p2122_p13 = scmp.lt.s32.totalorder %s258_s23, %s258_s23 }
  0x74   : > { %p2115_p10 = scmp.ne.s32.totalorder %s258_s23, %s2114_s15  ;;  %p2123_p0 = scmp.lt.s32.totalorder %s2114_s15, %s2114_s15 }
  0x76   : > { %p2117_p11 = pnand %p2115_p10, %p2374_p8  ;;  %p2124_p2 = por %p2123_p0, %p2122_p13 }
  0x78   : > { %p2118_p12 = pneg %p2117_p11 }
  0x7a   : > { %p2125_p5 = pnand %p2124_p2, %p2118_p12 }
  0x7c   : > { %2128 = shalt.err (!%p2125_p5)
}
  0x7d   : > { %1835 = dma.hbm_to_vmem [thread:$0]  (!%p2360_p6), %s2985_s4, 128, %s258_s23, [#allocation9]  }
  0x7e   : > { %s2274_s17 = smov [#allocation13]   ;;  %s2129_s29 = scalar_lea.hbm %s2987_s6, 32 }
  0x7f   : > { %s279_s13 = sshll.u32 %s2274_s17, 4  ;;  %p2130_p7 = scmp.ne.s32.totalorder %s2987_s6, %s2129_s29  ;;  %s280_s13 = int_to_ptr.vmem [resolvable:$true] %s279_s13 }
  0x80   : > { %p2136_p1 = scmp.lt.u32.totalorder %s2129_s29, %s2987_s6 }
  0x81   : > { %p2132_p9 = pnand %p2130_p7, %p2374_p8 }
  0x83   : > { %p2133_p4 = pneg %p2132_p9 }
  0x85   : > { %p2138_p3 = pnand %p2136_p1, %p2133_p4 }
  0x87   : > { %2141 = shalt.err (!%p2138_p3)
}
  0x88   : > { %s2142_s23 = scalar_lea.vmem %s280_s13, 32  ;;  %p2150_p13 = scmp.lt.s32.totalorder %s280_s13, %s280_s13 }
  0x89   : > { %p2143_p10 = scmp.ne.s32.totalorder %s280_s13, %s2142_s23  ;;  %p2151_p0 = scmp.lt.s32.totalorder %s2142_s23, %s2142_s23 }
  0x8b   : > { %p2145_p11 = pnand %p2143_p10, %p2374_p8  ;;  %p2152_p2 = por %p2151_p0, %p2150_p13 }
  0x8d   : > { %p2146_p12 = pneg %p2145_p11 }
  0x8f   : > { %p2153_p5 = pnand %p2152_p2, %p2146_p12 }
  0x91   : > { %2156 = shalt.err (!%p2153_p5)
}
  0x92   : > { %1841 = dma.hbm_to_vmem [thread:$0]  (!%p2360_p6), %s2987_s6, 32, %s280_s13, [#allocation12]  }
  0x93   : > { %s1727_s19 = sadd.s32 4294967294, %s2265_s27   ;;  %s2492_s11 = sadd.s32 1, %s2265_s27  }
  0x94   : > { %s30_s15 = ssub.s32 %s2265_s27, %s2492_s11  ;;  %s33_s21 = sadd.s32 1, %s2261_s26 }
  0x95   : > { %p31_p8 = scmp.eq.s32.totalorder %s30_s15, 0  ;;  %p40_p7 = scmp.ne.s32.totalorder %s2261_s26, %s2257_s25 }
  0x96   : > { %p41_p9 = scmp.eq.s32.totalorder %s2265_s27, 0  ;;  %p46_p4 = scmp.ne.s32.totalorder %s2257_s25, %s2253_s24 }
  0x97   : > { %s2503_s16 = scalar_select %p31_p8, %s2261_s26, %s33_s21  }
  0x98   : > { %p2505_p1 = por %p41_p9, %p40_p7  ;;  %p2996_p3 = scmp.eq.s32.totalorder %s2344_s30, 0 }
  0x99   : > { %p196_p10 = scmp.eq.s32.totalorder %s2344_s30, 1  ;;  %p202_p11 = scmp.eq.s32.totalorder %s1727_s19, 1 }
  0x9a   : > { %p2511_p6 = por %p2996_p3, %p46_p4  ;;  %p1856_p12 = scmp.lt.s32.totalorder %s2265_s27, 2 }
  0x9b   : > { %s290_s10 = sand.u32 1, %s2261_s26   ;;  %p2518_p13 = por %p196_p10, %p40_p7 }
  0x9c   : > { %p2522_p0 = por %p202_p11, %p46_p4  ;;  %s1736_s20 = sshll.u32 %s290_s10, 6 }
  0x9d   : > { %s2998_s18 = scalar_select %p2518_p13, 1, 0 }
  0x9e   : > { %s2999_s29 = scalar_select %p2522_p0, 1, 0 }
  0x9f   : > { %s1762_s22 = sshll.u32 %s2265_s27, 10  ;;  %s294_s12 = scalar_lea.vmem [#allocation2], %s1736_s20 }
  0xa0   : > { %s2530_s23 = scalar_lea.hbm %s2981_s0, %s1762_s22  ;;  %s301_s14 = sshll.u32 %s294_s12, 4  ;;  %s2532_s14 = int_to_ptr.vmem [resolvable:$true] %s301_s14 }
  0xa1   : > { %p2536_p2 = pnand %p1856_p12, %p2505_p1  ;;  %s2540_s15 = scalar_lea.sflag [#allocation3], %s290_s10 }
  0xa2   : > { %s2157_s21 = scalar_lea.hbm %s2530_s23, 1024  ;;  %s2162_s17 = scalar_lea.hbm %s2981_s0, 2048 }
  0xa3   : > { %p2158_p5 = scmp.ne.s32.totalorder %s2530_s23, %s2157_s21  ;;  %p2159_p8 = pneg %p2536_p2 }
  0xa4   : > { %p2163_p4 = scmp.lt.u32.totalorder %s2530_s23, %s2981_s0  ;;  %p2164_p1 = scmp.lt.u32.totalorder %s2162_s17, %s2157_s21 }
  0xa5   : > { %p2160_p7 = pnand %p2159_p8, %p2158_p5  ;;  %p2166_p10 = scmp.lt.u32.totalorder %s2157_s21, %s2530_s23 }
  0xa6   : > { %p2165_p3 = por %p2164_p1, %p2163_p4 }
  0xa7   : > { %p2161_p9 = pneg %p2160_p7 }
  0xa8   : > { %p2167_p11 = por %p2166_p10, %p2165_p3 }
  0xaa   : > { %p2168_p12 = pnand %p2167_p11, %p2161_p9 }
  0xac   : > { %2171 = shalt.err (!%p2168_p12)
}
  0xad   : > { %s2172_s10 = scalar_lea.vmem %s2532_s14, 1024  ;;  %s2275_s12 = smov [#allocation2]  }
  0xae   : > { %p2173_p5 = scmp.ne.s32.totalorder %s2532_s14, %s2172_s10  ;;  %s2177_s20 = sshll.u32 %s2275_s12, 4  ;;  %s2178_s20 = int_to_ptr.vmem [resolvable:$false] %s2177_s20 }
  0xaf   : > { %s2179_s22 = scalar_lea.vmem %s2178_s20, 2048  ;;  %p2180_p13 = scmp.lt.s32.totalorder %s2532_s14, %s2178_s20 }
  0xb0   : > { %p2175_p7 = pnand %p2173_p5, %p2159_p8  ;;  %p2181_p4 = scmp.lt.s32.totalorder %s2179_s22, %s2172_s10 }
  0xb2   : > { %p2176_p0 = pneg %p2175_p7  ;;  %p2182_p1 = por %p2181_p4, %p2180_p13 }
  0xb4   : > { %p2183_p3 = pnand %p2182_p1, %p2176_p0 }
  0xb6   : > { %2186 = shalt.err (!%p2183_p3)
}
  0xb7   : > { %s2276_s21 = smov 128   ;;  %s2277_s17 = smov 8  }
  0xb8   : > { %1845 = dma.hbm_to_vmem [thread:$0]  (!%p2536_p2), %s2530_s23, 1024, %s2532_s14, %s2540_s15, %s2276_s21, %s2276_s21, %s2277_s17  }
  0xb9   : > { %p3001_p8 = scmp.ne.s32.totalorder %s2992_s8, 0 }
  0xba   : > { %s2571_s28 = sand.u32 (!%p3001_p8), 1, %s2257_s25  }
  0xbb   : > { %313 = sbr.rel (%p3001_p8) target bundleno = 1447 (0x5a7), region = 48  ;;  %s1740_s9 = sshll.u32 (!%p3001_p8), %s2571_s28, 6 }
  0xbc   : > { %s316_s10 = scalar_lea.sflag (!%p3001_p8), [#allocation3], %s2571_s28  ;;  %s2577_s12 = scalar_lea.vmem (!%p3001_p8), [#allocation2], %s1740_s9 }
  0xc2   : > { %2232 = dma.done.wait (%p2511_p6), %s316_s10, 1024  }
  0xc3   : > { %2234 = vsyncadd (%p2511_p6), %s316_s10, 4294966272  ;;  %p3002_p13 = scmp.eq.s32.totalorder %s2344_s30, 0 }
  0xc5   : > { %2236 = dma.done.wait (%p3002_p13), [#allocation6], 256   ;;  %p3003_p0 = pmov %p3002_p13 }
  0xc7   : > { %2238 = vsyncadd (%p3003_p0), [#allocation6], 4294967040  ;;  %p3004_p2 = pmov %p3003_p0 }
  0xc8   : > { %p3005_p9 = pmov %p3003_p0 }
  0xc9   : > { %2240 = dma.done.wait (%p3004_p2), [#allocation9], 256  }
  0xca   : > { %2242 = vsyncadd (%p3005_p9), [#allocation9], 4294967040  ;;  %p3006_p10 = pmov %p3003_p0 }
  0xcb   : > { %p3007_p11 = pmov %p3003_p0 }
  0xcc   : > { %2244 = dma.done.wait (%p3006_p10), [#allocation12], 160  }
  0xcd   : > { %2246 = vsyncadd (%p3007_p11), [#allocation12], 4294967136  ;;  %v2278_v0 = vmov 0   ;;  %vm385_vm0 = vcmask 130048   ;;  %v2596_v1 = vld [vmem:[%s2577_s12 + $0x10] sm:$0xff]  ;;  %v2599_v2 = vld [vmem:[%s2577_s12] sm:$0xff]  ;;  %v609_v11 = vlaneseq }
  0xce   : > { %1911 = vset.pattern.permute.xlu1 %v2278_v0  ;;  %1910 = vset.pattern.permute.xlu0 %v2278_v0  ;;  %v2602_v3 = vld [vmem:[%s2577_s12 + $0x18] sm:$0xff]  ;;  %v392_v4 = vsel %vm385_vm0, %v2596_v1, 0.0  ;;  %v386_v5 = vsel %vm385_vm0, %v2599_v2, 0.0  ;;  %v2609_v6 = vld [vmem:[%s2577_s12 + $0x8] sm:$0xff]  ;;  %v2279_v9 = vmov 1966171168  }
  0xcf   : > { %393 = vadd.xlane.f32.xlu1 %v392_v4  ;;  %387 = vadd.xlane.f32.xlu0 %v386_v5  ;;  %v395_v7 = vsel %vm385_vm0, %v2602_v3, 0.0  ;;  %v389_v8 = vsel %vm385_vm0, %v2609_v6, 0.0  ;;  %v607_v10 = vunpack.c.l.s4 %v2279_v9  ;;  %v2616_v12 = vld [vmem:[%s2577_s12 + $0x28] sm:$0xff]  ;;  %v2619_v13 = vld [vmem:[%s2577_s12 + $0x20] sm:$0xff]  ;;  %v610_v17 = vshrl.u32 %v609_v11, 7  ;;  %v2626_v18 = vld [vmem:[%s2577_s12 + $0x30] sm:$0xff] }
  0xd0   : > { %v401_v14 = vsel %vm385_vm0, %v2616_v12, 0.0  ;;  %v398_v15 = vsel %vm385_vm0, %v2619_v13, 0.0  ;;  %v2629_v19 = vld [vmem:[%s2577_s12 + $0x38] sm:$0xff]  ;;  %v404_v20 = vsel %vm385_vm0, %v2626_v18, 0.0  ;;  %v383_v23 = vld [vmem:[#allocation5] sm:$0xff]  ;;  %v2643_v31 = vld [vmem:[#allocation7] sm:$0xff] }
  0xd1   : > { %v608_v16 = vunpack.c.0.s8 %v607_v10  ;;  %v407_v21 = vsel %vm385_vm0, %v2629_v19, 0.0  ;;  %v2639_v27 = vsub.s32 0, %v610_v17  ;;  %v605_v43 = vcombine.high %v383_v23, %v383_v23  ;;  %s373_s8 = scalar_lea.vmem [#allocation14], %s1740_s9  ;;  %s1763_s13 = sshll.u32 %s2344_s30, 10 }
  0xd2   : > { %vm979_vm1 = vcmask 31744   ;;  %vm1498_vm2 = vcmask 1041408   ;;  %s1597_s23 = sshll.u32 %s373_s8, 4  ;;  %s2931_s15 = scalar_lea.hbm %s2988_s7, %s1763_s13  ;;  %s2933_s23 = int_to_ptr.vmem [resolvable:$true] %s1597_s23 }
  0xd3   : > { %396 = vadd.xlane.f32.xlu1 %v395_v7  ;;  %390 = vadd.xlane.f32.xlu0 %v389_v8  ;;  %v2635_v22 = vsub.s32 %v608_v16, %v610_v17  ;;  %s1584_s30 = scalar_lea.sflag [#allocation4], %s2571_s28  ;;  %s2187_s20 = scalar_lea.vmem %s2933_s23, 1024 }
  0xd4   : > { %p2188_p6 = scmp.ne.s32.totalorder %s2933_s23, %s2187_s20  ;;  %p3008_p12 = scmp.ne.s32.totalorder %s2998_s18, 0 }
  0xd5   : > { %v612_v24 = vrot.slane %v383_v23, %v2635_v22  ;;  %v734_v34 = vrot.slane %v2643_v31, %v2635_v22  ;;  %v2656_v46 = vrot.slane %v605_v43, %v2635_v22  ;;  %s2280_s22 = smov [#allocation14]  }
  0xd6   : > { %p2189_p5 = pnand %p2188_p6, %p3008_p12  ;;  %s2191_s21 = sshll.u32 %s2280_s22, 4  ;;  %s2192_s21 = int_to_ptr.vmem [resolvable:$false] %s2191_s21 }
  0xd7   : > { %402 = vadd.xlane.f32.xlu1 %v401_v14  ;;  %399 = vadd.xlane.f32.xlu0 %v398_v15  ;;  %v620_v25 = vcombine.high %v612_v24, %v612_v24  ;;  %v628_v28 = vrot.slane %v612_v24, %v2635_v22  ;;  %v750_v37 = vrot.slane %v734_v34, %v2635_v22  ;;  %s2193_s17 = scalar_lea.vmem %s2192_s21, 2048  ;;  %p2194_p4 = scmp.lt.s32.totalorder %s2933_s23, %s2192_s21 }
  0xd8   : > { %v742_v38 = vcombine.high %v734_v34, %v734_v34  ;;  %v2661_v48 = vrot.slane %v2656_v46, %v2635_v22  ;;  %p2190_p7 = pneg %p2189_p5  ;;  %p2195_p1 = scmp.lt.s32.totalorder %s2193_s17, %s2187_s20 }
  0xd9   : > { %v642_v26 = vrot.slane %v620_v25, %v2635_v22  ;;  %v650_v30 = vcombine.high %v628_v28, %v628_v28  ;;  %v657_v35 = vrot.slane %v628_v28, %v2639_v27  ;;  %v779_v39 = vrot.slane %v750_v37, %v2639_v27 }
  0xda   : > { %v764_v40 = vrot.slane %v742_v38, %v2635_v22  ;;  %v772_v42 = vcombine.high %v750_v37, %v750_v37  ;;  %v673_v49 = vrot.slane %v2661_v48, %v2639_v27  ;;  %p2196_p3 = por %p2195_p1, %p2194_p4 }
  0xdb   : > { %405 = vadd.xlane.f32.xlu0 %v404_v20  ;;  %408 = vadd.xlane.f32.xlu1 %v407_v21  ;;  %v661_v29 = vrot.slane %v642_v26, %v2639_v27  ;;  %v665_v32 = vrot.slane %v650_v30, %v2639_v27  ;;  %v652_v33 = vcombine.high %v642_v26, %v642_v26 }
  0xdc   : > { %v783_v41 = vrot.slane %v764_v40, %v2639_v27  ;;  %v787_v44 = vrot.slane %v772_v42, %v2639_v27  ;;  %v774_v45 = vcombine.high %v764_v40, %v764_v40  ;;  %p2197_p8 = pnand %p2196_p3, %p2190_p7 }
  0xdd   : > { %v669_v36 = vrot.slane %v652_v33, %v2639_v27 }
  0xde   : > { %v791_v47 = vrot.slane %v774_v45, %v2639_v27 }
  0xec   : > { %691 = vperm.xlu1 %1911, %v661_v29  }
  0xf0   : > { %695 = vperm.xlu1 %1911, %v665_v32  }
  0xf1   : > { %687 = vperm.xlu0 %1910, %v657_v35  }
  0xf4   : > { %699 = vperm.xlu1 %1911, %v669_v36  }
  0xf8   : > { %809 = vperm.xlu1 %1911, %v779_v39  }
  0xfc   : > { %813 = vperm.xlu1 %1911, %v783_v41  }
 0x100   : > { %817 = vperm.xlu1 %1911, %v787_v44  }
 0x104   : > { %821 = vperm.xlu1 %1911, %v791_v47  }
 0x108   : > { %703 = vperm.xlu1 %1911, %v673_v49  }
 0x15c   : > { %v394_v50 = vpop.xlane.xlu1 %393  ;;  %v388_v51 = vpop.xlane.xlu0 %387 }
 0x15d   : > { %v413_v52 = vmul.f32 0.0625, %v394_v50  ;;  %v411_v53 = vmul.f32 0.0625, %v388_v51 }
 0x15f   : > { %v431_v54 = vrot.slane %v413_v52, 4  ;;  %v419_v55 = vrot.slane %v411_v53, 4 }
 0x160   : > { %v397_v56 = vpop.xlane.xlu1 %396  ;;  %v391_v57 = vpop.xlane.xlu0 %390 }
 0x161   : > { %v432_v58 = vadd.f32 %v431_v54, %v413_v52  ;;  %v420_v59 = vadd.f32 %v419_v55, %v411_v53  ;;  %v414_v60 = vmul.f32 0.0625, %v397_v56  ;;  %v412_v61 = vmul.f32 0.0625, %v391_v57 }
 0x163   : > { %v433_v62 = vrot.slane %v432_v58, 2  ;;  %v421_v63 = vrot.slane %v420_v59, 2  ;;  %v437_v0 = vrot.slane %v414_v60, 4  ;;  %v425_v4 = vrot.slane %v412_v61, 4 }
 0x164   : > { %v403_v5 = vpop.xlane.xlu1 %402  ;;  %v400_v7 = vpop.xlane.xlu0 %399 }
 0x165   : > { %v434_v8 = vadd.f32 %v433_v62, %v432_v58  ;;  %v422_v9 = vadd.f32 %v421_v63, %v420_v59  ;;  %v438_v10 = vadd.f32 %v437_v0, %v414_v60  ;;  %v426_v11 = vadd.f32 %v425_v4, %v412_v61 }
 0x166   : > { %v416_v14 = vmul.f32 0.0625, %v403_v5  ;;  %v415_v15 = vmul.f32 0.0625, %v400_v7 }
 0x167   : > { %v435_v16 = vrot.slane %v434_v8, 1  ;;  %v423_v17 = vrot.slane %v422_v9, 1  ;;  %v439_v20 = vrot.slane %v438_v10, 2  ;;  %v427_v21 = vrot.slane %v426_v11, 2 }
 0x168   : > { %v449_v23 = vrot.slane %v416_v14, 4  ;;  %v443_v24 = vrot.slane %v415_v15, 4  ;;  %v406_v25 = vpop.xlane.xlu0 %405 }
 0x169   : > { %v436_v26 = vadd.f32 %v435_v16, %v434_v8  ;;  %v424_v28 = vadd.f32 %v423_v17, %v422_v9  ;;  %v440_v29 = vadd.f32 %v439_v20, %v438_v10  ;;  %v428_v30 = vadd.f32 %v427_v21, %v426_v11 }
 0x16a   : > { %v450_v32 = vadd.f32 %v449_v23, %v416_v14  ;;  %v444_v33 = vadd.f32 %v443_v24, %v415_v15  ;;  %v417_v34 = vmul.f32 0.0625, %v406_v25  ;;  %v651_v21 = vcombine.high %v2661_v48, %v2661_v48  ;;  %v409_v24 = vpop.xlane.xlu1 %408 }
 0x16b   : > { %v441_v35 = vrot.slane %v440_v29, 1  ;;  %v429_v36 = vrot.slane %v428_v30, 1  ;;  %v468_v37 = vmul.f32 0.125, %v424_v28  ;;  %v470_v38 = vmul.f32 0.125, %v436_v26 }
 0x16c   : > { %v451_v39 = vrot.slane %v450_v32, 2  ;;  %v445_v40 = vrot.slane %v444_v33, 2  ;;  %v455_v41 = vrot.slane %v417_v34, 4  ;;  %v727_v23 = vcombine.high %v2643_v31, %v2643_v31 }
 0x16d   : > { %v442_v42 = vadd.f32 %v441_v35, %v440_v29  ;;  %v430_v43 = vadd.f32 %v429_v36, %v428_v30  ;;  %v2666_v44 = vsub.f32 %v2599_v2, %v468_v37  ;;  %v2669_v45 = vsub.f32 %v2596_v1, %v470_v38 }
 0x16e   : > { %v452_v47 = vadd.f32 %v451_v39, %v450_v32  ;;  %v446_v49 = vadd.f32 %v445_v40, %v444_v33  ;;  %v456_v50 = vadd.f32 %v455_v41, %v417_v34  ;;  %v418_v25 = vmul.f32 0.0625, %v409_v24 }
 0x16f   : > { %v484_v51 = vmul.f32 %v2666_v44, %v2666_v44  ;;  %v469_v52 = vmul.f32 0.125, %v430_v43  ;;  %v471_v53 = vmul.f32 0.125, %v442_v42  ;;  %v486_v2 = vmul.f32 %v2669_v45, %v2669_v45 }
 0x170   : > { %v453_v54 = vrot.slane %v452_v47, 1  ;;  %v447_v55 = vrot.slane %v446_v49, 1  ;;  %v457_v56 = vrot.slane %v456_v50, 2  ;;  %v681_v26 = vrot.slane %v651_v21, %v2639_v27 }
 0x171   : > { %v492_v57 = vsel %vm385_vm0, %v484_v51, 0.0  ;;  %v2677_v58 = vsub.f32 %v2609_v6, %v469_v52  ;;  %v2680_v1 = vsub.f32 %v2602_v3, %v471_v53  ;;  %v498_v5 = vsel %vm385_vm0, %v486_v2, 0.0 }
 0x172   : > { %v454_v59 = vadd.f32 %v453_v54, %v452_v47  ;;  %v448_v60 = vadd.f32 %v447_v55, %v446_v49  ;;  %v458_v61 = vadd.f32 %v457_v56, %v456_v50  ;;  %493 = vadd.xlane.f32.xlu0 %v492_v57  ;;  %v741_v29 = vrot.slane %v727_v23, %v2635_v22  ;;  %v1914_v50 = vld [vmem:[#allocation8] sm:$0xff]  }
 0x173   : > { %v485_v62 = vmul.f32 %v2677_v58, %v2677_v58  ;;  %v487_v6 = vmul.f32 %v2680_v1, %v2680_v1  ;;  %v461_v30 = vrot.slane %v418_v25, 4  ;;  %1774 = vmatprep.subr.bf16.mxu0 %v1914_v50 }
 0x174   : > { %v459_v63 = vrot.slane %v458_v61, 1  ;;  %v472_v0 = vmul.f32 0.125, %v448_v60  ;;  %v473_v4 = vmul.f32 0.125, %v454_v59  ;;  %v743_v48 = vcombine.high %v741_v29, %v741_v29  ;;  %1775 = vmatpush3.bf16.msra.mxu0 %v1914_v50 }
 0x175   : > { %v495_v7 = vsel %vm385_vm0, %v485_v62, 0.0  ;;  %v501_v14 = vsel %vm385_vm0, %v487_v6, 0.0  ;;  %v462_v34 = vadd.f32 %v461_v30, %v418_v25  ;;  %v757_v51 = vrot.slane %v741_v29, %v2635_v22 }
 0x176   : > { %v460_v8 = vadd.f32 %v459_v63, %v458_v61  ;;  %499 = vadd.xlane.f32.xlu0 %v498_v5  ;;  %496 = vadd.xlane.f32.xlu1 %v495_v7  ;;  %v2689_v3 = vsub.f32 %v2619_v13, %v472_v0  ;;  %v2692_v9 = vsub.f32 %v2616_v12, %v473_v4  ;;  %v688_v61 = vpop.permute.xlu0 %687 }
 0x177   : > { %v463_v35 = vrot.slane %v462_v34, 2  ;;  %v795_v52 = vrot.slane %v757_v51, %v2639_v27  ;;  %v773_v53 = vcombine.high %v757_v51, %v757_v51 }
 0x178   : > { %v488_v10 = vmul.f32 %v2689_v3, %v2689_v3  ;;  %v474_v11 = vmul.f32 0.125, %v460_v8  ;;  %v489_v15 = vmul.f32 %v2692_v9, %v2692_v9 }
 0x179   : > { %v464_v38 = vadd.f32 %v463_v35, %v462_v34  ;;  %v803_v54 = vrot.slane %v773_v53, %v2639_v27 }
 0x17a   : > { %502 = vadd.xlane.f32.xlu1 %v501_v14  ;;  %v504_v16 = vsel %vm385_vm0, %v488_v10, 0.0  ;;  %v2701_v17 = vsub.f32 %v2626_v18, %v474_v11  ;;  %v507_v13 = vsel %vm385_vm0, %v489_v15, 0.0  ;;  %v621_v18 = vcombine.high %v2656_v46, %v2656_v46 }
 0x17b   : > { %505 = vadd.xlane.f32.xlu0 %v504_v16  ;;  %v771_v46 = vrot.slane %v743_v48, %v2635_v22  ;;  %v465_v40 = vrot.slane %v464_v38, 1 }
 0x17c   : > { %v490_v12 = vmul.f32 %v2701_v17, %v2701_v17  ;;  %v649_v28 = vrot.slane %v621_v18, %v2635_v22 }
 0x17d   : > { %v799_v36 = vrot.slane %v771_v46, %v2639_v27  ;;  %v775_v37 = vcombine.high %v771_v46, %v771_v46  ;;  %v466_v41 = vadd.f32 %v465_v40, %v464_v38 }
 0x17e   : > { %508 = vadd.xlane.f32.xlu1 %v507_v13  ;;  %v510_v20 = vsel %vm385_vm0, %v490_v12, 0.0  ;;  %v677_v32 = vrot.slane %v649_v28, %v2639_v27  ;;  %v653_v33 = vcombine.high %v649_v28, %v649_v28 }
 0x17f   : > { %511 = vadd.xlane.f32.xlu0 %v510_v20  ;;  %v807_v39 = vrot.slane %v775_v37, %v2639_v27  ;;  %v475_v42 = vmul.f32 0.125, %v466_v41 }
 0x180   : > { %v685_v31 = vrot.slane %v653_v33, %v2639_v27 }
 0x181   : > { %v2722_v43 = vsub.f32 %v2629_v19, %v475_v42  ;;  %v2730_v19 = vpop.permute.xlu1 %691 }
 0x183   : > { %v491_v47 = vmul.f32 %v2722_v43, %v2722_v43 }
 0x185   : > { %v513_v49 = vsel %vm385_vm0, %v491_v47, 0.0  ;;  %v2732_v55 = vpop.permute.xlu1 %695 }
 0x189   : > { %v2734_v56 = vpop.permute.xlu1 %699 }
 0x18d   : > { %v2736_v57 = vpop.permute.xlu1 %809 }
 0x18f   : > { %711 = vperm.xlu1 %1911, %v681_v26  }
 0x191   : > { %v2738_v2 = vpop.permute.xlu1 %813 }
 0x195   : > { %707 = vperm.xlu0 %1910, %v677_v32   ;;  %v2740_v59 = vpop.permute.xlu1 %817 }
 0x199   : > { %715 = vperm.xlu0 %1910, %v685_v31   ;;  %v2742_v60 = vpop.permute.xlu1 %821 }
 0x19d   : > { %829 = vperm.xlu0 %1910, %v799_v36   ;;  %v2744_v62 = vpop.permute.xlu1 %703 }
 0x1a1   : > { %837 = vperm.xlu0 %1910, %v807_v39  }
 0x1b3   : > { %514 = vadd.xlane.f32.xlu1 %v513_v49 }
 0x1c4   : > { %825 = vperm.xlu1 %1911, %v795_v52  }
 0x1c8   : > { %833 = vperm.xlu1 %1911, %v803_v54  }
 0x1ff   : > { %v494_v63 = vpop.xlane.xlu0 %493 }
 0x200   : > { %v516_v0 = vmul.f32 0.0625, %v494_v63 }
 0x202   : > { %v524_v4 = vrot.slane %v516_v0, 4 }
 0x203   : > { %v497_v5 = vpop.xlane.xlu1 %496  ;;  %v500_v7 = vpop.xlane.xlu0 %499 }
 0x204   : > { %v525_v6 = vadd.f32 %v524_v4, %v516_v0  ;;  %v517_v8 = vmul.f32 0.0625, %v497_v5  ;;  %v518_v10 = vmul.f32 0.0625, %v500_v7 }
 0x206   : > { %v526_v11 = vrot.slane %v525_v6, 2  ;;  %v530_v14 = vrot.slane %v517_v8, 4  ;;  %v536_v15 = vrot.slane %v518_v10, 4 }
 0x207   : > { %v503_v16 = vpop.xlane.xlu1 %502 }
 0x208   : > { %v527_v12 = vadd.f32 %v526_v11, %v525_v6  ;;  %v531_v13 = vadd.f32 %v530_v14, %v517_v8  ;;  %v537_v20 = vadd.f32 %v536_v15, %v518_v10  ;;  %v519_v21 = vmul.f32 0.0625, %v503_v16  ;;  %v506_v26 = vpop.xlane.xlu0 %505 }
 0x209   : > { %v520_v48 = vmul.f32 0.0625, %v506_v26 }
 0x20a   : > { %v528_v23 = vrot.slane %v527_v12, 1  ;;  %v532_v18 = vrot.slane %v531_v13, 2  ;;  %v538_v24 = vrot.slane %v537_v20, 2  ;;  %v542_v25 = vrot.slane %v519_v21, 4 }
 0x20b   : > { %v509_v28 = vpop.xlane.xlu1 %508  ;;  %v548_v42 = vrot.slane %v520_v48, 4 }
 0x20c   : > { %v529_v29 = vadd.f32 %v528_v23, %v527_v12  ;;  %v533_v30 = vadd.f32 %v532_v18, %v531_v13  ;;  %v539_v32 = vadd.f32 %v538_v24, %v537_v20  ;;  %v543_v33 = vadd.f32 %v542_v25, %v519_v21  ;;  %v512_v20 = vpop.xlane.xlu0 %511 }
 0x20d   : > { %v521_v34 = vmul.f32 0.0625, %v509_v28  ;;  %v549_v5 = vadd.f32 %v548_v42, %v520_v48  ;;  %v522_v26 = vmul.f32 0.0625, %v512_v20 }
 0x20e   : > { %v572_v31 = vmul.f32 0.125, %v529_v29  ;;  %v534_v46 = vrot.slane %v533_v30, 1  ;;  %v540_v35 = vrot.slane %v539_v32, 1  ;;  %v544_v36 = vrot.slane %v543_v33, 2 }
 0x20f   : > { %v554_v37 = vrot.slane %v521_v34, 4  ;;  %v550_v8 = vrot.slane %v549_v5, 2 }
 0x210   : > { %v580_v38 = vadd.f32 1e-05, %v572_v31  ;;  %v535_v39 = vadd.f32 %v534_v46, %v533_v30  ;;  %v541_v40 = vadd.f32 %v540_v35, %v539_v32  ;;  %v545_v41 = vadd.f32 %v544_v36, %v543_v33 }
 0x211   : > { %v555_v47 = vadd.f32 %v554_v37, %v521_v34  ;;  %v551_v15 = vadd.f32 %v550_v8, %v549_v5 }
 0x212   : > { %1917 = vrsqrt.f32 %v580_v38  ;;  %v573_v49 = vmul.f32 0.125, %v535_v39  ;;  %v574_v50 = vmul.f32 0.125, %v541_v40  ;;  %v546_v51 = vrot.slane %v545_v41, 1 }
 0x213   : > { %v556_v52 = vrot.slane %v555_v47, 2  ;;  %v552_v24 = vrot.slane %v551_v15, 1 }
 0x214   : > { %v581_v53 = vadd.f32 1e-05, %v573_v49  ;;  %v582_v54 = vadd.f32 1e-05, %v574_v50  ;;  %v547_v63 = vadd.f32 %v546_v51, %v545_v41  ;;  %v708_v37 = vpop.permute.xlu0 %707 }
 0x215   : > { %v557_v0 = vadd.f32 %v556_v52, %v555_v47  ;;  %v553_v48 = vadd.f32 %v552_v24, %v551_v15 }
 0x216   : > { %1919 = vrsqrt.f32 %v581_v53  ;;  %v575_v4 = vmul.f32 0.125, %v547_v63 }
 0x217   : > { %1921 = vrsqrt.f32 %v582_v54  ;;  %v558_v6 = vrot.slane %v557_v0, 1  ;;  %v576_v46 = vmul.f32 0.125, %v553_v48 }
 0x218   : > { %v583_v7 = vadd.f32 1e-05, %v575_v4  ;;  %v716_v49 = vpop.permute.xlu0 %715 }
 0x219   : > { %v559_v11 = vadd.f32 %v558_v6, %v557_v0 }
 0x21a   : > { %1923 = vrsqrt.f32 %v583_v7 }
 0x21b   : > { %v577_v13 = vmul.f32 0.125, %v559_v11 }
 0x21c   : > { %v1918_v10 = vpop.eup %1917  ;;  %v830_v15 = vpop.permute.xlu0 %829 }
 0x21d   : > { %v596_v14 = vmul.f32 %v1918_v10, %v2666_v44  ;;  %v585_v32 = vadd.f32 1e-05, %v577_v13 }
 0x21f   : > { %v718_v16 = vmul.f32 %v688_v61, %v596_v14  ;;  %v712_v14 = vpop.permute.xlu1 %711 }
 0x220   : > { %v1920_v12 = vpop.eup %1919 }
 0x221   : > { %v1922_v21 = vpop.eup %1921  ;;  %v597_v23 = vmul.f32 %v1920_v12, %v2677_v58  ;;  %v840_v18 = vadd.f32 %v2736_v57, %v718_v16  ;;  %v560_v57 = vrot.slane %v522_v26, 4 }
 0x222   : > { %v598_v25 = vmul.f32 %v1922_v21, %v2669_v45 }
 0x223   : > { %v719_v28 = vmul.f32 %v2730_v19, %v597_v23  ;;  %v856_v29 = vmul.f32 0.70710677, %v840_v18  ;;  %v848_v41 = vmul.f32 0.5, %v840_v18 }
 0x224   : > { %v1924_v30 = vpop.eup %1923  ;;  %v720_v44 = vmul.f32 %v2732_v55, %v598_v25  ;;  %v561_v55 = vadd.f32 %v560_v57, %v522_v26 }
 0x225   : > { %v841_v61 = vadd.f32 %v2738_v2, %v719_v28  ;;  %1925 = verf.f32 %v856_v29  ;;  %v599_v33 = vmul.f32 %v1924_v30, %v2680_v1  ;;  %v584_v2 = vadd.f32 1e-05, %v576_v46 }
 0x226   : > { %v842_v58 = vadd.f32 %v2740_v59, %v720_v44  ;;  %1927 = vrsqrt.f32 %v585_v32  ;;  %v562_v1 = vrot.slane %v561_v55, 2 }
 0x227   : > { %v857_v34 = vmul.f32 0.70710677, %v841_v61  ;;  %v721_v45 = vmul.f32 %v2734_v56, %v599_v33  ;;  %v849_v42 = vmul.f32 0.5, %v841_v61 }
 0x228   : > { %v858_v31 = vmul.f32 0.70710677, %v842_v58  ;;  %v563_v40 = vadd.f32 %v562_v1, %v561_v55  ;;  %v850_v0 = vmul.f32 0.5, %v842_v58 }
 0x229   : > { %1929 = verf.f32 %v857_v34  ;;  %v843_v19 = vadd.f32 %v2742_v60, %v721_v45 }
 0x22a   : > { %1931 = verf.f32 %v858_v31  ;;  %v564_v54 = vrot.slane %v563_v40, 1 }
 0x22b   : > { %v859_v35 = vmul.f32 0.70710677, %v843_v19  ;;  %v851_v4 = vmul.f32 0.5, %v843_v19 }
 0x22c   : > { %v565_v10 = vadd.f32 %v564_v54, %v563_v40 }
 0x22d   : > { %1933 = verf.f32 %v859_v35 }
 0x22e   : > { %1935 = vrsqrt.f32 %v584_v2  ;;  %v578_v12 = vmul.f32 0.125, %v565_v10 }
 0x22f   : > { %v1926_v36 = vpop.eup %1925 }
 0x230   : > { %v1928_v38 = vpop.eup %1927  ;;  %v872_v59 = vadd.f32 1.0, %v1926_v36  ;;  %v586_v18 = vadd.f32 1e-05, %v578_v12 }
 0x231   : > { %v601_v60 = vmul.f32 %v1928_v38, %v2692_v9 }
 0x232   : > { %v880_v50 = vmul.f32 %v872_v59, %v848_v41 }
 0x233   : > { %v1930_v39 = vpop.eup %1929  ;;  %v723_v7 = vmul.f32 %v708_v37, %v601_v60 }
 0x234   : > { %v1932_v56 = vpop.eup %1931  ;;  %v873_v47 = vadd.f32 1.0, %v1930_v39 }
 0x235   : > { %v874_v52 = vadd.f32 1.0, %v1932_v56  ;;  %v845_v16 = vadd.f32 %v830_v15, %v723_v7  ;;  %v838_v56 = vpop.permute.xlu0 %837 }
 0x236   : > { %v881_v51 = vmul.f32 %v873_v47, %v849_v42 }
 0x237   : > { %v1934_v53 = vpop.eup %1933  ;;  %v882_v6 = vmul.f32 %v874_v52, %v850_v0  ;;  %v861_v21 = vmul.f32 0.70710677, %v845_v16  ;;  %v853_v31 = vmul.f32 0.5, %v845_v16 }
 0x238   : > { %v888_v63 = vpack.c.bf16 %v881_v51, %v880_v50  ;;  %v875_v5 = vadd.f32 1.0, %v1934_v53  ;;  %v1936_v11 = vpop.eup %1935 }
 0x239   : > { %v600_v13 = vmul.f32 %v1936_v11, %v2689_v3  ;;  %1937 = verf.f32 %v861_v21 }
 0x23a   : > { %1776 = vmatprep.mubr.msk.bf16.mxu0 %vm385_vm0, %v888_v63  ;;  %v883_v8 = vmul.f32 %v875_v5, %v851_v4  ;;  %1939 = vrsqrt.f32 %v586_v18 }
 0x23b   : > { %v722_v25 = vmul.f32 %v2744_v62, %v600_v13  ;;  %v977_v13 = vld [vmem:[#allocation10] sm:$0xff] }
 0x23c   : > { %v889_v9 = vpack.c.bf16 %v883_v8, %v882_v6  ;;  %v1205_v21 = vrot.slane %v977_v13, %v2635_v22 }
 0x23e   : > { %1777 = vmatmul.mubr.msk.bf16.vlgmr.msra.gmra.mrb[0].mxu0 %vm385_vm0, %v889_v9 }
 0x240   : > { %v515_v20 = vpop.xlane.xlu1 %514 }
 0x241   : > { %v523_v23 = vmul.f32 0.0625, %v515_v20 }
 0x243   : > { %v566_v24 = vrot.slane %v523_v23, 4  ;;  %v1938_v48 = vpop.eup %1937 }
 0x244   : > { %v826_v26 = vpop.permute.xlu1 %825  ;;  %v1940_v58 = vpop.eup %1939  ;;  %v877_v34 = vadd.f32 1.0, %v1938_v48  ;;  %v1198_v48 = vcombine.high %v977_v13, %v977_v13 }
 0x245   : > { %v567_v28 = vadd.f32 %v566_v24, %v523_v23  ;;  %v844_v29 = vadd.f32 %v826_v26, %v722_v25  ;;  %v602_v62 = vmul.f32 %v1940_v58, %v2701_v17  ;;  %v1213_v23 = vcombine.high %v1205_v21, %v1205_v21  ;;  %v2801_v25 = vld [vmem:[#allocation11] sm:$0xff] }
 0x246   : > { %v885_v55 = vmul.f32 %v877_v34, %v853_v31  ;;  %v1221_v24 = vrot.slane %v1205_v21, %v2635_v22  ;;  %v1327_v26 = vrot.slane %v2801_v25, %v2635_v22 }
 0x247   : > { %v568_v30 = vrot.slane %v567_v28, 2  ;;  %v860_v32 = vmul.f32 0.70710677, %v844_v29  ;;  %v852_v19 = vmul.f32 0.5, %v844_v29  ;;  %v724_v36 = vmul.f32 %v712_v14, %v602_v62 }
 0x248   : > { %v834_v2 = vpop.permute.xlu1 %833  ;;  %v1235_v18 = vrot.slane %v1213_v23, %v2635_v22  ;;  %v1243_v29 = vcombine.high %v1221_v24, %v1221_v24 }
 0x249   : > { %v569_v44 = vadd.f32 %v568_v30, %v567_v28  ;;  %1941 = verf.f32 %v860_v32  ;;  %v846_v37 = vadd.f32 %v834_v2, %v724_v36  ;;  %v1250_v30 = vrot.slane %v1221_v24, %v2639_v27 }
 0x24a   : > { %v1254_v28 = vrot.slane %v1235_v18, %v2639_v27  ;;  %v1245_v32 = vcombine.high %v1235_v18, %v1235_v18 }
 0x24b   : > { %v570_v61 = vrot.slane %v569_v44, 1  ;;  %v862_v39 = vmul.f32 0.70710677, %v846_v37  ;;  %v854_v50 = vmul.f32 0.5, %v846_v37 }
 0x24d   : > { %v571_v33 = vadd.f32 %v570_v61, %v569_v44  ;;  %v1335_v44 = vcombine.high %v1327_v26, %v1327_v26  ;;  %v1258_v61 = vrot.slane %v1243_v29, %v2639_v27 }
 0x24f   : > { %v579_v3 = vmul.f32 0.125, %v571_v33  ;;  %v1343_v33 = vrot.slane %v1327_v26, %v2635_v22  ;;  %v1357_v58 = vrot.slane %v1335_v44, %v2635_v22 }
 0x251   : > { %v587_v57 = vadd.f32 1e-05, %v579_v3  ;;  %v1262_v3 = vrot.slane %v1245_v32, %v2639_v27  ;;  %v1365_v34 = vcombine.high %v1343_v33, %v1343_v33  ;;  %v1376_v62 = vrot.slane %v1357_v58, %v2639_v27 }
 0x252   : > { %v1367_v31 = vcombine.high %v1357_v58, %v1357_v58 }
 0x253   : > { %v1942_v45 = vpop.eup %1941  ;;  %1943 = vrsqrt.f32 %v587_v57  ;;  %v1372_v57 = vrot.slane %v1343_v33, %v2639_v27 }
 0x254   : > { %v876_v46 = vadd.f32 1.0, %v1942_v45  ;;  %1945 = verf.f32 %v862_v39  ;;  %v2813_v45 = vrot.slane %v1198_v48, %v2635_v22 }
 0x256   : > { %v884_v35 = vmul.f32 %v876_v46, %v852_v19  ;;  %v1380_v19 = vrot.slane %v1365_v34, %v2639_v27  ;;  %v2819_v46 = vrot.slane %v2813_v45, %v2635_v22 }
 0x258   : > { %v890_v1 = vpack.c.bf16 %v885_v55, %v884_v35  ;;  %v1384_v55 = vrot.slane %v1367_v31, %v2639_v27  ;;  %v1266_v35 = vrot.slane %v2819_v46, %v2639_v27 }
 0x25a   : > { %1780 = vmatprep.mubr.msk.bf16.mxu0 %vm385_vm0, %v890_v1 }
 0x25d   : > { %v1944_v38 = vpop.eup %1943 }
 0x25e   : > { %v603_v59 = vmul.f32 %v1944_v38, %v2722_v43  ;;  %v1946_v42 = vpop.eup %1945 }
 0x25f   : > { %v878_v47 = vadd.f32 1.0, %v1946_v42 }
 0x260   : > { %v725_v40 = vmul.f32 %v716_v49, %v603_v59 }
 0x261   : > { %v886_v53 = vmul.f32 %v878_v47, %v854_v50 }
 0x262   : > { %v847_v41 = vadd.f32 %v838_v56, %v725_v40 }
 0x264   : > { %v863_v17 = vmul.f32 0.70710677, %v847_v41  ;;  %v855_v51 = vmul.f32 0.5, %v847_v41 }
 0x266   : > { %1947 = verf.f32 %v863_v17 }
 0x270   : > { %v1948_v60 = vpop.eup %1947 }
 0x271   : > { %v879_v52 = vadd.f32 1.0, %v1948_v60 }
 0x273   : > { %v887_v54 = vmul.f32 %v879_v52, %v855_v51 }
 0x275   : > { %v891_v63 = vpack.c.bf16 %v887_v54, %v886_v53 }
 0x277   : > { %1781 = vmatmul.mubr.msk.bf16.gmra.mrb[4].mxu0 %vm385_vm0, %v891_v63 }
 0x311   : > { %v2766_v43 = vpop.f32.mrb[0].mxu0 }
 0x312   : > { %v2768_v49 = vpop.f32.mrb[1].mxu0  ;;  %v986_v8 = vsel %vm979_vm1, %v2766_v43, 0.0 }
 0x313   : > { %v2770_v0 = vpop.f32.mrb[2].mxu0  ;;  %v980_v4 = vsel %vm979_vm1, %v2768_v49, 0.0 }
 0x314   : > { %981 = vadd.xlane.f32.xlu1 %v980_v4  ;;  %v2774_v5 = vpop.f32.mrb[3].mxu0  ;;  %v989_v6 = vsel %vm979_vm1, %v2770_v0, 0.0 }
 0x315   : > { %v983_v7 = vsel %vm979_vm1, %v2774_v5, 0.0 }
 0x316   : > { %984 = vadd.xlane.f32.xlu0 %v983_v7 }
 0x318   : > { %990 = vadd.xlane.f32.xlu1 %v989_v6 }
 0x31a   : > { %987 = vadd.xlane.f32.xlu0 %v986_v8 }
 0x34a   : > { %v2782_v10 = vpop.f32.mrb[4].mxu0 }
 0x34b   : > { %v2784_v11 = vpop.f32.mrb[5].mxu0  ;;  %v998_v12 = vsel %vm979_vm1, %v2782_v10, 0.0 }
 0x34c   : > { %v2786_v14 = vpop.f32.mrb[6].mxu0  ;;  %v992_v15 = vsel %vm979_vm1, %v2784_v11, 0.0 }
 0x34d   : > { %993 = vadd.xlane.f32.xlu0 %v992_v15  ;;  %v2790_v9 = vpop.f32.mrb[7].mxu0  ;;  %v1001_v20 = vsel %vm979_vm1, %v2786_v14, 0.0 }
 0x34e   : > { %v995_v16 = vsel %vm979_vm1, %v2790_v9, 0.0 }
 0x34f   : > { %996 = vadd.xlane.f32.xlu1 %v995_v16 }
 0x351   : > { %999 = vadd.xlane.f32.xlu0 %v998_v12 }
 0x353   : > { %1002 = vadd.xlane.f32.xlu1 %v1001_v20 }
 0x364   : > { %1284 = vperm.xlu1 %1911, %v1254_v28  }
 0x367   : > { %1280 = vperm.xlu0 %1910, %v1250_v30  }
 0x368   : > { %1288 = vperm.xlu1 %1911, %v1258_v61  }
 0x36b   : > { %1292 = vperm.xlu0 %1910, %v1262_v3  }
 0x36c   : > { %1402 = vperm.xlu1 %1911, %v1372_v57  }
 0x36f   : > { %1406 = vperm.xlu0 %1910, %v1376_v62  }
 0x370   : > { %1410 = vperm.xlu1 %1911, %v1380_v19  }
 0x373   : > { %1414 = vperm.xlu0 %1910, %v1384_v55  }
 0x374   : > { %1296 = vperm.xlu1 %1911, %v1266_v35  }
 0x3a1   : > { %v982_v2 = vpop.xlane.xlu1 %981 }
 0x3a2   : > { %v1005_v36 = vmul.f32 0.25, %v982_v2 }
 0x3a3   : > { %v985_v1 = vpop.xlane.xlu0 %984 }
 0x3a4   : > { %v1013_v37 = vrot.slane %v1005_v36, 4  ;;  %v1006_v38 = vmul.f32 0.25, %v985_v1 }
 0x3a5   : > { %v991_v59 = vpop.xlane.xlu1 %990 }
 0x3a6   : > { %v1014_v39 = vadd.f32 %v1013_v37, %v1005_v36  ;;  %v1019_v40 = vrot.slane %v1006_v38, 4  ;;  %v1008_v56 = vmul.f32 0.25, %v991_v59 }
 0x3a7   : > { %v988_v41 = vpop.xlane.xlu0 %987 }
 0x3a8   : > { %v1015_v17 = vrot.slane %v1014_v39, 2  ;;  %v1020_v42 = vadd.f32 %v1019_v40, %v1006_v38  ;;  %v1031_v47 = vrot.slane %v1008_v56, 4  ;;  %v1007_v60 = vmul.f32 0.25, %v988_v41 }
 0x3aa   : > { %v1016_v50 = vadd.f32 %v1015_v17, %v1014_v39  ;;  %v1021_v51 = vrot.slane %v1020_v42, 2  ;;  %v1032_v52 = vadd.f32 %v1031_v47, %v1008_v56  ;;  %v1025_v53 = vrot.slane %v1007_v60, 4 }
 0x3ac   : > { %v1017_v54 = vrot.slane %v1016_v50, 1  ;;  %v1022_v63 = vadd.f32 %v1021_v51, %v1020_v42  ;;  %v1033_v4 = vrot.slane %v1032_v52, 2  ;;  %v1026_v7 = vadd.f32 %v1025_v53, %v1007_v60 }
 0x3ae   : > { %v1023_v6 = vrot.slane %v1022_v63, 1  ;;  %v1034_v8 = vadd.f32 %v1033_v4, %v1032_v52  ;;  %v1027_v15 = vrot.slane %v1026_v7, 2  ;;  %v1018_v16 = vadd.f32 %v1017_v54, %v1016_v50 }
 0x3b0   : > { %v1024_v12 = vadd.f32 %v1023_v6, %v1022_v63  ;;  %v1035_v13 = vrot.slane %v1034_v8, 1  ;;  %v1028_v20 = vadd.f32 %v1027_v15, %v1026_v7  ;;  %v1061_v28 = vmul.f32 0.125, %v1018_v16 }
 0x3b2   : > { %v1036_v21 = vadd.f32 %v1035_v13, %v1034_v8  ;;  %v1029_v23 = vrot.slane %v1028_v20, 1  ;;  %v1062_v18 = vmul.f32 0.125, %v1024_v12  ;;  %v2836_v33 = vsub.f32 %v2768_v49, %v1061_v28 }
 0x3b4   : > { %v1030_v24 = vadd.f32 %v1029_v23, %v1028_v20  ;;  %v1064_v26 = vmul.f32 0.125, %v1036_v21  ;;  %v2828_v32 = vsub.f32 %v2774_v5, %v1062_v18  ;;  %v1077_v58 = vmul.f32 %v2836_v33, %v2836_v33 }
 0x3b6   : > { %v2825_v29 = vsub.f32 %v2770_v0, %v1064_v26  ;;  %v1063_v30 = vmul.f32 0.125, %v1030_v24  ;;  %v1078_v0 = vmul.f32 %v2828_v32, %v2828_v32  ;;  %v1085_v49 = vsel %vm979_vm1, %v1077_v58, 0.0  ;;  %v1485_v58 = vld [vmem:[#allocation13] sm:$0x3] }
 0x3b7   : > { %1794 = vmatprep.subr.msk.bf16.mxu1 %vm1498_vm2, %v1485_v58 }
 0x3b8   : > { %v1080_v44 = vmul.f32 %v2825_v29, %v2825_v29  ;;  %v2833_v61 = vsub.f32 %v2766_v43, %v1063_v30  ;;  %v1088_v43 = vsel %vm979_vm1, %v1078_v0, 0.0  ;;  %v1244_v0 = vcombine.high %v2819_v46, %v2819_v46 }
 0x3ba   : > { %v1094_v48 = vsel %vm979_vm1, %v1080_v44, 0.0  ;;  %v1079_v3 = vmul.f32 %v2833_v61, %v2833_v61 }
 0x3bb   : > { %1095 = vadd.xlane.f32.xlu1 %v1094_v48  ;;  %v1320_v48 = vcombine.high %v2801_v25, %v2801_v25 }
 0x3bc   : > { %v1091_v5 = vsel %vm979_vm1, %v1079_v3, 0.0  ;;  %v1214_v3 = vcombine.high %v2813_v45, %v2813_v45 }
 0x3bd   : > { %1092 = vadd.xlane.f32.xlu0 %v1091_v5  ;;  %v1334_v5 = vrot.slane %v1320_v48, %v2635_v22 }
 0x3bf   : > { %1089 = vadd.xlane.f32.xlu1 %v1088_v43  ;;  %v1500_v43 = vsel %vm1498_vm2, %v1485_v58, 0  ;;  %v1336_v45 = vcombine.high %v1334_v5, %v1334_v5 }
 0x3c0   : > { %1785 = vmatpush3.bf16.msra.mxu1 %v1500_v43 }
 0x3c1   : > { %1086 = vadd.xlane.f32.xlu0 %v1085_v49  ;;  %v1242_v49 = vrot.slane %v1214_v3, %v2635_v22 }
 0x3c3   : > { %v1270_v25 = vrot.slane %v1242_v49, %v2639_v27 }
 0x3da   : > { %v994_v57 = vpop.xlane.xlu0 %993 }
 0x3db   : > { %v1009_v34 = vmul.f32 0.25, %v994_v57  ;;  %v1274_v57 = vrot.slane %v1244_v0, %v2639_v27 }
 0x3dc   : > { %v997_v62 = vpop.xlane.xlu1 %996 }
 0x3dd   : > { %v1037_v31 = vrot.slane %v1009_v34, 4  ;;  %v1010_v19 = vmul.f32 0.25, %v997_v62  ;;  %v1246_v62 = vcombine.high %v1242_v49, %v1242_v49 }
 0x3de   : > { %v1000_v55 = vpop.xlane.xlu0 %999 }
 0x3df   : > { %v1038_v35 = vadd.f32 %v1037_v31, %v1009_v34  ;;  %v1043_v2 = vrot.slane %v1010_v19, 4  ;;  %v1011_v36 = vmul.f32 0.25, %v1000_v55  ;;  %v1350_v34 = vrot.slane %v1334_v5, %v2635_v22 }
 0x3e0   : > { %v1003_v1 = vpop.xlane.xlu1 %1002  ;;  %v1364_v55 = vrot.slane %v1336_v45, %v2635_v22 }
 0x3e1   : > { %v1039_v37 = vrot.slane %v1038_v35, 2  ;;  %v1044_v38 = vadd.f32 %v1043_v2, %v1010_v19  ;;  %v1049_v59 = vrot.slane %v1011_v36, 4  ;;  %v1012_v39 = vmul.f32 0.25, %v1003_v1 }
 0x3e2   : > { %v1388_v46 = vrot.slane %v1350_v34, %v2639_v27  ;;  %v1366_v31 = vcombine.high %v1350_v34, %v1350_v34  ;;  %v1278_v19 = vrot.slane %v1246_v62, %v2639_v27  ;;  %v1392_v2 = vrot.slane %v1364_v55, %v2639_v27 }
 0x3e3   : > { %v1040_v40 = vadd.f32 %v1039_v37, %v1038_v35  ;;  %v1045_v56 = vrot.slane %v1044_v38, 2  ;;  %v1050_v41 = vadd.f32 %v1049_v59, %v1011_v36  ;;  %v1055_v17 = vrot.slane %v1012_v39, 4 }
 0x3e4   : > { %v1396_v35 = vrot.slane %v1366_v31, %v2639_v27  ;;  %v1368_v36 = vcombine.high %v1364_v55, %v1364_v55  ;;  %v2889_v37 = vpop.permute.xlu1 %1284 }
 0x3e5   : > { %v1041_v42 = vrot.slane %v1040_v40, 1  ;;  %v1046_v47 = vadd.f32 %v1045_v56, %v1044_v38  ;;  %v1051_v60 = vrot.slane %v1050_v41, 2  ;;  %v1056_v50 = vadd.f32 %v1055_v17, %v1012_v39 }
 0x3e6   : > { %v1400_v1 = vrot.slane %v1368_v36, %v2639_v27  ;;  %v2891_v59 = vpop.permute.xlu0 %1280 }
 0x3e7   : > { %v1042_v51 = vadd.f32 %v1041_v42, %v1040_v40  ;;  %v1047_v52 = vrot.slane %v1046_v47, 1  ;;  %v1052_v53 = vadd.f32 %v1051_v60, %v1050_v41  ;;  %v1057_v54 = vrot.slane %v1056_v50, 2 }
 0x3e8   : > { %v1289_v38 = vpop.permute.xlu1 %1288 }
 0x3e9   : > { %v1048_v63 = vadd.f32 %v1047_v52, %v1046_v47  ;;  %v1053_v4 = vrot.slane %v1052_v53, 1  ;;  %v1058_v7 = vadd.f32 %v1057_v54, %v1056_v50  ;;  %v1065_v15 = vmul.f32 0.125, %v1042_v51 }
 0x3ea   : > { %v1293_v22 = vpop.permute.xlu0 %1292 }
 0x3eb   : > { %v1054_v6 = vadd.f32 %v1053_v4, %v1052_v53  ;;  %v1059_v8 = vrot.slane %v1058_v7, 1  ;;  %v1066_v13 = vmul.f32 0.125, %v1048_v63  ;;  %v2852_v23 = vsub.f32 %v2784_v11, %v1065_v15 }
 0x3ec   : > { %v2893_v39 = vpop.permute.xlu1 %1402 }
 0x3ed   : > { %v1060_v16 = vadd.f32 %v1059_v8, %v1058_v7  ;;  %v1067_v12 = vmul.f32 0.125, %v1054_v6  ;;  %v2860_v26 = vsub.f32 %v2790_v9, %v1066_v13 }
 0x3ee   : > { %v1407_v56 = vpop.permute.xlu0 %1406 }
 0x3ef   : > { %v2849_v20 = vsub.f32 %v2782_v10, %v1067_v12  ;;  %v1068_v21 = vmul.f32 0.125, %v1060_v16  ;;  %v1081_v10 = vmul.f32 %v2852_v23, %v2852_v23  ;;  %v1082_v44 = vmul.f32 %v2860_v26, %v2860_v26 }
 0x3f0   : > { %v1411_v40 = vpop.permute.xlu1 %1410 }
 0x3f1   : > { %v1083_v18 = vmul.f32 %v2849_v20, %v2849_v20  ;;  %v2857_v24 = vsub.f32 %v2786_v14, %v1068_v21  ;;  %v1097_v14 = vsel %vm979_vm1, %v1081_v10, 0.0  ;;  %v1100_v9 = vsel %vm979_vm1, %v1082_v44, 0.0 }
 0x3f2   : > { %v1415_v17 = vpop.permute.xlu0 %1414 }
 0x3f3   : > { %v1103_v28 = vsel %vm979_vm1, %v1083_v18, 0.0  ;;  %v1084_v30 = vmul.f32 %v2857_v24, %v2857_v24 }
 0x3f4   : > { %1104 = vadd.xlane.f32.xlu0 %v1103_v28  ;;  %v2895_v41 = vpop.permute.xlu1 %1296 }
 0x3f5   : > { %v1106_v11 = vsel %vm979_vm1, %v1084_v30, 0.0 }
 0x3f6   : > { %1107 = vadd.xlane.f32.xlu1 %v1106_v11 }
 0x3f8   : > { %1098 = vadd.xlane.f32.xlu0 %v1097_v14 }
 0x3fa   : > { %1101 = vadd.xlane.f32.xlu1 %v1100_v9 }
 0x40b   : > { %1304 = vperm.xlu1 %1911, %v1274_v57  }
 0x40e   : > { %1300 = vperm.xlu0 %1910, %v1270_v25  }
 0x40f   : > { %1418 = vperm.xlu1 %1911, %v1388_v46  }
 0x412   : > { %1308 = vperm.xlu0 %1910, %v1278_v19  }
 0x413   : > { %1426 = vperm.xlu1 %1911, %v1396_v35  }
 0x416   : > { %1422 = vperm.xlu0 %1910, %v1392_v2  }
 0x41a   : > { %1430 = vperm.xlu0 %1910, %v1400_v1  }
 0x448   : > { %v1096_v42 = vpop.xlane.xlu1 %1095 }
 0x449   : > { %v1112_v47 = vmul.f32 0.25, %v1096_v42 }
 0x44a   : > { %v1093_v60 = vpop.xlane.xlu0 %1092 }
 0x44b   : > { %v1135_v50 = vrot.slane %v1112_v47, 4  ;;  %v1111_v51 = vmul.f32 0.25, %v1093_v60 }
 0x44c   : > { %v1090_v27 = vpop.xlane.xlu1 %1089 }
 0x44d   : > { %v1136_v52 = vadd.f32 %v1135_v50, %v1112_v47  ;;  %v1129_v53 = vrot.slane %v1111_v51, 4  ;;  %v1110_v54 = vmul.f32 0.25, %v1090_v27 }
 0x44e   : > { %v1087_v63 = vpop.xlane.xlu0 %1086 }
 0x44f   : > { %v1137_v4 = vrot.slane %v1136_v52, 2  ;;  %v1130_v7 = vadd.f32 %v1129_v53, %v1111_v51  ;;  %v1123_v6 = vrot.slane %v1110_v54, 4  ;;  %v1109_v8 = vmul.f32 0.25, %v1087_v63 }
 0x451   : > { %v1138_v15 = vadd.f32 %v1137_v4, %v1136_v52  ;;  %v1131_v16 = vrot.slane %v1130_v7, 2  ;;  %v1124_v12 = vadd.f32 %v1123_v6, %v1110_v54  ;;  %v1117_v13 = vrot.slane %v1109_v8, 4 }
 0x453   : > { %v1139_v21 = vrot.slane %v1138_v15, 1  ;;  %v1132_v18 = vadd.f32 %v1131_v16, %v1130_v7  ;;  %v1125_v28 = vrot.slane %v1124_v12, 2  ;;  %v1118_v30 = vadd.f32 %v1117_v13, %v1109_v8 }
 0x455   : > { %v1140_v10 = vadd.f32 %v1139_v21, %v1138_v15  ;;  %v1133_v11 = vrot.slane %v1132_v18, 1  ;;  %v1126_v44 = vadd.f32 %v1125_v28, %v1124_v12  ;;  %v1119_v14 = vrot.slane %v1118_v30, 2 }
 0x457   : > { %v1168_v9 = vmul.f32 0.125, %v1140_v10  ;;  %v1134_v48 = vadd.f32 %v1133_v11, %v1132_v18  ;;  %v1127_v3 = vrot.slane %v1126_v44, 1  ;;  %v1120_v0 = vadd.f32 %v1119_v14, %v1118_v30 }
 0x459   : > { %v1176_v5 = vadd.f32 1e-05, %v1168_v9  ;;  %v1167_v58 = vmul.f32 0.125, %v1134_v48  ;;  %v1128_v43 = vadd.f32 %v1127_v3, %v1126_v44  ;;  %v1121_v49 = vrot.slane %v1120_v0, 1 }
 0x45b   : > { %1949 = vrsqrt.f32 %v1176_v5  ;;  %v1175_v57 = vadd.f32 1e-05, %v1167_v58  ;;  %v1166_v34 = vmul.f32 0.125, %v1128_v43  ;;  %v1122_v25 = vadd.f32 %v1121_v49, %v1120_v0 }
 0x45d   : > { %1951 = vrsqrt.f32 %v1175_v57  ;;  %v1174_v62 = vadd.f32 1e-05, %v1166_v34  ;;  %v1165_v45 = vmul.f32 0.125, %v1122_v25 }
 0x45f   : > { %1953 = vrsqrt.f32 %v1174_v62  ;;  %v1173_v46 = vadd.f32 1e-05, %v1165_v45 }
 0x461   : > { %1955 = vrsqrt.f32 %v1173_v46 }
 0x465   : > { %v1950_v31 = vpop.eup %1949 }
 0x466   : > { %v1192_v19 = vmul.f32 %v1950_v31, %v2825_v29 }
 0x467   : > { %v1952_v55 = vpop.eup %1951 }
 0x468   : > { %v1191_v35 = vmul.f32 %v1952_v55, %v2833_v61  ;;  %v1314_v2 = vmul.f32 %v1293_v22, %v1192_v19 }
 0x469   : > { %v1954_v36 = vpop.eup %1953 }
 0x46a   : > { %v1190_v1 = vmul.f32 %v1954_v36, %v2828_v32  ;;  %v1313_v42 = vmul.f32 %v1289_v38, %v1191_v35  ;;  %v1436_v47 = vadd.f32 %v1415_v17, %v1314_v2 }
 0x46b   : > { %v1956_v60 = vpop.eup %1955 }
 0x46c   : > { %v1189_v50 = vmul.f32 %v1956_v60, %v2836_v33  ;;  %v1312_v51 = vmul.f32 %v2889_v37, %v1190_v1  ;;  %v1435_v27 = vadd.f32 %v1411_v40, %v1313_v42  ;;  %v1452_v52 = vmul.f32 0.70710677, %v1436_v47 }
 0x46d   : > { %v1444_v8 = vmul.f32 0.5, %v1436_v47 }
 0x46e   : > { %v1311_v53 = vmul.f32 %v2891_v59, %v1189_v50  ;;  %v1434_v54 = vadd.f32 %v1407_v56, %v1312_v51  ;;  %v1451_v29 = vmul.f32 0.70710677, %v1435_v27  ;;  %v1443_v40 = vmul.f32 0.5, %v1435_v27 }
 0x470   : > { %v1433_v63 = vadd.f32 %v2893_v39, %v1311_v53  ;;  %v1450_v61 = vmul.f32 0.70710677, %v1434_v54  ;;  %1957 = verf.f32 %v1451_v29  ;;  %v1442_v59 = vmul.f32 0.5, %v1434_v54 }
 0x471   : > { %1959 = verf.f32 %v1452_v52 }
 0x472   : > { %v1449_v22 = vmul.f32 0.70710677, %v1433_v63  ;;  %1961 = verf.f32 %v1450_v61  ;;  %v1441_v6 = vmul.f32 0.5, %v1433_v63 }
 0x474   : > { %1963 = verf.f32 %v1449_v22 }
 0x47a   : > { %v1958_v32 = vpop.eup %1957 }
 0x47b   : > { %v1960_v38 = vpop.eup %1959  ;;  %v1467_v33 = vadd.f32 1.0, %v1958_v32 }
 0x47c   : > { %v1962_v17 = vpop.eup %1961  ;;  %v1468_v7 = vadd.f32 1.0, %v1960_v38 }
 0x47d   : > { %v1466_v4 = vadd.f32 1.0, %v1962_v17  ;;  %v1475_v15 = vmul.f32 %v1467_v33, %v1443_v40 }
 0x47e   : > { %v1964_v37 = vpop.eup %1963  ;;  %v1476_v21 = vmul.f32 %v1468_v7, %v1444_v8 }
 0x47f   : > { %v1465_v56 = vadd.f32 1.0, %v1964_v37  ;;  %v1474_v12 = vmul.f32 %v1466_v4, %v1442_v59 }
 0x480   : > { %v1482_v11 = vpack.c.bf16 %v1476_v21, %v1475_v15 }
 0x481   : > { %v1105_v39 = vpop.xlane.xlu0 %1104  ;;  %v1473_v16 = vmul.f32 %v1465_v56, %v1441_v6 }
 0x482   : > { %v1115_v13 = vmul.f32 0.25, %v1105_v39 }
 0x483   : > { %v1108_v18 = vpop.xlane.xlu1 %1107  ;;  %v1481_v28 = vpack.c.bf16 %v1474_v12, %v1473_v16 }
 0x484   : > { %v1153_v30 = vrot.slane %v1115_v13, 4  ;;  %v1116_v10 = vmul.f32 0.25, %v1108_v18 }
 0x485   : > { %1786 = vmatprep.mubr.msk.bf16.mxu1 %vm979_vm1, %v1481_v28  ;;  %v1099_v44 = vpop.xlane.xlu0 %1098 }
 0x486   : > { %v1154_v14 = vadd.f32 %v1153_v30, %v1115_v13  ;;  %v1159_v9 = vrot.slane %v1116_v10, 4  ;;  %v1113_v48 = vmul.f32 0.25, %v1099_v44  ;;  %1787 = vmatmul.mubr.msk.bf16.vlgmr.msra.gmra.mrb[0].mxu1 %vm979_vm1, %v1482_v11 }
 0x487   : > { %v1102_v3 = vpop.xlane.xlu1 %1101 }
 0x488   : > { %v1155_v0 = vrot.slane %v1154_v14, 2  ;;  %v1160_v5 = vadd.f32 %v1159_v9, %v1116_v10  ;;  %v1141_v58 = vrot.slane %v1113_v48, 4  ;;  %v1114_v43 = vmul.f32 0.25, %v1102_v3 }
 0x48a   : > { %v1156_v49 = vadd.f32 %v1155_v0, %v1154_v14  ;;  %v1161_v57 = vrot.slane %v1160_v5, 2  ;;  %v1142_v34 = vadd.f32 %v1141_v58, %v1113_v48  ;;  %v1147_v25 = vrot.slane %v1114_v43, 4 }
 0x48b   : > { %v1305_v22 = vpop.permute.xlu1 %1304 }
 0x48c   : > { %v1157_v62 = vrot.slane %v1156_v49, 1  ;;  %v1162_v45 = vadd.f32 %v1161_v57, %v1160_v5  ;;  %v1143_v46 = vrot.slane %v1142_v34, 2  ;;  %v1148_v31 = vadd.f32 %v1147_v25, %v1114_v43 }
 0x48d   : > { %v1301_v52 = vpop.permute.xlu0 %1300 }
 0x48e   : > { %v1158_v19 = vadd.f32 %v1157_v62, %v1156_v49  ;;  %v1163_v55 = vrot.slane %v1162_v45, 1  ;;  %v1144_v35 = vadd.f32 %v1143_v46, %v1142_v34  ;;  %v1149_v2 = vrot.slane %v1148_v31, 2 }
 0x48f   : > { %v1419_v17 = vpop.permute.xlu1 %1418 }
 0x490   : > { %v1171_v36 = vmul.f32 0.125, %v1158_v19  ;;  %v1164_v1 = vadd.f32 %v1163_v55, %v1162_v45  ;;  %v1145_v42 = vrot.slane %v1144_v35, 1  ;;  %v1150_v47 = vadd.f32 %v1149_v2, %v1148_v31  ;;  %v1981_v19 = vld [vmem:[%s2577_s12 + $0x10] sm:$0xff]  ;;  %v1982_v2 = vld [vmem:[%s2577_s12] sm:$0xff] }
 0x491   : > { %v1309_v38 = vpop.permute.xlu0 %1308 }
 0x492   : > { %v1179_v60 = vadd.f32 1e-05, %v1171_v36  ;;  %v1172_v50 = vmul.f32 0.125, %v1164_v1  ;;  %v1146_v51 = vadd.f32 %v1145_v42, %v1144_v35  ;;  %v1151_v27 = vrot.slane %v1150_v47, 1  ;;  %v1983_v42 = vld [vmem:[%s2577_s12 + $0x18] sm:$0xff] }
 0x493   : > { %v1427_v56 = vpop.permute.xlu1 %1426 }
 0x494   : > { %1965 = vrsqrt.f32 %v1179_v60  ;;  %v1180_v53 = vadd.f32 1e-05, %v1172_v50  ;;  %v1169_v54 = vmul.f32 0.125, %v1146_v51  ;;  %v1152_v29 = vadd.f32 %v1151_v27, %v1150_v47  ;;  %v1984_v50 = vld [vmem:[%s2577_s12 + $0x8] sm:$0xff] }
 0x495   : > { %v1423_v37 = vpop.permute.xlu0 %1422 }
 0x496   : > { %1967 = vrsqrt.f32 %v1180_v53  ;;  %v1177_v63 = vadd.f32 1e-05, %v1169_v54  ;;  %v1170_v61 = vmul.f32 0.125, %v1152_v29  ;;  %v1986_v29 = vld [vmem:[%s2577_s12 + $0x20] sm:$0xff] }
 0x498   : > { %1969 = vrsqrt.f32 %v1177_v63  ;;  %v1178_v32 = vadd.f32 1e-05, %v1170_v61 }
 0x499   : > { %v1431_v18 = vpop.permute.xlu0 %1430 }
 0x49a   : > { %1971 = vrsqrt.f32 %v1178_v32 }
 0x49e   : > { %v1966_v33 = vpop.eup %1965 }
 0x49f   : > { %v1195_v4 = vmul.f32 %v1966_v33, %v2849_v20 }
 0x4a0   : > { %v1968_v40 = vpop.eup %1967 }
 0x4a1   : > { %v1317_v7 = vmul.f32 %v1305_v22, %v1195_v4  ;;  %v1196_v6 = vmul.f32 %v1968_v40, %v2857_v24  ;;  %v1987_v22 = vld [vmem:[%s2577_s12 + $0x38] sm:$0xff] }
 0x4a2   : > { %v1970_v59 = vpop.eup %1969 }
 0x4a3   : > { %v1193_v8 = vmul.f32 %v1970_v59, %v2852_v23  ;;  %v1318_v15 = vmul.f32 %v1309_v38, %v1196_v6  ;;  %v1439_v39 = vadd.f32 %v1427_v56, %v1317_v7 }
 0x4a4   : > { %v1972_v16 = vpop.eup %1971 }
 0x4a5   : > { %v1194_v12 = vmul.f32 %v1972_v16, %v2860_v26  ;;  %v1315_v13 = vmul.f32 %v2895_v41, %v1193_v8  ;;  %v1455_v21 = vmul.f32 0.70710677, %v1439_v39  ;;  %v1440_v28 = vadd.f32 %v1431_v18, %v1318_v15 }
 0x4a6   : > { %v1447_v49 = vmul.f32 0.5, %v1439_v39 }
 0x4a7   : > { %v1316_v20 = vmul.f32 %v1301_v52, %v1194_v12  ;;  %v1437_v30 = vadd.f32 %v1419_v17, %v1315_v13  ;;  %v1456_v10 = vmul.f32 0.70710677, %v1440_v28  ;;  %1973 = verf.f32 %v1455_v21  ;;  %v1985_v52 = vld [vmem:[%s2577_s12 + $0x30] sm:$0xff]  ;;  %v1988_v17 = vld [vmem:[%s2577_s12 + $0x28] sm:$0xff] }
 0x4a8   : > { %v1448_v0 = vmul.f32 0.5, %v1440_v28 }
 0x4a9   : > { %v1453_v11 = vmul.f32 0.70710677, %v1437_v30  ;;  %v1438_v24 = vadd.f32 %v1423_v37, %v1316_v20  ;;  %1975 = verf.f32 %v1456_v10  ;;  %v1445_v5 = vmul.f32 0.5, %v1437_v30 }
 0x4ab   : > { %1977 = verf.f32 %v1453_v11  ;;  %v1454_v44 = vmul.f32 0.70710677, %v1438_v24  ;;  %v1446_v58 = vmul.f32 0.5, %v1438_v24 }
 0x4ad   : > { %1979 = verf.f32 %v1454_v44 }
 0x4b1   : > { %v1974_v23 = vpop.eup %1973 }
 0x4b2   : > { %v1471_v41 = vadd.f32 1.0, %v1974_v23 }
 0x4b3   : > { %v1976_v14 = vpop.eup %1975 }
 0x4b4   : > { %v1472_v48 = vadd.f32 1.0, %v1976_v14  ;;  %v1479_v62 = vmul.f32 %v1471_v41, %v1447_v49 }
 0x4b5   : > { %v1978_v9 = vpop.eup %1977 }
 0x4b6   : > { %v1469_v26 = vadd.f32 1.0, %v1978_v9  ;;  %v1480_v57 = vmul.f32 %v1472_v48, %v1448_v0 }
 0x4b7   : > { %v1980_v3 = vpop.eup %1979 }
 0x4b8   : > { %v1470_v43 = vadd.f32 1.0, %v1980_v3  ;;  %v1477_v34 = vmul.f32 %v1469_v26, %v1445_v5  ;;  %v1484_v46 = vpack.c.bf16 %v1480_v57, %v1479_v62 }
 0x4ba   : > { %v1478_v25 = vmul.f32 %v1470_v43, %v1446_v58 }
 0x4bc   : > { %v1483_v45 = vpack.c.bf16 %v1478_v25, %v1477_v34 }
 0x4be   : > { %1790 = vmatprep.mubr.msk.bf16.mxu1 %vm979_vm1, %v1483_v45 }
 0x4bf   : > { %1791 = vmatmul.mubr.msk.bf16.gmra.mrb[4].mxu1 %vm979_vm1, %v1484_v46 }
 0x559   : > { %v1788_v31 = vpop.f32.mrb[0].mxu1 }
 0x55a   : > { %v1569_v55 = vadd.f32 %v1981_v19, %v1788_v31  ;;  %v1536_v35 = vpop.f32.mrb[1].mxu1 }
 0x55b   : > { %v1567_v36 = vadd.f32 %v1982_v2, %v1536_v35  ;;  %v1789_v1 = vpop.f32.mrb[2].mxu1 }
 0x55c   : > { %1577 = vst.msk [vmem:[%s373_s8 + $0x10] sm:$0xff] %vm385_vm0, %v1569_v55  ;;  %v1570_v47 = vadd.f32 %v1983_v42, %v1789_v1  ;;  %v1539_v60 = vpop.f32.mrb[3].mxu1 }
 0x55d   : > { %1575 = vst.msk [vmem:[%s373_s8] sm:$0xff] %vm385_vm0, %v1567_v36  ;;  %v1568_v51 = vadd.f32 %v1984_v50, %v1539_v60 }
 0x55e   : > { %1578 = vst.msk [vmem:[%s373_s8 + $0x18] sm:$0xff] %vm385_vm0, %v1570_v47 }
 0x55f   : > { %1576 = vst.msk [vmem:[%s373_s8 + $0x8] sm:$0xff] %vm385_vm0, %v1568_v51 }
 0x592   : > { %v1792_v27 = vpop.f32.mrb[4].mxu1 }
 0x593   : > { %v1573_v53 = vadd.f32 %v1985_v52, %v1792_v27  ;;  %v1552_v54 = vpop.f32.mrb[5].mxu1 }
 0x594   : > { %v1571_v63 = vadd.f32 %v1986_v29, %v1552_v54  ;;  %v1793_v61 = vpop.f32.mrb[6].mxu1 }
 0x595   : > { %1581 = vst.msk [vmem:[%s373_s8 + $0x30] sm:$0xff] %vm385_vm0, %v1573_v53  ;;  %v1574_v32 = vadd.f32 %v1987_v22, %v1793_v61  ;;  %v1555_v38 = vpop.f32.mrb[7].mxu1 }
 0x596   : > { %1579 = vst.msk [vmem:[%s373_s8 + $0x20] sm:$0xff] %vm385_vm0, %v1571_v63  ;;  %v1572_v33 = vadd.f32 %v1988_v17, %v1555_v38 }
 0x597   : > { %1582 = vst.msk [vmem:[%s373_s8 + $0x38] sm:$0xff] %vm385_vm0, %v1574_v32 }
 0x598   : > { %1580 = vst.msk [vmem:[%s373_s8 + $0x28] sm:$0xff] %vm385_vm0, %v1572_v33 }
 0x599   : > { %2200 = shalt.err (!%p2197_p8)
}
 0x59a   : > { %s2201_s9 = scalar_lea.hbm %s2931_s15, 1024  ;;  %s2205_s8 = scalar_lea.hbm %s2988_s7, 2048 }
 0x59b   : > { %p2202_p13 = scmp.ne.s32.totalorder %s2931_s15, %s2201_s9  ;;  %p2206_p9 = scmp.lt.u32.totalorder %s2931_s15, %s2988_s7 }
 0x59c   : > { %p2207_p10 = scmp.lt.u32.totalorder %s2205_s8, %s2201_s9  ;;  %p2209_p6 = scmp.lt.u32.totalorder %s2201_s9, %s2931_s15 }
 0x59d   : > { %p2203_p0 = pnand %p2202_p13, %p3008_p12 }
 0x59e   : > { %p2208_p11 = por %p2207_p10, %p2206_p9 }
 0x59f   : > { %p2204_p2 = pneg %p2203_p0 }
 0x5a0   : > { %p2210_p5 = por %p2209_p6, %p2208_p11 }
 0x5a2   : > { %p2211_p7 = pnand %p2210_p5, %p2204_p2 }
 0x5a4   : > { %2214 = shalt.err (!%p2211_p7)
}
 0x5a5   : > { %s2281_s19 = smov 128   ;;  %s2282_s20 = smov 8  }
 0x5a6   : > { %1821 = dma.vmem_to_hbm [thread:$0]  (%p3008_p12), %s2933_s23, 1024, %s2931_s15, %s1584_s30, %s2281_s19, %s2281_s19, %s2282_s20  }
 0x5a7 PF: > { %s1612_s22 = sand.u32 1, %s2253_s24   ;;  %p3009_p4 = scmp.ne.s32.totalorder %s2999_s29, 0 }
 0x5a8   : > { %p3010_p1 = scmp.ge.s32.totalorder %s2265_s27, 2  ;;  %s1613_s21 = scalar_lea.sflag [#allocation4], %s1612_s22 }
 0x5aa   : > { %p1847_p3 = pnand %p3010_p1, %p3009_p4 }
 0x5ac   : > { %2248 = dma.done.wait (!%p1847_p3), %s1613_s21, 1024  }
 0x5ad   : > { %2250 = vsyncadd (!%p1847_p3), %s1613_s21, 4294966272  ;;  %p23_p8 = scmp.ge.s32.totalorder %s2492_s11, 4   ;;  %s3011_s24 = smov %s2257_s25 }
 0x5ae   : > { %s3012_s25 = smov %s2261_s26  ;;  %s3013_s26 = smov %s2503_s16 }
 0x5af   : > { %s3014_s27 = smov %s2492_s11  ;;  %25 = sbr.rel (!%p23_p8) target bundleno = 8 (0x8), region = 117 }
 0x5b6   :  { %1618 = vsyncpa [#allocation3], 1 }
 0x5b7   :  { %1620 = vsyncpa [#allocation3 + $0x1], 1 }
 0x5b8   :  { %1621 = vsyncpa [#allocation6], 1 }
 0x5b9   :  { %1622 = vsyncpa [#allocation9], 1 }
 0x5ba   :  { %1623 = vsyncpa [#allocation12], 1 }
 0x5bb   :  { %1624 = vsyncpa [#allocation4], 1 }
 0x5bc   :  { %1626 = vsyncpa [#allocation4 + $0x1], 1 }

// kernel: mdx_forward.11
= control target key start
LH: loop header
LB: loop body
LE: loop exit
PB: predicated region body
PF: predicated region fallthrough
CT: control target
= control target key end

     0   :  { %s1479_s0 = inlined_call_operand.hbm [shape: f32[2,8,128], index: 0, kind: input, shape index: {}]   ;;  %s1480_s1 = inlined_call_operand.hbm [shape: f32[2,8,128], index: 1, kind: input, shape index: {}]   ;;  %s1481_s2 = inlined_call_operand.hbm [shape: f32[9,128], index: 2, kind: input, shape index: {}]   ;;  %s1482_s3 = inlined_call_operand.hbm [shape: f32[8,1], index: 3, kind: input, shape index: {}]   ;;  %s1483_s4 = inlined_call_operand.hbm [shape: f32[8,1], index: 4, kind: input, shape index: {}]   ;;  %s1484_s5 = inlined_call_operand.hbm [shape: bf16[8,80], index: 5, kind: input, shape index: {}]   ;;  %s1485_s6 = inlined_call_operand.hbm [shape: f32[2,8,128], index: 6, kind: output, shape index: {}]  }
   0x1   :  { %1490 = sst [smem:[#allocation21_spill]] %s1481_s2 }
   0x2   :  { %1491 = sst [smem:[#allocation22_spill]] %s1482_s3 }
   0x3   :  { %1492 = sst [smem:[#allocation23_spill]] %s1483_s4 }
   0x4   :  { %11 = vsyncpa [#allocation4], 0 }
   0x5   :  { %13 = vsyncpa [#allocation4 + $0x1], 0 }
   0x6   :  { %14 = vsyncpa [#allocation7], 0 }
   0x7   :  { %16 = vsyncpa [#allocation7 + $0x1], 0 }
   0x8   :  { %17 = vsyncpa [#allocation10], 0 }
   0x9   :  { %18 = vsyncpa [#allocation13], 0 }
   0xa   :  { %19 = vsyncpa [#allocation5], 0 }
   0xb   :  { %21 = vsyncpa [#allocation5 + $0x1], 0  ;;  %s1146_s21 = smov 0   ;;  %s1148_s22 = smov 0  }
   0xc   :  { %s1150_s23 = smov 0   ;;  %s1152_s24 = smov 0  }
   0xd LB: > { %s1091_s25 = smov [#allocation8]   ;;  %s1167_s27 = sadd.s32 4294967295, %s1089_s24   ;;  %s1089_s24 = sphi %s1152_s24, %s1519_s24   ;;  %s1085_s23 = sphi %s1150_s23, %s1518_s23   ;;  %s1081_s22 = sphi %s1148_s22, %s1517_s22   ;;  %s1077_s21 = sphi %s1146_s21, %s1516_s21  }
   0xe   : > { %s206_s26 = sshll.u32 %s1091_s25, 4  ;;  %p680_p0 = scmp.ge.s32.totalorder %s1089_s24, 1  ;;  %s1172_s26 = int_to_ptr.vmem [resolvable:$true] %s206_s26 }
   0xf   : > { %p1486_p1 = scmp.eq.s32.totalorder %s1167_s27, 0  ;;  %p194_p2 = scmp.lt.s32.totalorder %s1089_s24, 3 }
  0x10   : > { %s1092_s29 = smov [#allocation9]   ;;  %s1093_s8 = smov [#allocation11]  }
  0x11   : > { %p1174_p3 = pnand %p680_p0, %p194_p2  ;;  %s220_s30 = sshll.u32 %s1092_s29, 4  ;;  %s1187_s30 = int_to_ptr.vmem [resolvable:$true] %s220_s30 }
  0x12   : > { %s231_s9 = sshll.u32 %s1093_s8, 4  ;;  %s1495_s2 = sld [smem:[#allocation21_spill]]  ;;  %s1189_s9 = int_to_ptr.vmem [resolvable:$true] %s231_s9 }
  0x13   : > { %s1493_s28 = scalar_select %p1174_p3, 1, 0 }
  0x14   : > { %p746_p5 = pneg %p1174_p3 }
  0x16   : > { %p1183_p6 = pnand %p746_p5, %p1486_p1 }
  0x18   : > { %s835_s12 = scalar_lea.hbm %s1495_s2, 256  ;;  %p1199_p8 = pneg %p1183_p6 }
  0x19   : > { %p836_p7 = scmp.ne.s32.totalorder %s1495_s2, %s835_s12  ;;  %p842_p11 = scmp.lt.u32.totalorder %s835_s12, %s1495_s2 }
  0x1b   : > { %p838_p9 = pnand %p1199_p8, %p836_p7 }
  0x1d   : > { %p839_p10 = pneg %p838_p9 }
  0x1f   : > { %p844_p12 = pnand %p842_p11, %p839_p10 }
  0x21   : > { %847 = shalt.err (!%p844_p12)
}
  0x22   : > { %s848_s18 = scalar_lea.vmem %s1172_s26, 256  ;;  %p856_p5 = scmp.lt.s32.totalorder %s1172_s26, %s1172_s26 }
  0x23   : > { %p849_p13 = scmp.ne.s32.totalorder %s1172_s26, %s848_s18  ;;  %p857_p4 = scmp.lt.s32.totalorder %s848_s18, %s848_s18 }
  0x25   : > { %p851_p0 = pnand %p849_p13, %p1199_p8  ;;  %p858_p7 = por %p857_p4, %p856_p5 }
  0x27   : > { %p852_p2 = pneg %p851_p0 }
  0x29   : > { %p859_p9 = pnand %p858_p7, %p852_p2 }
  0x2b   : > { %862 = shalt.err (!%p859_p9)
}
  0x2c   : > { %s1094_s19 = smov 128   ;;  %s1095_s20 = smov 8  }
  0x2d   : > { %749 = dma.hbm_to_vmem [thread:$0]  (!%p1183_p6), %s1495_s2, 256, %s1172_s26, [#allocation7], %s1094_s19, %s1094_s19, %s1095_s20  }
  0x2e   : > { %s1497_s3 = sld [smem:[#allocation22_spill]] }
  0x34   : > { %s863_s11 = scalar_lea.hbm %s1497_s3, 128 }
  0x35   : > { %p864_p4 = scmp.ne.s32.totalorder %s1497_s3, %s863_s11  ;;  %p870_p12 = scmp.lt.u32.totalorder %s863_s11, %s1497_s3 }
  0x37   : > { %p866_p10 = pnand %p864_p4, %p1199_p8 }
  0x39   : > { %p867_p11 = pneg %p866_p10 }
  0x3b   : > { %p872_p13 = pnand %p870_p12, %p867_p11 }
  0x3d   : > { %875 = shalt.err (!%p872_p13)
}
  0x3e   : > { %s876_s26 = scalar_lea.vmem %s1187_s30, 128  ;;  %p884_p7 = scmp.lt.s32.totalorder %s1187_s30, %s1187_s30 }
  0x3f   : > { %p877_p0 = scmp.ne.s32.totalorder %s1187_s30, %s876_s26  ;;  %p885_p9 = scmp.lt.s32.totalorder %s876_s26, %s876_s26 }
  0x41   : > { %p879_p2 = pnand %p877_p0, %p1199_p8  ;;  %p886_p4 = por %p885_p9, %p884_p7 }
  0x43   : > { %p880_p5 = pneg %p879_p2 }
  0x45   : > { %p887_p10 = pnand %p886_p4, %p880_p5 }
  0x47   : > { %890 = shalt.err (!%p887_p10)
}
  0x48   : > { %752 = dma.hbm_to_vmem [thread:$0]  (!%p1183_p6), %s1497_s3, 128, %s1187_s30, [#allocation10]  }
  0x49   : > { %s1498_s4 = sld [smem:[#allocation23_spill]] }
  0x4f   : > { %s891_s25 = scalar_lea.hbm %s1498_s4, 128 }
  0x50   : > { %p892_p11 = scmp.ne.s32.totalorder %s1498_s4, %s891_s25  ;;  %p898_p0 = scmp.lt.u32.totalorder %s891_s25, %s1498_s4 }
  0x52   : > { %p894_p12 = pnand %p892_p11, %p1199_p8 }
  0x54   : > { %p895_p13 = pneg %p894_p12 }
  0x56   : > { %p900_p2 = pnand %p898_p0, %p895_p13 }
  0x58   : > { %903 = shalt.err (!%p900_p2)
}
  0x59   : > { %s904_s30 = scalar_lea.vmem %s1189_s9, 128  ;;  %p912_p4 = scmp.lt.s32.totalorder %s1189_s9, %s1189_s9 }
  0x5a   : > { %p905_p5 = scmp.ne.s32.totalorder %s1189_s9, %s904_s30  ;;  %p913_p10 = scmp.lt.s32.totalorder %s904_s30, %s904_s30 }
  0x5c   : > { %p907_p7 = pnand %p905_p5, %p1199_p8  ;;  %p914_p11 = por %p913_p10, %p912_p4 }
  0x5e   : > { %p908_p9 = pneg %p907_p7 }
  0x60   : > { %p915_p12 = pnand %p914_p11, %p908_p9 }
  0x62   : > { %918 = shalt.err (!%p915_p12)
}
  0x63   : > { %755 = dma.hbm_to_vmem [thread:$0]  (!%p1183_p6), %s1498_s4, 128, %s1189_s9, [#allocation10]  }
  0x64   : > { %s1096_s14 = smov [#allocation12]   ;;  %s919_s18 = scalar_lea.hbm %s1484_s5, 64 }
  0x65   : > { %s242_s16 = sshll.u32 %s1096_s14, 4  ;;  %p920_p13 = scmp.ne.s32.totalorder %s1484_s5, %s919_s18  ;;  %s243_s16 = int_to_ptr.vmem [resolvable:$true] %s242_s16 }
  0x66   : > { %p926_p5 = scmp.lt.u32.totalorder %s919_s18, %s1484_s5 }
  0x67   : > { %p922_p0 = pnand %p920_p13, %p1199_p8 }
  0x69   : > { %p923_p2 = pneg %p922_p0 }
  0x6b   : > { %p928_p7 = pnand %p926_p5, %p923_p2 }
  0x6d   : > { %931 = shalt.err (!%p928_p7)
}
  0x6e   : > { %s932_s9 = scalar_lea.vmem %s243_s16, 64  ;;  %p940_p11 = scmp.lt.s32.totalorder %s243_s16, %s243_s16 }
  0x6f   : > { %p933_p9 = scmp.ne.s32.totalorder %s243_s16, %s932_s9  ;;  %p941_p12 = scmp.lt.s32.totalorder %s932_s9, %s932_s9 }
  0x71   : > { %p935_p4 = pnand %p933_p9, %p1199_p8  ;;  %p942_p1 = por %p941_p12, %p940_p11 }
  0x73   : > { %p936_p10 = pneg %p935_p4 }
  0x75   : > { %p943_p3 = pnand %p942_p1, %p936_p10 }
  0x77   : > { %946 = shalt.err (!%p943_p3)
}
  0x78   : > { %758 = dma.hbm_to_vmem [thread:$0]  (!%p1183_p6), %s1484_s5, 64, %s243_s16, [#allocation13]  }
  0x79   : > { %s679_s15 = sadd.s32 4294967294, %s1089_s24   ;;  %s1286_s7 = sadd.s32 1, %s1089_s24  }
  0x7a   : > { %s31_s11 = ssub.s32 %s1089_s24, %s1286_s7  ;;  %s34_s30 = sadd.s32 1, %s1085_s23 }
  0x7b   : > { %p32_p1 = scmp.eq.s32.totalorder %s31_s11, 0  ;;  %p41_p3 = scmp.ne.s32.totalorder %s1085_s23, %s1081_s22 }
  0x7c   : > { %p42_p8 = scmp.eq.s32.totalorder %s1089_s24, 0  ;;  %p47_p13 = scmp.ne.s32.totalorder %s1081_s22, %s1077_s21 }
  0x7d   : > { %s1297_s12 = scalar_select %p32_p1, %s1085_s23, %s34_s30  }
  0x7e   : > { %p1299_p0 = por %p42_p8, %p41_p3  ;;  %p1500_p2 = scmp.eq.s32.totalorder %s1167_s27, 0 }
  0x7f   : > { %p181_p5 = scmp.eq.s32.totalorder %s1167_s27, 1  ;;  %p187_p7 = scmp.eq.s32.totalorder %s679_s15, 1 }
  0x80   : > { %p1305_p6 = por %p1500_p2, %p47_p13  ;;  %p774_p9 = scmp.lt.s32.totalorder %s1089_s24, 2 }
  0x81   : > { %s253_s16 = sand.u32 1, %s1085_s23   ;;  %p1312_p4 = por %p181_p5, %p41_p3 }
  0x82   : > { %s1501_s14 = scalar_select %p1305_p6, 1, 0 }
  0x83   : > { %s1502_s26 = scalar_select %p1312_p4, 1, 0 }
  0x84   : > { %p1316_p10 = por %p187_p7, %p47_p13  ;;  %s1320_s18 = sshll.u32 %s253_s16, 3 }
  0x85   : > { %s687_s19 = sshll.u32 %s1089_s24, 7  ;;  %s257_s9 = scalar_lea.vmem [#allocation3], %s1320_s18 }
  0x86   : > { %s1503_s17 = scalar_select %p1316_p10, 1, 0 }
  0x87   : > { %s1326_s29 = scalar_lea.hbm %s1479_s0, %s687_s19  ;;  %s264_s8 = sshll.u32 %s257_s9, 4  ;;  %s1329_s8 = int_to_ptr.vmem [resolvable:$true] %s264_s8 }
  0x88   : > { %p1333_p11 = pnand %p774_p9, %p1299_p0  ;;  %s1340_s30 = scalar_lea.hbm %s1480_s1, %s687_s19 }
  0x89   : > { %s271_s20 = sand.u32 1, %s1089_s24   ;;  %s254_s25 = scalar_lea.sflag [#allocation4], %s253_s16 }
  0x8a   : > { %s947_s2 = scalar_lea.hbm %s1326_s29, 128  ;;  %p949_p1 = pneg %p1333_p11 }
  0x8b   : > { %p948_p12 = scmp.ne.s32.totalorder %s1326_s29, %s947_s2  ;;  %s952_s3 = scalar_lea.hbm %s1479_s0, 256 }
  0x8c   : > { %p953_p13 = scmp.lt.u32.totalorder %s1326_s29, %s1479_s0  ;;  %p954_p0 = scmp.lt.u32.totalorder %s952_s3, %s947_s2 }
  0x8d   : > { %p950_p3 = pnand %p949_p1, %p948_p12  ;;  %p956_p5 = scmp.lt.u32.totalorder %s947_s2, %s1326_s29 }
  0x8e   : > { %p955_p2 = por %p954_p0, %p953_p13 }
  0x8f   : > { %p951_p8 = pneg %p950_p3 }
  0x90   : > { %p957_p7 = por %p956_p5, %p955_p2 }
  0x92   : > { %p958_p9 = pnand %p957_p7, %p951_p8 }
  0x94   : > { %961 = shalt.err (!%p958_p9)
}
  0x95   : > { %s962_s16 = scalar_lea.vmem %s1329_s8, 128  ;;  %s1097_s19 = smov [#allocation3]  }
  0x96   : > { %p963_p12 = scmp.ne.s32.totalorder %s1329_s8, %s962_s16  ;;  %s967_s11 = sshll.u32 %s1097_s19, 4  ;;  %s968_s11 = int_to_ptr.vmem [resolvable:$false] %s967_s11 }
  0x97   : > { %s969_s4 = scalar_lea.vmem %s968_s11, 256  ;;  %p970_p4 = scmp.lt.s32.totalorder %s1329_s8, %s968_s11 }
  0x98   : > { %p965_p3 = pnand %p963_p12, %p949_p1  ;;  %p971_p13 = scmp.lt.s32.totalorder %s969_s4, %s962_s16 }
  0x9a   : > { %p966_p10 = pneg %p965_p3  ;;  %p972_p0 = por %p971_p13, %p970_p4 }
  0x9c   : > { %p973_p2 = pnand %p972_p0, %p966_p10 }
  0x9e   : > { %976 = shalt.err (!%p973_p2)
}
  0x9f   : > { %762 = dma.hbm_to_vmem [thread:$0]  (!%p1333_p11), %s1326_s29, 128, %s1329_s8, %s254_s25  }
  0xa0   : > { %s275_s2 = scalar_lea.vmem [#allocation6], %s1320_s18  ;;  %s272_s13 = scalar_lea.sflag [#allocation7], %s271_s20 }
  0xa1   : > { %s282_s3 = sshll.u32 %s275_s2, 4  ;;  %s977_s9 = scalar_lea.hbm %s1340_s30, 128  ;;  %s283_s3 = int_to_ptr.vmem [resolvable:$true] %s282_s3 }
  0xa2   : > { %p978_p4 = scmp.ne.s32.totalorder %s1340_s30, %s977_s9  ;;  %s982_s19 = scalar_lea.hbm %s1480_s1, 256 }
  0xa3   : > { %p983_p5 = scmp.lt.u32.totalorder %s1340_s30, %s1480_s1  ;;  %p984_p7 = scmp.lt.u32.totalorder %s982_s19, %s977_s9 }
  0xa4   : > { %p980_p10 = pnand %p978_p4, %p949_p1  ;;  %p986_p12 = scmp.lt.u32.totalorder %s977_s9, %s1340_s30 }
  0xa5   : > { %p985_p9 = por %p984_p7, %p983_p5 }
  0xa6   : > { %p981_p8 = pneg %p980_p10 }
  0xa7   : > { %p987_p3 = por %p986_p12, %p985_p9 }
  0xa9   : > { %p988_p13 = pnand %p987_p3, %p981_p8 }
  0xab   : > { %991 = shalt.err (!%p988_p13)
}
  0xac   : > { %s992_s18 = scalar_lea.vmem %s283_s3, 128  ;;  %s1098_s29 = smov [#allocation6]  }
  0xad   : > { %p993_p0 = scmp.ne.s32.totalorder %s283_s3, %s992_s18  ;;  %s997_s8 = sshll.u32 %s1098_s29, 4  ;;  %s998_s8 = int_to_ptr.vmem [resolvable:$false] %s997_s8 }
  0xae   : > { %s999_s20 = scalar_lea.vmem %s998_s8, 256  ;;  %p1000_p10 = scmp.lt.s32.totalorder %s283_s3, %s998_s8 }
  0xaf   : > { %p995_p2 = pnand %p993_p0, %p949_p1  ;;  %p1001_p6 = scmp.lt.s32.totalorder %s999_s20, %s992_s18 }
  0xb1   : > { %p996_p4 = pneg %p995_p2  ;;  %p1002_p5 = por %p1001_p6, %p1000_p10 }
  0xb3   : > { %p1003_p7 = pnand %p1002_p5, %p996_p4 }
  0xb5   : > { %1006 = shalt.err (!%p1003_p7)
}
  0xb6   : > { %765 = dma.hbm_to_vmem [thread:$0]  (!%p1333_p11), %s1340_s30, 128, %s283_s3, %s272_s13  }
  0xb7   : > { %p1505_p8 = scmp.ne.s32.totalorder %s1493_s28, 0 }
  0xb8   : > { %s1393_s25 = sand.u32 (!%p1505_p8), 1, %s1081_s22   ;;  %p1506_p6 = scmp.ne.s32.totalorder (!%p1505_p8), %s1501_s14, 0 }
  0xb9   : > { %291 = sbr.rel (%p1505_p8) target bundleno = 916 (0x394), region = 44  ;;  %s1396_s2 = sshll.u32 (!%p1505_p8), %s1393_s25, 3 }
  0xba   : > { %s294_s9 = scalar_lea.sflag (!%p1505_p8), [#allocation4], %s1393_s25  ;;  %s297_s15 = scalar_lea.vmem (!%p1505_p8), [#allocation3], %s1396_s2 }
  0xc0   : > { %1052 = dma.done.wait (%p1506_p6), %s294_s9, 128  }
  0xc1   : > { %1054 = vsyncadd (%p1506_p6), %s294_s9, 4294967168  ;;  %s302_s28 = sand.u32 1, %s1167_s27   ;;  %s306_s30 = scalar_lea.vmem [#allocation6], %s1396_s2 }
  0xc2   : > { %s303_s10 = scalar_lea.sflag [#allocation7], %s302_s28 }
  0xc3   : > { %1056 = dma.done.wait (%p1506_p6), %s303_s10, 128  }
  0xc4   : > { %1058 = vsyncadd (%p1506_p6), %s303_s10, 4294967168  ;;  %p1507_p11 = scmp.eq.s32.totalorder %s1167_s27, 0 }
  0xc6   : > { %1060 = dma.done.wait (%p1507_p11), [#allocation7], 256   ;;  %p1508_p1 = pmov %p1507_p11 }
  0xc8   : > { %1062 = vsyncadd (%p1508_p1), [#allocation7], 4294967040  ;;  %p1509_p9 = pmov %p1508_p1 }
  0xc9   : > { %p1510_p12 = pmov %p1508_p1 }
  0xca   : > { %1064 = dma.done.wait (%p1509_p9), [#allocation10], 256  }
  0xcb   : > { %1066 = vsyncadd (%p1510_p12), [#allocation10], 4294967040  ;;  %p1511_p3 = pmov %p1508_p1 }
  0xcc   : > { %p1512_p13 = pmov %p1508_p1 }
  0xcd   : > { %1068 = dma.done.wait (%p1511_p3), [#allocation13], 64  }
  0xce   : > { %1070 = vsyncadd (%p1512_p13), [#allocation13], 4294967232  ;;  %v357_v0 = vld [vmem:[%s297_s15] sm:$0xff]  ;;  %v358_v1 = vld [vmem:[#allocation9] sm:$0xff]  ;;  %v1099_v2 = vmov 0   ;;  %s1100_s14 = smov 17   ;;  %v393_v27 = vlaneseq }
  0xcf   : > { %360 = vadd.xlane.f32.xlu0 %v357_v0  ;;  %829 = vset.pattern.permute.xlu1 %v1099_v2  ;;  %v359_v3 = vld [vmem:[#allocation11] sm:$0xff]  ;;  %s1101_s3 = smov 16   ;;  %v1102_v26 = vmov 0.0   ;;  %s1103_s13 = smov 1   ;;  %vm1109_vm0 = vmmov 0   ;;  %v389_v31 = vld [vmem:[#allocation8] sm:$0xff] }
  0xd0   : > { %830 = vset.pattern.permute.xlu0 %v1099_v2  ;;  %374 = vperm.xlu1 %829, %v358_v1   ;;  %v477_v18 = vld [vmem:[%s306_s30] sm:$0xff]  ;;  %s1104_s16 = smov 111   ;;  %s1105_s19 = smov 15   ;;  %v394_v28 = vshrl.u32 %v393_v27, 7  ;;  %v698_v41 = vld [vmem:[#allocation8 + $0x8] ss:$0 sm:$0xff] }
  0xd1   : > { %v478_v19 = vpack.c.bf16 %v477_v18, %v477_v18  ;;  %710 = vmatprep.subr.bf16.mxu0 %v1102_v26  ;;  %s1106_s11 = smov 127   ;;  %s1107_s4 = smov 112   ;;  %720 = vmatprep.mubr.msk.bf16.mxu0 %vm1109_vm0, %v1102_v26  ;;  %vm489_vm1 = vcmask 654336  }
  0xd2   : > { %s1108_s18 = smov 113   ;;  %v395_v29 = vsub.s32 0, %v394_v28  ;;  %v404_v30 = vsub.s32 1, %v394_v28  ;;  %v425_v34 = vsub.s32 3, %v394_v28  ;;  %v416_v37 = vsub.s32 2, %v394_v28  ;;  %s355_s29 = scalar_lea.vmem [#allocation14], %s1396_s2 }
  0xd3   : > { %v480_v20 = vrot.slane %v478_v19, 4  ;;  %v439_v50 = vsub.s32 5, %v394_v28  ;;  %v460_v57 = vsub.s32 7, %v394_v28  ;;  %v451_v62 = vsub.s32 6, %v394_v28  ;;  %s548_s8 = sshll.u32 %s355_s29, 4  ;;  %s701_s20 = sshll.u32 %s1167_s27, 7  ;;  %s1432_s8 = int_to_ptr.vmem [resolvable:$true] %s548_s8 }
  0xd4   : > { %380 = vperm.xlu1 %829, %v359_v3   ;;  %v396_v32 = vrot.slane %v389_v31, %v395_v29  ;;  %v405_v33 = vrot.slane %v389_v31, %v404_v30  ;;  %v426_v40 = vrot.slane %v389_v31, %v425_v34  ;;  %v417_v46 = vrot.slane %v389_v31, %v416_v37  ;;  %s1437_s28 = scalar_lea.hbm %s1485_s6, %s701_s20  ;;  %s535_s10 = scalar_lea.sflag [#allocation5], %s1393_s25 }
  0xd5   : > { %482 = vst [vmem:[#allocation2 + $0x20] sm:$0xf0] %v480_v20  ;;  %v440_v56 = vrot.slane %v389_v31, %v439_v50  ;;  %v461_v61 = vrot.slane %v389_v31, %v460_v57  ;;  %s1007_s30 = scalar_lea.vmem %s1432_s8, 128  ;;  %p1513_p2 = scmp.ne.s32.totalorder %s1502_s26, 0 }
  0xd6   : > { %p1008_p0 = scmp.ne.s32.totalorder %s1432_s8, %s1007_s30  ;;  %s1110_s27 = smov [#allocation14]  }
  0xd7   : > { %s1011_s2 = sshll.u32 %s1110_s27, 4  ;;  %s1012_s2 = int_to_ptr.vmem [resolvable:$false] %s1011_s2 }
  0xd8   : > { %p1009_p4 = pnand %p1008_p0, %p1513_p2  ;;  %p1014_p5 = scmp.lt.s32.totalorder %s1432_s8, %s1012_s2 }
  0xda   : > { %p1010_p10 = pneg %p1009_p4 }
 0x14f   : > { %v375_v11 = vpop.permute.xlu1 %374 }
 0x153   : > { %v381_v15 = vpop.permute.xlu1 %380 }
 0x15c   : > { %v361_v4 = vpop.xlane.xlu0 %360 }
 0x15d   : > { %v363_v5 = vmul.f32 0.0078125, %v361_v4  ;;  %v452_v4 = vrot.slane %v389_v31, %v451_v62 }
 0x15f   : > { %v364_v6 = vsub.f32 %v357_v0, %v363_v5 }
 0x161   : > { %v365_v7 = vmul.f32 %v364_v6, %v364_v6 }
 0x163   : > { %366 = vadd.xlane.f32.xlu0 %v365_v7 }
 0x1f0   : > { %v367_v8 = vpop.xlane.xlu0 %366 }
 0x1f1   : > { %v368_v9 = vmul.f32 0.0078125, %v367_v8 }
 0x1f3   : > { %v369_v10 = vadd.f32 1e-05, %v368_v9 }
 0x1f5   : > { %831 = vrsqrt.f32 %v369_v10 }
 0x1ff   : > { %v832_v12 = vpop.eup %831 }
 0x200   : > { %v371_v13 = vmul.f32 %v832_v12, %v364_v6 }
 0x202   : > { %v377_v14 = vmul.f32 %v375_v11, %v371_v13 }
 0x204   : > { %v383_v16 = vadd.f32 %v381_v15, %v377_v14  ;;  %v483_v14 = vld [vmem:[#allocation12] sm:$0xf] }
 0x206   : > { %v385_v17 = vmul.f32 0.70710677, %v383_v16  ;;  %v384_v22 = vmul.f32 0.5, %v383_v16 }
 0x208   : > { %833 = verf.f32 %v385_v17 }
 0x212   : > { %v834_v21 = vpop.eup %833 }
 0x213   : > { %v387_v23 = vadd.f32 1.0, %v834_v21 }
 0x215   : > { %v388_v24 = vmul.f32 %v387_v23, %v384_v22 }
 0x217   : > { %391 = vrot.lane.b32.xlu1 %v388_v24, %s1100_s14  ;;  %400 = vrot.lane.b32.xlu0 %v388_v24, %s1101_s3  ;;  %v433_v25 = vpack.c.bf16 %v388_v24, %v388_v24  ;;  %s1013_s14 = scalar_lea.vmem %s1012_s2, 256 }
 0x218   : > { %p1015_p7 = scmp.lt.s32.totalorder %s1013_s14, %s1007_s30 }
 0x219   : > { %434 = vst [vmem:[#allocation2 + $0x10] sm:$0xf] %v433_v25 }
 0x21a   : > { %p1016_p8 = por %p1015_p7, %p1014_p5 }
 0x21b   : > { %421 = vrot.lane.b32.xlu1 %v388_v24, %s1103_s13  ;;  %468 = vrot.lane.b32.xlu0 %v388_v24, %s1104_s16 }
 0x21c   : > { %p1017_p6 = pnand %p1016_p8, %p1010_p10 }
 0x21f   : > { %412 = vrot.lane.b32.xlu1 %v388_v24, %s1105_s19 }
 0x223   : > { %435 = vrot.lane.b32.xlu1 %v388_v24, %s1106_s11 }
 0x227   : > { %456 = vrot.lane.b32.xlu1 %v388_v24, %s1107_s4 }
 0x22b   : > { %447 = vrot.lane.b32.xlu1 %v388_v24, %s1108_s18 }
 0x289   : > { %v392_v35 = vpop.permute.xlu1 %391  ;;  %v401_v36 = vpop.permute.xlu0 %400 }
 0x28a   : > { %v397_v38 = vmul.f32 %v396_v32, %v392_v35  ;;  %v406_v39 = vmul.f32 %v405_v33, %v401_v36 }
 0x28c   : > { %v398_v42 = vpack.c.bf16 %v397_v38, %v397_v38  ;;  %v407_v43 = vpack.c.bf16 %v406_v39, %v406_v39 }
 0x28d   : > { %v422_v44 = vpop.permute.xlu1 %421  ;;  %v469_v45 = vpop.permute.xlu0 %468 }
 0x28e   : > { %399 = vst [vmem:[#allocation2] sm:$0xf] %v398_v42  ;;  %v409_v47 = vrot.slane %v407_v43, 4  ;;  %v427_v48 = vmul.f32 %v426_v40, %v422_v44  ;;  %v474_v49 = vmul.f32 %v698_v41, %v469_v45 }
 0x290   : > { %411 = vst [vmem:[#allocation2] sm:$0xf0] %v409_v47  ;;  %v428_v51 = vpack.c.bf16 %v427_v48, %v427_v48  ;;  %v475_v52 = vpack.c.bf16 %v474_v49, %v474_v49 }
 0x291   : > { %v413_v53 = vpop.permute.xlu1 %412 }
 0x292   : > { %v430_v54 = vrot.slane %v428_v51, 4  ;;  %476 = vst [vmem:[#allocation2 + $0x20] sm:$0xf] %v475_v52  ;;  %v418_v55 = vmul.f32 %v417_v46, %v413_v53 }
 0x294   : > { %432 = vst [vmem:[#allocation2 + $0x8] sm:$0xf0] %v430_v54  ;;  %v419_v58 = vpack.c.bf16 %v418_v55, %v418_v55 }
 0x295   : > { %v436_v59 = vpop.permute.xlu1 %435 }
 0x296   : > { %420 = vst [vmem:[#allocation2 + $0x8] sm:$0xf] %v419_v58  ;;  %v441_v60 = vmul.f32 %v440_v56, %v436_v59 }
 0x297   : > { %v484_v63 = vld [vmem:[#allocation2] sm:$0xff] }
 0x298   : > { %v442_v0 = vpack.c.bf16 %v441_v60, %v441_v60  ;;  %711 = vmatpush3.bf16.msra.mxu0 %v484_v63 }
 0x299   : > { %v457_v1 = vpop.permute.xlu1 %456  ;;  %712 = vmatprep.subr.bf16.mxu0 %v1102_v26  ;;  %v488_v13 = vld [vmem:[#allocation2 + $0x20] sm:$0xff] }
 0x29a   : > { %v444_v2 = vrot.slane %v442_v0, 4  ;;  %v462_v3 = vmul.f32 %v461_v61, %v457_v1 }
 0x29c   : > { %446 = vst [vmem:[#allocation2 + $0x10] sm:$0xf0] %v444_v2  ;;  %v463_v5 = vpack.c.bf16 %v462_v3, %v462_v3 }
 0x29d   : > { %v448_v6 = vpop.permute.xlu1 %447  ;;  %v485_v7 = vld [vmem:[#allocation2 + $0x8] sm:$0xff] }
 0x29e   : > { %v465_v8 = vrot.slane %v463_v5, 4  ;;  %v453_v9 = vmul.f32 %v452_v4, %v448_v6  ;;  %713 = vmatpush3.bf16.msra.mxu0 %v485_v7 }
 0x29f   : > { %714 = vmatprep.subr.bf16.mxu0 %v1102_v26 }
 0x2a0   : > { %467 = vst [vmem:[#allocation2 + $0x18] sm:$0xf0] %v465_v8  ;;  %v454_v10 = vpack.c.bf16 %v453_v9, %v453_v9 }
 0x2a2   : > { %455 = vst [vmem:[#allocation2 + $0x18] sm:$0xf] %v454_v10 }
 0x2a3   : > { %v486_v11 = vld [vmem:[#allocation2 + $0x10] sm:$0xff] }
 0x2a4   : > { %715 = vmatpush3.bf16.msra.mxu0 %v486_v11 }
 0x2a5   : > { %716 = vmatprep.subr.bf16.mxu0 %v1102_v26 }
 0x2a9   : > { %v487_v12 = vld [vmem:[#allocation2 + $0x18] sm:$0xff] }
 0x2aa   : > { %717 = vmatpush3.bf16.msra.mxu0 %v487_v12 }
 0x2ab   : > { %718 = vmatprep.subr.bf16.mxu0 %v1102_v26 }
 0x2ae   : > { %719 = vmatpush3.bf16.msra.mxu0 %v488_v13 }
 0x2b1   : > { %721 = vmatmul.mubr.msk.bf16.vlgmr.msra.gmra.mrb[0].mxu0 %vm489_vm1, %v483_v14 }
 0x384   : > { %v527_v15 = vpop.f32.mrb[0].mxu0 }
 0x385   : > { %533 = vst [vmem:[%s355_s29] sm:$0xff] %v527_v15  ;;  %v722_v16 = vpop.f32.mrb[1].mxu0 }
 0x386   : > { %v530_v17 = vpop.f32.mrb[2].mxu0 }
 0x387   : > { %1020 = shalt.err (!%p1017_p6)
}
 0x388   : > { %s1021_s25 = scalar_lea.hbm %s1437_s28, 128  ;;  %s1025_s16 = scalar_lea.hbm %s1485_s6, 256 }
 0x389   : > { %p1022_p11 = scmp.ne.s32.totalorder %s1437_s28, %s1021_s25  ;;  %p1026_p12 = scmp.lt.u32.totalorder %s1437_s28, %s1485_s6 }
 0x38a   : > { %p1027_p3 = scmp.lt.u32.totalorder %s1025_s16, %s1021_s25  ;;  %p1029_p0 = scmp.lt.u32.totalorder %s1021_s25, %s1437_s28 }
 0x38b   : > { %p1023_p1 = pnand %p1022_p11, %p1513_p2 }
 0x38c   : > { %p1028_p13 = por %p1027_p3, %p1026_p12 }
 0x38d   : > { %p1024_p9 = pneg %p1023_p1 }
 0x38e   : > { %p1030_p4 = por %p1029_p0, %p1028_p13 }
 0x390   : > { %p1031_p10 = pnand %p1030_p4, %p1024_p9 }
 0x392   : > { %1034 = shalt.err (!%p1031_p10)
}
 0x393   : > { %744 = dma.vmem_to_hbm [thread:$0]  (%p1513_p2), %s1432_s8, 128, %s1437_s28, %s535_s10   ;;  %v723_v18 = vpop.f32.mrb[3].mxu0 }
 0x394 PF: > { %s560_s4 = sand.u32 1, %s1077_s21   ;;  %p1514_p5 = scmp.ne.s32.totalorder %s1503_s17, 0 }
 0x395   : > { %p1515_p7 = scmp.ge.s32.totalorder %s1089_s24, 2  ;;  %s561_s18 = scalar_lea.sflag [#allocation5], %s560_s4 }
 0x397   : > { %p767_p8 = pnand %p1515_p7, %p1514_p5 }
 0x399   : > { %1072 = dma.done.wait (!%p767_p8), %s561_s18, 128  }
 0x39a   : > { %1074 = vsyncadd (!%p767_p8), %s561_s18, 4294967168  ;;  %p24_p6 = scmp.ge.s32.totalorder %s1286_s7, 4   ;;  %s1516_s21 = smov %s1081_s22 }
 0x39b   : > { %s1517_s22 = smov %s1085_s23  ;;  %s1518_s23 = smov %s1297_s12 }
 0x39c   : > { %s1519_s24 = smov %s1286_s7  ;;  %26 = sbr.rel (!%p24_p6) target bundleno = 13 (0xd), region = 118 }
 0x3a3   :  { %566 = vsyncpa [#allocation4], 1 }
 0x3a4   :  { %568 = vsyncpa [#allocation4 + $0x1], 1 }
 0x3a5   :  { %569 = vsyncpa [#allocation7], 1 }
 0x3a6   :  { %571 = vsyncpa [#allocation7 + $0x1], 1 }
 0x3a7   :  { %572 = vsyncpa [#allocation10], 1 }
 0x3a8   :  { %573 = vsyncpa [#allocation13], 1 }
 0x3a9   :  { %574 = vsyncpa [#allocation5], 1 }
 0x3aa   :  { %576 = vsyncpa [#allocation5 + $0x1], 1 }

</bundles_post_ra>
